<compile_context>
chip_gen: v6e
topology: v6e:2x2x1
jax: 0.10.0
libtpu: 0.0.40
codegen_flags: <defaults>
</compile_context>

<pallas_src>
import functools

import jax
import jax.numpy as jnp
import numpy as np
from jax.experimental import pallas as pl
from jax.experimental.pallas import tpu as pltpu  # noqa: F401  (TPU backend assumed)

LANE = 128  # TPU vreg lane width; all matmul N dims / padded channel dims use it.


# ---------------------------------------------------------------------------
# Pallas kernels
# ---------------------------------------------------------------------------
def _dense_kernel(x_ref, w_ref, b_ref, o_ref, *, apply_relu):
    # bf16 x bf16 -> f32 accumulate on the MXU; bias+ReLU epilogue in f32.
    acc = jnp.dot(x_ref[...], w_ref[...], preferred_element_type=jnp.float32)
    acc = acc + b_ref[...]                      # (1, N) broadcasts over rows
    if apply_relu:
        acc = jnp.maximum(acc, 0.0)
    o_ref[...] = acc.astype(o_ref.dtype)


def dense(x, w, b, *, apply_relu, out_dtype):
    """x: (M, K) bf16, w: (K, N) bf16, b: (1, N) f32 -> (M, N) out_dtype.

    Toy sizes: whole operands fit in VMEM, so full-array blocks with a
    trivial grid (block_shape == array shape satisfies the (8,128) rule).
    """
    M, K = x.shape
    K2, N = w.shape
    assert K == K2 and b.shape == (1, N), (x.shape, w.shape, b.shape)
    kernel = functools.partial(_dense_kernel, apply_relu=apply_relu)
    return pl.pallas_call(
        kernel,
        out_shape=jax.ShapeDtypeStruct((M, N), out_dtype),
        grid=(1,),
        in_specs=[
            pl.BlockSpec((M, K), lambda i: (0, 0)),
            pl.BlockSpec((K, N), lambda i: (0, 0)),
            pl.BlockSpec((1, N), lambda i: (0, 0)),
        ],
        out_specs=pl.BlockSpec((M, N), lambda i: (0, 0)),
    )(x, w, b)


def _mlp_kernel(x_ref, w1_ref, b1_ref, w2_ref, b2_ref, o_ref):
    # Fused fc1 (+ReLU) + fc2; hidden activation stays in VMEM/vregs.
    h = jnp.dot(x_ref[...], w1_ref[...], preferred_element_type=jnp.float32)
    h = jnp.maximum(h + b1_ref[...], 0.0)
    q = jnp.dot(h.astype(jnp.bfloat16), w2_ref[...],
                preferred_element_type=jnp.float32)
    o_ref[...] = q + b2_ref[...]


def mlp_head(x, w1, b1, w2, b2):
    """x: (B, K) bf16 -> (B, 128) f32 (Q-values padded to 128 lanes)."""
    M, K = x.shape
    hid = w1.shape[1]
    N = w2.shape[1]
    return pl.pallas_call(
        _mlp_kernel,
        out_shape=jax.ShapeDtypeStruct((M, N), jnp.float32),
        grid=(1,),
        in_specs=[
            pl.BlockSpec((M, K), lambda i: (0, 0)),
            pl.BlockSpec((K, hid), lambda i: (0, 0)),
            pl.BlockSpec((1, hid), lambda i: (0, 0)),
            pl.BlockSpec((hid, N), lambda i: (0, 0)),
            pl.BlockSpec((1, N), lambda i: (0, 0)),
        ],
        out_specs=pl.BlockSpec((M, N), lambda i: (0, 0)),
    )(x, w1, b1, w2, b2)


# ---------------------------------------------------------------------------
# Thin XLA glue: NHWC im2col (strided slices + concat on the minor axis only)
# ---------------------------------------------------------------------------
# TODO(synk): the stride-2 window gather itself is kept as XLA glue; an
# in-kernel version would need strided sublane gathers (pl.ds with stride).
def _im2col_nhwc(x, k, stride, k_target):
    """x: (B, H, W, C) -> (B*Ho*Wo, k_target), feature order (ki, kj, c)."""
    B, H, W, C = x.shape
    Ho = (H - k) // stride + 1
    Wo = (W - k) // stride + 1
    cols = [x[:, ki:ki + (Ho - 1) * stride + 1:stride,
              kj:kj + (Wo - 1) * stride + 1:stride, :]
            for ki in range(k) for kj in range(k)]
    feat = k * k * C
    if k_target > feat:                       # zero-pad K up to a lane multiple
        cols.append(jnp.zeros((B, Ho, Wo, k_target - feat), x.dtype))
    p = jnp.concatenate(cols, axis=-1)        # (B, Ho, Wo, k_target)
    return p.reshape(B * Ho * Wo, k_target), Ho, Wo


def conv2d_relu(x, w_packed, b_packed, *, k, stride):
    """x: (B, H, W, Cpad) bf16; w_packed: (k*k*Cpad_in, 128) bf16; -> NHWC bf16."""
    B = x.shape[0]
    patches, Ho, Wo = _im2col_nhwc(x, k, stride, w_packed.shape[0])
    y = dense(patches, w_packed, b_packed, apply_relu=True, out_dtype=jnp.bfloat16)
    return y.reshape(B, Ho, Wo, w_packed.shape[1])   # stays NHWC, lane-dense


# ---------------------------------------------------------------------------
# Parameters: torch-layout init + one-time packing (pad / transpose / bf16)
# ---------------------------------------------------------------------------
def _conv2d_size_out(size, kernel_size, stride):
    return (size - (kernel_size - 1) - 1) // stride + 1


def init_params(key, in_h, in_w, output_dim):
    conv_h = _conv2d_size_out(_conv2d_size_out(_conv2d_size_out(in_h, 5, 2), 5, 2), 3, 2)
    conv_w = _conv2d_size_out(_conv2d_size_out(_conv2d_size_out(in_w, 5, 2), 5, 2), 3, 2)
    conv_output_size = conv_h * conv_w * 64

    ks = jax.random.split(key, 10)

    def unif(k, shape, fan_in):
        bound = 1.0 / np.sqrt(fan_in)
        return jax.random.uniform(k, shape, jnp.float32, -bound, bound)

    return {
        "conv1_w": unif(ks[0], (32, 3, 5, 5), 3 * 5 * 5),
        "conv1_b": unif(ks[1], (32,), 3 * 5 * 5),
        "conv2_w": unif(ks[2], (64, 32, 5, 5), 32 * 5 * 5),
        "conv2_b": unif(ks[3], (64,), 32 * 5 * 5),
        "conv3_w": unif(ks[4], (64, 64, 3, 3), 64 * 3 * 3),
        "conv3_b": unif(ks[5], (64,), 64 * 3 * 3),
        "fc1_w": unif(ks[6], (512, conv_output_size), conv_output_size),
        "fc1_b": unif(ks[7], (512,), conv_output_size),
        "fc2_w": unif(ks[8], (output_dim, 512), 512),
        "fc2_b": unif(ks[9], (output_dim,), 512),
    }


def _pack_conv(w, b, *, cin_pad, rows_pad_to=None):
    """torch (Cout, Cin, k, k) -> ((k*k*cin_pad [padded]), 128) bf16, rows
    ordered (ki, kj, cin) to match _im2col_nhwc; Cout zero-padded to 128."""
    Cout, Cin, k, _ = w.shape
    wt = jnp.transpose(w, (2, 3, 1, 0))                                   # (k,k,Cin,Cout)
    wt = jnp.pad(wt, ((0, 0), (0, 0), (0, cin_pad - Cin), (0, LANE - Cout)))
    wp = wt.reshape(k * k * cin_pad, LANE)
    if rows_pad_to is not None and rows_pad_to > wp.shape[0]:
        wp = jnp.pad(wp, ((0, rows_pad_to - wp.shape[0]), (0, 0)))
    bp = jnp.pad(b, (0, LANE - Cout)).reshape(1, LANE).astype(jnp.float32)
    return wp.astype(jnp.bfloat16), bp


def pack_params(params, in_h, in_w):
    h3 = _conv2d_size_out(_conv2d_size_out(_conv2d_size_out(in_h, 5, 2), 5, 2), 3, 2)
    w3 = _conv2d_size_out(_conv2d_size_out(_conv2d_size_out(in_w, 5, 2), 5, 2), 3, 2)
    c3_out = params["conv3_w"].shape[0]                   # 64

    c1w, c1b = _pack_conv(params["conv1_w"], params["conv1_b"], cin_pad=3, rows_pad_to=LANE)
    c2w, c2b = _pack_conv(params["conv2_w"], params["conv2_b"], cin_pad=LANE)
    c3w, c3b = _pack_conv(params["conv3_w"], params["conv3_b"], cin_pad=LANE)

    # fc1: torch columns are indexed (c, h, w) (NCHW flatten). Repack once to
    # the NHWC-padded flatten order (h, w, c_pad) produced by the Pallas path.
    fc1_w = params["fc1_w"]                               # (512, 64*h3*w3)
    nhid = fc1_w.shape[0]
    f1 = fc1_w.reshape(nhid, c3_out, h3, w3)
    f1 = jnp.transpose(f1, (2, 3, 1, 0))                  # (h3, w3, 64, 512)
    f1 = jnp.pad(f1, ((0, 0), (0, 0), (0, LANE - c3_out), (0, 0)))
    f1 = f1.reshape(h3 * w3 * LANE, nhid).astype(jnp.bfloat16)
    f1b = params["fc1_b"].reshape(1, nhid).astype(jnp.float32)

    fc2_w = params["fc2_w"]                               # (out_dim, 512)
    odim = fc2_w.shape[0]
    f2 = jnp.pad(fc2_w.T, ((0, 0), (0, LANE - odim))).astype(jnp.bfloat16)   # (512, 128)
    f2b = jnp.pad(params["fc2_b"], (0, LANE - odim)).reshape(1, LANE).astype(jnp.float32)

    return {
        "conv1_w": c1w, "conv1_b": c1b,
        "conv2_w": c2w, "conv2_b": c2b,
        "conv3_w": c3w, "conv3_b": c3b,
        "fc1_w": f1, "fc1_b": f1b,
        "fc2_w": f2, "fc2_b": f2b,
    }


# ---------------------------------------------------------------------------
# Forward pass (mirrors DQNCNN.forward)
# ---------------------------------------------------------------------------
def dqn_cnn_forward(packed, x_nchw, *, output_dim):
    # One layout fixup at the boundary: NCHW -> NHWC (channel-minor), bf16.
    x = jnp.transpose(x_nchw, (0, 2, 3, 1)).astype(jnp.bfloat16)
    x = conv2d_relu(x, packed["conv1_w"], packed["conv1_b"], k=5, stride=2)
    x = conv2d_relu(x, packed["conv2_w"], packed["conv2_b"], k=5, stride=2)
    x = conv2d_relu(x, packed["conv3_w"], packed["conv3_b"], k=3, stride=2)
    B, h3, w3, cp = x.shape
    # Flatten in (h, w, c_pad) order — fc1's packed columns were permuted at
    # init so this matches torch's x.view(B, -1) on NCHW exactly.
    x = x.reshape(B, h3 * w3 * cp)
    q = mlp_head(x, packed["fc1_w"], packed["fc1_b"],
                 packed["fc2_w"], packed["fc2_b"])        # (B, 128) f32
    return q[:, :output_dim]


# Pure-JAX f32 reference for validation (uses the torch-layout params).
def _ref_forward(params, x):
    def conv(x, w, b, s):
        y = jax.lax.conv_general_dilated(
            x, w, (s, s), "VALID", dimension_numbers=("NCHW", "OIHW", "NCHW"))
        return jax.nn.relu(y + b[None, :, None, None])

    x = conv(x, params["conv1_w"], params["conv1_b"], 2)
    x = conv(x, params["conv2_w"], params["conv2_b"], 2)
    x = conv(x, params["conv3_w"], params["conv3_b"], 2)
    x = x.reshape(x.shape[0], -1)
    x = jax.nn.relu(x @ params["fc1_w"].T + params["fc1_b"])
    return x @ params["fc2_w"].T + params["fc2_b"]


if __name__ == "__main__":
    key = jax.random.PRNGKey(0)
    k_x, k_p = jax.random.split(key)

    B, C, H, W = 2, 3, 41, 33          # small synthetic input (NCHW, 3 channels)
    output_dim = 4

    x = jax.random.uniform(k_x, (B, C, H, W), jnp.float32)
    params = init_params(k_p, H, W, output_dim)
    packed = pack_params(params, H, W)          # one-time weight packing

    fwd = jax.jit(functools.partial(dqn_cnn_forward, output_dim=output_dim))
    out = jax.block_until_ready(fwd(packed, x))
    ref = _ref_forward(params, x)

    assert out.shape == (B, output_dim), out.shape
    # bf16 operands with f32 accumulation: expected |err| ~1e-3 on O(0.05) outputs.
    np.testing.assert_allclose(np.asarray(out), np.asarray(ref), rtol=2e-2, atol=1e-2)
    print("KERNEL_OK")
</pallas_src>

<mosaic_0001>
module attributes {stable_mosaic.version = 11 : i64} {
  func.func @_dense_kernel(%arg0: i32, %arg1: memref<570x128xbf16, #tpu.memory_space<vmem>>, %arg2: memref<128x128xbf16, #tpu.memory_space<vmem>>, %arg3: memref<1x128xf32, #tpu.memory_space<vmem>>, %arg4: memref<570x128xbf16, #tpu.memory_space<vmem>>) attributes {dimension_semantics = [#tpu.dimension_semantics<arbitrary>], iteration_bounds = array<i64: 1>, scalar_prefetch = 0 : i64, scratch_operands = 0 : i64, tpu.core_type = #tpu.core_type<tc>, window_params = [{pipeline_mode = #tpu.pipeline_mode<synchronous>, transform_indices = @transform_0, window_bounds = array<i64: 570, 128>}, {pipeline_mode = #tpu.pipeline_mode<synchronous>, transform_indices = @transform_1, window_bounds = array<i64: 128, 128>}, {pipeline_mode = #tpu.pipeline_mode<synchronous>, transform_indices = @transform_2, window_bounds = array<i64: 1, 128>}, {pipeline_mode = #tpu.pipeline_mode<synchronous>, transform_indices = @transform_3, window_bounds = array<i64: 570, 128>}]} {
    %c0 = arith.constant 0 : index
    %c0_0 = arith.constant 0 : index
    %0 = vector.load %arg1[%c0, %c0_0] : memref<570x128xbf16, #tpu.memory_space<vmem>>, vector<570x128xbf16>
    %c0_1 = arith.constant 0 : index
    %c0_2 = arith.constant 0 : index
    %1 = vector.load %arg2[%c0_1, %c0_2] : memref<128x128xbf16, #tpu.memory_space<vmem>>, vector<128x128xbf16>
    %cst = arith.constant dense<0.000000e+00> : vector<570x128xf32>
    %2 = tpu.matmul %0, %1, %cst {dimension_numbers = #tpu.dot_dimension_numbers<[1], [0], [0], [1], [0, 0, 1, 1], [], []>} : vector<570x128xbf16>, vector<128x128xbf16>, vector<570x128xf32> -> vector<570x128xf32>
    %c0_3 = arith.constant 0 : index
    %c0_4 = arith.constant 0 : index
    %3 = vector.load %arg3[%c0_3, %c0_4] : memref<1x128xf32, #tpu.memory_space<vmem>>, vector<1x128xf32>
    %4 = vector.broadcast %3 : vector<1x128xf32> to vector<570x128xf32>
    %5 = arith.addf %2, %4 : vector<570x128xf32>
    %cst_5 = arith.constant 0.000000e+00 : f32
    %6 = vector.broadcast %cst_5 : f32 to vector<570x128xf32>
    %7 = arith.maximumf %5, %6 : vector<570x128xf32>
    %8 = arith.truncf %7 : vector<570x128xf32> to vector<570x128xbf16>
    %c0_6 = arith.constant 0 : index
    %c0_7 = arith.constant 0 : index
    %9 = vector.load %arg4[%c0_6, %c0_7] : memref<570x128xbf16, #tpu.memory_space<vmem>>, vector<570x128xbf16>
    tpu.vector_store %arg4[%c0_6, %c0_7], %8 {strides = array<i32>} : memref<570x128xbf16, #tpu.memory_space<vmem>>, vector<570x128xbf16>,
    return
  }
  func.func @transform_0(%arg0: i32) -> (i32, i32) {
    %c0_i32 = arith.constant 0 : i32
    %c0_i32_0 = arith.constant 0 : i32
    %c0_i32_1 = arith.constant 0 : i32
    return %c0_i32, %c0_i32_0 : i32, i32
  }
  func.func @transform_1(%arg0: i32) -> (i32, i32) {
    %c0_i32 = arith.constant 0 : i32
    %c0_i32_0 = arith.constant 0 : i32
    %c0_i32_1 = arith.constant 0 : i32
    return %c0_i32, %c0_i32_0 : i32, i32
  }
  func.func @transform_2(%arg0: i32) -> (i32, i32) {
    %c0_i32 = arith.constant 0 : i32
    %c0_i32_0 = arith.constant 0 : i32
    %c0_i32_1 = arith.constant 0 : i32
    return %c0_i32, %c0_i32_0 : i32, i32
  }
  func.func @transform_3(%arg0: i32) -> (i32, i32) {
    %c0_i32 = arith.constant 0 : i32
    %c0_i32_0 = arith.constant 0 : i32
    %c0_i32_1 = arith.constant 0 : i32
    return %c0_i32, %c0_i32_0 : i32, i32
  }
}

module attributes {stable_mosaic.version = 11 : i64} {
  func.func @_dense_kernel(%arg0: i32, %arg1: memref<96x3200xbf16, #tpu.memory_space<vmem>>, %arg2: memref<3200x128xbf16, #tpu.memory_space<vmem>>, %arg3: memref<1x128xf32, #tpu.memory_space<vmem>>, %arg4: memref<96x128xbf16, #tpu.memory_space<vmem>>) attributes {dimension_semantics = [#tpu.dimension_semantics<arbitrary>], iteration_bounds = array<i64: 1>, scalar_prefetch = 0 : i64, scratch_operands = 0 : i64, tpu.core_type = #tpu.core_type<tc>, window_params = [{pipeline_mode = #tpu.pipeline_mode<synchronous>, transform_indices = @transform_0, window_bounds = array<i64: 96, 3200>}, {pipeline_mode = #tpu.pipeline_mode<synchronous>, transform_indices = @transform_1, window_bounds = array<i64: 3200, 128>}, {pipeline_mode = #tpu.pipeline_mode<synchronous>, transform_indices = @transform_2, window_bounds = array<i64: 1, 128>}, {pipeline_mode = #tpu.pipeline_mode<synchronous>, transform_indices = @transform_3, window_bounds = array<i64: 96, 128>}]} {
    %c0 = arith.constant 0 : index
    %c0_0 = arith.constant 0 : index
    %0 = vector.load %arg1[%c0, %c0_0] : memref<96x3200xbf16, #tpu.memory_space<vmem>>, vector<96x3200xbf16>
    %c0_1 = arith.constant 0 : index
    %c0_2 = arith.constant 0 : index
    %1 = vector.load %arg2[%c0_1, %c0_2] : memref<3200x128xbf16, #tpu.memory_space<vmem>>, vector<3200x128xbf16>
    %cst = arith.constant dense<0.000000e+00> : vector<96x128xf32>
    %2 = tpu.matmul %0, %1, %cst {dimension_numbers = #tpu.dot_dimension_numbers<[1], [0], [0], [1], [0, 0, 1, 1], [], []>} : vector<96x3200xbf16>, vector<3200x128xbf16>, vector<96x128xf32> -> vector<96x128xf32>
    %c0_3 = arith.constant 0 : index
    %c0_4 = arith.constant 0 : index
    %3 = vector.load %arg3[%c0_3, %c0_4] : memref<1x128xf32, #tpu.memory_space<vmem>>, vector<1x128xf32>
    %4 = vector.broadcast %3 : vector<1x128xf32> to vector<96x128xf32>
    %5 = arith.addf %2, %4 : vector<96x128xf32>
    %cst_5 = arith.constant 0.000000e+00 : f32
    %6 = vector.broadcast %cst_5 : f32 to vector<96x128xf32>
    %7 = arith.maximumf %5, %6 : vector<96x128xf32>
    %8 = arith.truncf %7 : vector<96x128xf32> to vector<96x128xbf16>
    %c0_6 = arith.constant 0 : index
    %c0_7 = arith.constant 0 : index
    %9 = vector.load %arg4[%c0_6, %c0_7] : memref<96x128xbf16, #tpu.memory_space<vmem>>, vector<96x128xbf16>
    tpu.vector_store %arg4[%c0_6, %c0_7], %8 {strides = array<i32>} : memref<96x128xbf16, #tpu.memory_space<vmem>>, vector<96x128xbf16>,
    return
  }
  func.func @transform_0(%arg0: i32) -> (i32, i32) {
    %c0_i32 = arith.constant 0 : i32
    %c0_i32_0 = arith.constant 0 : i32
    %c0_i32_1 = arith.constant 0 : i32
    return %c0_i32, %c0_i32_0 : i32, i32
  }
  func.func @transform_1(%arg0: i32) -> (i32, i32) {
    %c0_i32 = arith.constant 0 : i32
    %c0_i32_0 = arith.constant 0 : i32
    %c0_i32_1 = arith.constant 0 : i32
    return %c0_i32, %c0_i32_0 : i32, i32
  }
  func.func @transform_2(%arg0: i32) -> (i32, i32) {
    %c0_i32 = arith.constant 0 : i32
    %c0_i32_0 = arith.constant 0 : i32
    %c0_i32_1 = arith.constant 0 : i32
    return %c0_i32, %c0_i32_0 : i32, i32
  }
  func.func @transform_3(%arg0: i32) -> (i32, i32) {
    %c0_i32 = arith.constant 0 : i32
    %c0_i32_0 = arith.constant 0 : i32
    %c0_i32_1 = arith.constant 0 : i32
    return %c0_i32, %c0_i32_0 : i32, i32
  }
}

module attributes {stable_mosaic.version = 11 : i64} {
  func.func @_dense_kernel(%arg0: i32, %arg1: memref<12x1152xbf16, #tpu.memory_space<vmem>>, %arg2: memref<1152x128xbf16, #tpu.memory_space<vmem>>, %arg3: memref<1x128xf32, #tpu.memory_space<vmem>>, %arg4: memref<12x128xbf16, #tpu.memory_space<vmem>>) attributes {dimension_semantics = [#tpu.dimension_semantics<arbitrary>], iteration_bounds = array<i64: 1>, scalar_prefetch = 0 : i64, scratch_operands = 0 : i64, tpu.core_type = #tpu.core_type<tc>, window_params = [{pipeline_mode = #tpu.pipeline_mode<synchronous>, transform_indices = @transform_0, window_bounds = array<i64: 12, 1152>}, {pipeline_mode = #tpu.pipeline_mode<synchronous>, transform_indices = @transform_1, window_bounds = array<i64: 1152, 128>}, {pipeline_mode = #tpu.pipeline_mode<synchronous>, transform_indices = @transform_2, window_bounds = array<i64: 1, 128>}, {pipeline_mode = #tpu.pipeline_mode<synchronous>, transform_indices = @transform_3, window_bounds = array<i64: 12, 128>}]} {
    %c0 = arith.constant 0 : index
    %c0_0 = arith.constant 0 : index
    %0 = vector.load %arg1[%c0, %c0_0] : memref<12x1152xbf16, #tpu.memory_space<vmem>>, vector<12x1152xbf16>
    %c0_1 = arith.constant 0 : index
    %c0_2 = arith.constant 0 : index
    %1 = vector.load %arg2[%c0_1, %c0_2] : memref<1152x128xbf16, #tpu.memory_space<vmem>>, vector<1152x128xbf16>
    %cst = arith.constant dense<0.000000e+00> : vector<12x128xf32>
    %2 = tpu.matmul %0, %1, %cst {dimension_numbers = #tpu.dot_dimension_numbers<[1], [0], [0], [1], [0, 0, 1, 1], [], []>} : vector<12x1152xbf16>, vector<1152x128xbf16>, vector<12x128xf32> -> vector<12x128xf32>
    %c0_3 = arith.constant 0 : index
    %c0_4 = arith.constant 0 : index
    %3 = vector.load %arg3[%c0_3, %c0_4] : memref<1x128xf32, #tpu.memory_space<vmem>>, vector<1x128xf32>
    %4 = vector.broadcast %3 : vector<1x128xf32> to vector<12x128xf32>
    %5 = arith.addf %2, %4 : vector<12x128xf32>
    %cst_5 = arith.constant 0.000000e+00 : f32
    %6 = vector.broadcast %cst_5 : f32 to vector<12x128xf32>
    %7 = arith.maximumf %5, %6 : vector<12x128xf32>
    %8 = arith.truncf %7 : vector<12x128xf32> to vector<12x128xbf16>
    %c0_6 = arith.constant 0 : index
    %c0_7 = arith.constant 0 : index
    %9 = vector.load %arg4[%c0_6, %c0_7] : memref<12x128xbf16, #tpu.memory_space<vmem>>, vector<12x128xbf16>
    tpu.vector_store %arg4[%c0_6, %c0_7], %8 {strides = array<i32>} : memref<12x128xbf16, #tpu.memory_space<vmem>>, vector<12x128xbf16>,
    return
  }
  func.func @transform_0(%arg0: i32) -> (i32, i32) {
    %c0_i32 = arith.constant 0 : i32
    %c0_i32_0 = arith.constant 0 : i32
    %c0_i32_1 = arith.constant 0 : i32
    return %c0_i32, %c0_i32_0 : i32, i32
  }
  func.func @transform_1(%arg0: i32) -> (i32, i32) {
    %c0_i32 = arith.constant 0 : i32
    %c0_i32_0 = arith.constant 0 : i32
    %c0_i32_1 = arith.constant 0 : i32
    return %c0_i32, %c0_i32_0 : i32, i32
  }
  func.func @transform_2(%arg0: i32) -> (i32, i32) {
    %c0_i32 = arith.constant 0 : i32
    %c0_i32_0 = arith.constant 0 : i32
    %c0_i32_1 = arith.constant 0 : i32
    return %c0_i32, %c0_i32_0 : i32, i32
  }
  func.func @transform_3(%arg0: i32) -> (i32, i32) {
    %c0_i32 = arith.constant 0 : i32
    %c0_i32_0 = arith.constant 0 : i32
    %c0_i32_1 = arith.constant 0 : i32
    return %c0_i32, %c0_i32_0 : i32, i32
  }
}

module attributes {stable_mosaic.version = 11 : i64} {
  func.func @_mlp_kernel(%arg0: i32, %arg1: memref<2x768xbf16, #tpu.memory_space<vmem>>, %arg2: memref<768x512xbf16, #tpu.memory_space<vmem>>, %arg3: memref<1x512xf32, #tpu.memory_space<vmem>>, %arg4: memref<512x128xbf16, #tpu.memory_space<vmem>>, %arg5: memref<1x128xf32, #tpu.memory_space<vmem>>, %arg6: memref<2x128xf32, #tpu.memory_space<vmem>>) attributes {dimension_semantics = [#tpu.dimension_semantics<arbitrary>], iteration_bounds = array<i64: 1>, scalar_prefetch = 0 : i64, scratch_operands = 0 : i64, tpu.core_type = #tpu.core_type<tc>, window_params = [{pipeline_mode = #tpu.pipeline_mode<synchronous>, transform_indices = @transform_0, window_bounds = array<i64: 2, 768>}, {pipeline_mode = #tpu.pipeline_mode<synchronous>, transform_indices = @transform_1, window_bounds = array<i64: 768, 512>}, {pipeline_mode = #tpu.pipeline_mode<synchronous>, transform_indices = @transform_2, window_bounds = array<i64: 1, 512>}, {pipeline_mode = #tpu.pipeline_mode<synchronous>, transform_indices = @transform_3, window_bounds = array<i64: 512, 128>}, {pipeline_mode = #tpu.pipeline_mode<synchronous>, transform_indices = @transform_4, window_bounds = array<i64: 1, 128>}, {pipeline_mode = #tpu.pipeline_mode<synchronous>, transform_indices = @transform_5, window_bounds = array<i64: 2, 128>}]} {
    %c0 = arith.constant 0 : index
    %c0_0 = arith.constant 0 : index
    %0 = vector.load %arg1[%c0, %c0_0] : memref<2x768xbf16, #tpu.memory_space<vmem>>, vector<2x768xbf16>
    %c0_1 = arith.constant 0 : index
    %c0_2 = arith.constant 0 : index
    %1 = vector.load %arg2[%c0_1, %c0_2] : memref<768x512xbf16, #tpu.memory_space<vmem>>, vector<768x512xbf16>
    %cst = arith.constant dense<0.000000e+00> : vector<2x512xf32>
    %2 = tpu.matmul %0, %1, %cst {dimension_numbers = #tpu.dot_dimension_numbers<[1], [0], [0], [1], [0, 0, 1, 1], [], []>} : vector<2x768xbf16>, vector<768x512xbf16>, vector<2x512xf32> -> vector<2x512xf32>
    %c0_3 = arith.constant 0 : index
    %c0_4 = arith.constant 0 : index
    %3 = vector.load %arg3[%c0_3, %c0_4] : memref<1x512xf32, #tpu.memory_space<vmem>>, vector<1x512xf32>
    %4 = vector.broadcast %3 : vector<1x512xf32> to vector<2x512xf32>
    %5 = arith.addf %2, %4 : vector<2x512xf32>
    %cst_5 = arith.constant 0.000000e+00 : f32
    %6 = vector.broadcast %cst_5 : f32 to vector<2x512xf32>
    %7 = arith.maximumf %5, %6 : vector<2x512xf32>
    %8 = arith.truncf %7 : vector<2x512xf32> to vector<2x512xbf16>
    %c0_6 = arith.constant 0 : index
    %c0_7 = arith.constant 0 : index
    %9 = vector.load %arg4[%c0_6, %c0_7] : memref<512x128xbf16, #tpu.memory_space<vmem>>, vector<512x128xbf16>
    %cst_8 = arith.constant dense<0.000000e+00> : vector<2x128xf32>
    %10 = tpu.matmul %8, %9, %cst_8 {dimension_numbers = #tpu.dot_dimension_numbers<[1], [0], [0], [1], [0, 0, 1, 1], [], []>} : vector<2x512xbf16>, vector<512x128xbf16>, vector<2x128xf32> -> vector<2x128xf32>
    %c0_9 = arith.constant 0 : index
    %c0_10 = arith.constant 0 : index
    %11 = vector.load %arg5[%c0_9, %c0_10] : memref<1x128xf32, #tpu.memory_space<vmem>>, vector<1x128xf32>
    %12 = vector.broadcast %11 : vector<1x128xf32> to vector<2x128xf32>
    %13 = arith.addf %10, %12 : vector<2x128xf32>
    %c0_11 = arith.constant 0 : index
    %c0_12 = arith.constant 0 : index
    %14 = vector.load %arg6[%c0_11, %c0_12] : memref<2x128xf32, #tpu.memory_space<vmem>>, vector<2x128xf32>
    tpu.vector_store %arg6[%c0_11, %c0_12], %13 {strides = array<i32>} : memref<2x128xf32, #tpu.memory_space<vmem>>, vector<2x128xf32>,
    return
  }
  func.func @transform_0(%arg0: i32) -> (i32, i32) {
    %c0_i32 = arith.constant 0 : i32
    %c0_i32_0 = arith.constant 0 : i32
    %c0_i32_1 = arith.constant 0 : i32
    return %c0_i32, %c0_i32_0 : i32, i32
  }
  func.func @transform_1(%arg0: i32) -> (i32, i32) {
    %c0_i32 = arith.constant 0 : i32
    %c0_i32_0 = arith.constant 0 : i32
    %c0_i32_1 = arith.constant 0 : i32
    return %c0_i32, %c0_i32_0 : i32, i32
  }
  func.func @transform_2(%arg0: i32) -> (i32, i32) {
    %c0_i32 = arith.constant 0 : i32
    %c0_i32_0 = arith.constant 0 : i32
    %c0_i32_1 = arith.constant 0 : i32
    return %c0_i32, %c0_i32_0 : i32, i32
  }
  func.func @transform_3(%arg0: i32) -> (i32, i32) {
    %c0_i32 = arith.constant 0 : i32
    %c0_i32_0 = arith.constant 0 : i32
    %c0_i32_1 = arith.constant 0 : i32
    return %c0_i32, %c0_i32_0 : i32, i32
  }
  func.func @transform_4(%arg0: i32) -> (i32, i32) {
    %c0_i32 = arith.constant 0 : i32
    %c0_i32_0 = arith.constant 0 : i32
    %c0_i32_1 = arith.constant 0 : i32
    return %c0_i32, %c0_i32_0 : i32, i32
  }
  func.func @transform_5(%arg0: i32) -> (i32, i32) {
    %c0_i32 = arith.constant 0 : i32
    %c0_i32_0 = arith.constant 0 : i32
    %c0_i32_1 = arith.constant 0 : i32
    return %c0_i32, %c0_i32_0 : i32, i32
  }
}

</mosaic_0001>

<bundles_post_ra>
// kernel: dqn_cnn_forward.4
= control target key start
LH: loop header
LB: loop body
LE: loop exit
PB: predicated region body
PF: predicated region fallthrough
CT: control target
= control target key end

     0   :  { %s2061_s1 = inlined_call_operand.vmem [shape: bf16[128,128], index: 1, kind: input, shape index: {}]   ;;  %s2062_s0 = inlined_call_operand.vmem [shape: bf16[570,128], index: 0, kind: input, shape index: {}]   ;;  %s2063_s2 = inlined_call_operand.vmem [shape: f32[1,128], index: 2, kind: input, shape index: {}]   ;;  %s2064_s3 = inlined_call_operand.vmem [shape: bf16[570,128], index: 3, kind: output, shape index: {}]  }
   0x1   :  { %v1677_v0 = vld [vmem:[%s2061_s1 + $0x38] sm:$0xff]   ;;  %v1678_v1 = vld [vmem:[%s2061_s1 + $0x30] sm:$0xff]   ;;  %v1679_v2 = vld [vmem:[%s2061_s1 + $0x28] sm:$0xff]  }
   0x2   :  { %1573 = vmatprep.subr.bf16.mxu0 %v1677_v0  ;;  %1661 = vmatprep.subr.bf16.mxu1 %v1677_v0  ;;  %v1680_v3 = vld [vmem:[%s2061_s1 + $0x20] sm:$0xff]   ;;  %v1686_v5 = vld [vmem:[%s2062_s0 + $0x90] sm:$0xff]   ;;  %v1681_v6 = vld [vmem:[%s2061_s1 + $0x18] sm:$0xff]  }
   0x3   :  { %1574 = vmatpush3.bf16.msra.mxu0 %v1677_v0  ;;  %1669 = vmatpush3.bf16.msra.mxu1 %v1677_v0  ;;  %v1685_v4 = vld [vmem:[%s2062_s0] sm:$0xff]   ;;  %v1682_v7 = vld [vmem:[%s2061_s1 + $0x10] sm:$0xff]   ;;  %v1683_v8 = vld [vmem:[%s2061_s1 + $0x8] sm:$0xff]  }
   0x4   :  { %1575 = vmatprep.subr.bf16.mxu0 %v1678_v1  ;;  %1662 = vmatprep.subr.bf16.mxu1 %v1678_v1  ;;  %v1684_v9 = vld [vmem:[%s2061_s1] sm:$0xff]   ;;  %v1687_v10 = vld [vmem:[%s2062_s0 + $0x8] sm:$0xff]   ;;  %v1688_v11 = vld [vmem:[%s2062_s0 + $0x98] sm:$0xff]  }
   0x5   :  { %1589 = vmatprep.mubr.bf16.mxu0 %v1685_v4  ;;  %1625 = vmatprep.mubr.bf16.mxu1 %v1686_v5  ;;  %v1689_v12 = vld [vmem:[%s2062_s0 + $0x10] sm:$0xff]   ;;  %v1690_v13 = vld [vmem:[%s2062_s0 + $0xa0] sm:$0xff]   ;;  %v1691_v14 = vld [vmem:[%s2062_s0 + $0x18] sm:$0xff]  }
   0x6   :  { %v1692_v15 = vld [vmem:[%s2062_s0 + $0xa8] sm:$0xff]   ;;  %v1693_v16 = vld [vmem:[%s2062_s0 + $0x20] sm:$0xff]   ;;  %v1694_v17 = vld [vmem:[%s2062_s0 + $0xb0] sm:$0xff]  }
   0x7   :  { %1576 = vmatpush3.bf16.msra.mxu0 %v1678_v1  ;;  %1670 = vmatpush3.bf16.msra.mxu1 %v1678_v1  ;;  %v1695_v18 = vld [vmem:[%s2062_s0 + $0x28] sm:$0xff]   ;;  %v1696_v19 = vld [vmem:[%s2062_s0 + $0xb8] sm:$0xff]   ;;  %v1697_v20 = vld [vmem:[%s2062_s0 + $0x30] sm:$0xff]  }
   0x8   :  { %1577 = vmatprep.subr.bf16.mxu0 %v1679_v2  ;;  %1663 = vmatprep.subr.bf16.mxu1 %v1679_v2  ;;  %v1698_v21 = vld [vmem:[%s2062_s0 + $0xc0] sm:$0xff]   ;;  %v1699_v22 = vld [vmem:[%s2062_s0 + $0x38] sm:$0xff]   ;;  %v1700_v23 = vld [vmem:[%s2062_s0 + $0xc8] sm:$0xff]  }
   0x9   :  { %v1701_v24 = vld [vmem:[%s2062_s0 + $0x40] sm:$0xff]   ;;  %v1702_v25 = vld [vmem:[%s2062_s0 + $0xd0] sm:$0xff]   ;;  %v1703_v26 = vld [vmem:[%s2062_s0 + $0x48] sm:$0xff]  }
   0xa   :  { %v1704_v27 = vld [vmem:[%s2062_s0 + $0xd8] sm:$0xff]   ;;  %v1705_v28 = vld [vmem:[%s2062_s0 + $0x50] sm:$0xff]   ;;  %v1706_v29 = vld [vmem:[%s2062_s0 + $0xe0] sm:$0xff]  }
   0xb   :  { %1578 = vmatpush3.bf16.msra.mxu0 %v1679_v2  ;;  %1671 = vmatpush3.bf16.msra.mxu1 %v1679_v2  ;;  %v1707_v30 = vld [vmem:[%s2062_s0 + $0x58] sm:$0xff]   ;;  %v1708_v31 = vld [vmem:[%s2062_s0 + $0xe8] sm:$0xff]   ;;  %v1709_v32 = vld [vmem:[%s2062_s0 + $0x60] sm:$0xff]  }
   0xc   :  { %1579 = vmatprep.subr.bf16.mxu0 %v1680_v3  ;;  %1664 = vmatprep.subr.bf16.mxu1 %v1680_v3  ;;  %v1710_v33 = vld [vmem:[%s2062_s0 + $0xf0] sm:$0xff]   ;;  %v1711_v34 = vld [vmem:[%s2062_s0 + $0x68] sm:$0xff]   ;;  %v1712_v35 = vld [vmem:[%s2062_s0 + $0xf8] sm:$0xff]  }
   0xd   :  { %v1713_v36 = vld [vmem:[%s2062_s0 + $0x70] sm:$0xff]   ;;  %v1714_v37 = vld [vmem:[%s2062_s0 + $0x100] sm:$0xff]   ;;  %v1715_v38 = vld [vmem:[%s2062_s0 + $0x78] sm:$0xff]  }
   0xe   :  { %v1716_v39 = vld [vmem:[%s2062_s0 + $0x108] sm:$0xff]   ;;  %v1717_v40 = vld [vmem:[%s2062_s0 + $0x80] sm:$0xff]   ;;  %v1718_v41 = vld [vmem:[%s2062_s0 + $0x110] sm:$0xff]  }
   0xf   :  { %1580 = vmatpush3.bf16.msra.mxu0 %v1680_v3  ;;  %1672 = vmatpush3.bf16.msra.mxu1 %v1680_v3  ;;  %v1719_v42 = vld [vmem:[%s2062_s0 + $0x88] sm:$0xff]   ;;  %v1720_v43 = vld [vmem:[%s2062_s0 + $0x118] sm:$0x1f]   ;;  %v1876_v44 = vld [vmem:[%s2063_s2] ss:$0 sm:$0xff] }
  0x10   :  { %1581 = vmatprep.subr.bf16.mxu0 %v1681_v6  ;;  %1665 = vmatprep.subr.bf16.mxu1 %v1681_v6 }
  0x13   :  { %1582 = vmatpush3.bf16.msra.mxu0 %v1681_v6  ;;  %1673 = vmatpush3.bf16.msra.mxu1 %v1681_v6 }
  0x14   :  { %1583 = vmatprep.subr.bf16.mxu0 %v1682_v7  ;;  %1666 = vmatprep.subr.bf16.mxu1 %v1682_v7 }
  0x17   :  { %1584 = vmatpush3.bf16.msra.mxu0 %v1682_v7  ;;  %1674 = vmatpush3.bf16.msra.mxu1 %v1682_v7 }
  0x18   :  { %1585 = vmatprep.subr.bf16.mxu0 %v1683_v8  ;;  %1667 = vmatprep.subr.bf16.mxu1 %v1683_v8 }
  0x1b   :  { %1586 = vmatpush3.bf16.msra.mxu0 %v1683_v8  ;;  %1675 = vmatpush3.bf16.msra.mxu1 %v1683_v8 }
  0x1c   :  { %1587 = vmatprep.subr.bf16.mxu0 %v1684_v9  ;;  %1668 = vmatprep.subr.bf16.mxu1 %v1684_v9 }
  0x1f   :  { %1588 = vmatpush3.bf16.msra.mxu0 %v1684_v9  ;;  %1676 = vmatpush3.bf16.msra.mxu1 %v1684_v9 }
  0x22   :  { %1590 = vmatmul.mubr.bf16.vlgmr.msra.gmra.mxu0 %v1687_v10  ;;  %1626 = vmatmul.mubr.bf16.vlgmr.msra.gmra.mxu1 %v1688_v11 }
  0x23   :  { %1593 = vmatprep.mubr.bf16.mxu0 %v1689_v12  ;;  %1629 = vmatprep.mubr.bf16.mxu1 %v1690_v13 }
  0x2a   :  { %1594 = vmatmul.mubr.bf16.gmra.mxu0 %v1691_v14  ;;  %1630 = vmatmul.mubr.bf16.gmra.mxu1 %v1692_v15 }
  0x2b   :  { %1597 = vmatprep.mubr.bf16.mxu0 %v1693_v16  ;;  %1633 = vmatprep.mubr.bf16.mxu1 %v1694_v17 }
  0x32   :  { %1598 = vmatmul.mubr.bf16.gmra.mxu0 %v1695_v18  ;;  %1634 = vmatmul.mubr.bf16.gmra.mxu1 %v1696_v19 }
  0x33   :  { %1601 = vmatprep.mubr.bf16.mxu0 %v1697_v20  ;;  %1637 = vmatprep.mubr.bf16.mxu1 %v1698_v21 }
  0x3a   :  { %1602 = vmatmul.mubr.bf16.gmra.mxu0 %v1699_v22  ;;  %1638 = vmatmul.mubr.bf16.gmra.mxu1 %v1700_v23 }
  0x3b   :  { %1605 = vmatprep.mubr.bf16.mxu0 %v1701_v24  ;;  %1641 = vmatprep.mubr.bf16.mxu1 %v1702_v25 }
  0x42   :  { %1606 = vmatmul.mubr.bf16.gmra.mxu0 %v1703_v26  ;;  %1642 = vmatmul.mubr.bf16.gmra.mxu1 %v1704_v27 }
  0x43   :  { %1609 = vmatprep.mubr.bf16.mxu0 %v1705_v28  ;;  %1645 = vmatprep.mubr.bf16.mxu1 %v1706_v29 }
  0x4a   :  { %1610 = vmatmul.mubr.bf16.gmra.mxu0 %v1707_v30  ;;  %1646 = vmatmul.mubr.bf16.gmra.mxu1 %v1708_v31 }
  0x4b   :  { %1613 = vmatprep.mubr.bf16.mxu0 %v1709_v32  ;;  %1649 = vmatprep.mubr.bf16.mxu1 %v1710_v33 }
  0x52   :  { %1614 = vmatmul.mubr.bf16.gmra.mxu0 %v1711_v34  ;;  %1650 = vmatmul.mubr.bf16.gmra.mxu1 %v1712_v35 }
  0x53   :  { %1617 = vmatprep.mubr.bf16.mxu0 %v1713_v36  ;;  %1653 = vmatprep.mubr.bf16.mxu1 %v1714_v37 }
  0x5a   :  { %1618 = vmatmul.mubr.bf16.gmra.mxu0 %v1715_v38  ;;  %1654 = vmatmul.mubr.bf16.gmra.mxu1 %v1716_v39 }
  0x5b   :  { %1621 = vmatprep.mubr.bf16.mxu0 %v1717_v40  ;;  %1657 = vmatprep.mubr.bf16.mxu1 %v1718_v41 }
  0x62   :  { %1622 = vmatmul.mubr.bf16.gmra.mxu0 %v1719_v42  ;;  %1658 = vmatmul.mubr.bf16.gmra.mxu1 %v1720_v43 }
  0xe2   :  { %v1591_v45 = vpop.f32.mrf.mxu0  ;;  %v1627_v46 = vpop.f32.mrf.mxu1 }
  0xe3   :  { %v417_v47 = vadd.f32 %v1591_v45, %v1876_v44  ;;  %v561_v48 = vadd.f32 %v1627_v46, %v1876_v44 }
  0xe4   :  { %v408_v49 = vpop.f32.mrf.mxu0  ;;  %v552_v50 = vpop.f32.mrf.mxu1 }
  0xe5   :  { %v409_v51 = vadd.f32 %v1876_v44, %v408_v49  ;;  %v553_v52 = vadd.f32 %v1876_v44, %v552_v50  ;;  %v697_v57 = vmax.f32 %v417_v47, 0.0  ;;  %v733_v58 = vmax.f32 %v561_v48, 0.0 }
  0xe6   :  { %v1592_v53 = vpop.f32.mrf.mxu0  ;;  %v1628_v54 = vpop.f32.mrf.mxu1 }
  0xe7   :  { %v420_v55 = vadd.f32 %v1592_v53, %v1876_v44  ;;  %v564_v56 = vadd.f32 %v1628_v54, %v1876_v44  ;;  %v695_v1 = vmax.f32 %v409_v51, 0.0  ;;  %v731_v2 = vmax.f32 %v553_v52, 0.0 }
  0xe8   :  { %v411_v59 = vpop.f32.mrf.mxu0  ;;  %v555_v60 = vpop.f32.mrf.mxu1 }
  0xe9   :  { %v698_v61 = vmax.f32 %v420_v55, 0.0  ;;  %v734_v62 = vmax.f32 %v564_v56, 0.0  ;;  %v412_v63 = vadd.f32 %v1876_v44, %v411_v59  ;;  %v556_v0 = vadd.f32 %v1876_v44, %v555_v60 }
  0xea   :  { %v1595_v3 = vpop.f32.mrf.mxu0  ;;  %v1631_v4 = vpop.f32.mrf.mxu1 }
  0xeb   :  { %v1328_v5 = vpack.c.bf16 %v698_v61, %v697_v57  ;;  %v1418_v6 = vpack.c.bf16 %v734_v62, %v733_v58  ;;  %v696_v7 = vmax.f32 %v412_v63, 0.0  ;;  %v732_v8 = vmax.f32 %v556_v0, 0.0 }
  0xec   :  { %v433_v9 = vadd.f32 %v1595_v3, %v1876_v44  ;;  %v577_v10 = vadd.f32 %v1631_v4, %v1876_v44  ;;  %v424_v11 = vpop.f32.mrf.mxu0  ;;  %v568_v12 = vpop.f32.mrf.mxu1 }
  0xed   :  { %1495 = vst [vmem:[%s2064_s3 + $0x8] sm:$0xff] %v1328_v5   ;;  %1513 = vst [vmem:[%s2064_s3 + $0x98] sm:$0xff] %v1418_v6   ;;  %v1323_v13 = vpack.c.bf16 %v696_v7, %v695_v1  ;;  %v1413_v14 = vpack.c.bf16 %v732_v8, %v731_v2  ;;  %v425_v15 = vadd.f32 %v1876_v44, %v424_v11 }
  0xee   :  { %v569_v16 = vadd.f32 %v1876_v44, %v568_v12  ;;  %v1596_v17 = vpop.f32.mrf.mxu0  ;;  %v1632_v18 = vpop.f32.mrf.mxu1  ;;  %v701_v21 = vmax.f32 %v433_v9, 0.0  ;;  %v737_v22 = vmax.f32 %v577_v10, 0.0 }
  0xef   :  { %1324 = vst [vmem:[%s2064_s3] sm:$0xff] %v1323_v13   ;;  %1512 = vst [vmem:[%s2064_s3 + $0x90] sm:$0xff] %v1413_v14   ;;  %v436_v19 = vadd.f32 %v1596_v17, %v1876_v44  ;;  %v580_v20 = vadd.f32 %v1632_v18, %v1876_v44  ;;  %v699_v29 = vmax.f32 %v425_v15, 0.0 }
  0xf0   :  { %v427_v23 = vpop.f32.mrf.mxu0  ;;  %v571_v24 = vpop.f32.mrf.mxu1  ;;  %v735_v30 = vmax.f32 %v569_v16, 0.0 }
  0xf1   :  { %v702_v25 = vmax.f32 %v436_v19, 0.0  ;;  %v738_v26 = vmax.f32 %v580_v20, 0.0  ;;  %v428_v27 = vadd.f32 %v1876_v44, %v427_v23  ;;  %v572_v28 = vadd.f32 %v1876_v44, %v571_v24 }
  0xf2   :  { %v1599_v31 = vpop.f32.mrf.mxu0  ;;  %v1635_v32 = vpop.f32.mrf.mxu1 }
  0xf3   :  { %v1338_v33 = vpack.c.bf16 %v702_v25, %v701_v21  ;;  %v1428_v34 = vpack.c.bf16 %v738_v26, %v737_v22  ;;  %v700_v35 = vmax.f32 %v428_v27, 0.0  ;;  %v736_v36 = vmax.f32 %v572_v28, 0.0 }
  0xf4   :  { %v449_v37 = vadd.f32 %v1599_v31, %v1876_v44  ;;  %v593_v38 = vadd.f32 %v1635_v32, %v1876_v44  ;;  %v440_v39 = vpop.f32.mrf.mxu0  ;;  %v584_v40 = vpop.f32.mrf.mxu1 }
  0xf5   :  { %1497 = vst [vmem:[%s2064_s3 + $0x18] sm:$0xff] %v1338_v33   ;;  %1515 = vst [vmem:[%s2064_s3 + $0xa8] sm:$0xff] %v1428_v34   ;;  %v1333_v41 = vpack.c.bf16 %v700_v35, %v699_v29  ;;  %v1423_v42 = vpack.c.bf16 %v736_v36, %v735_v30  ;;  %v441_v43 = vadd.f32 %v1876_v44, %v440_v39 }
  0xf6   :  { %v585_v45 = vadd.f32 %v1876_v44, %v584_v40  ;;  %v1600_v46 = vpop.f32.mrf.mxu0  ;;  %v1636_v47 = vpop.f32.mrf.mxu1  ;;  %v705_v50 = vmax.f32 %v449_v37, 0.0  ;;  %v741_v51 = vmax.f32 %v593_v38, 0.0 }
  0xf7   :  { %1496 = vst [vmem:[%s2064_s3 + $0x10] sm:$0xff] %v1333_v41   ;;  %1514 = vst [vmem:[%s2064_s3 + $0xa0] sm:$0xff] %v1423_v42   ;;  %v452_v48 = vadd.f32 %v1600_v46, %v1876_v44  ;;  %v596_v49 = vadd.f32 %v1636_v47, %v1876_v44  ;;  %v703_v58 = vmax.f32 %v441_v43, 0.0 }
  0xf8   :  { %v443_v52 = vpop.f32.mrf.mxu0  ;;  %v587_v53 = vpop.f32.mrf.mxu1  ;;  %v739_v59 = vmax.f32 %v585_v45, 0.0 }
  0xf9   :  { %v706_v54 = vmax.f32 %v452_v48, 0.0  ;;  %v742_v55 = vmax.f32 %v596_v49, 0.0  ;;  %v444_v56 = vadd.f32 %v1876_v44, %v443_v52  ;;  %v588_v57 = vadd.f32 %v1876_v44, %v587_v53 }
  0xfa   :  { %v1603_v60 = vpop.f32.mrf.mxu0  ;;  %v1639_v61 = vpop.f32.mrf.mxu1 }
  0xfb   :  { %v1348_v62 = vpack.c.bf16 %v706_v54, %v705_v50  ;;  %v1438_v63 = vpack.c.bf16 %v742_v55, %v741_v51  ;;  %v704_v0 = vmax.f32 %v444_v56, 0.0  ;;  %v740_v1 = vmax.f32 %v588_v57, 0.0 }
  0xfc   :  { %v465_v2 = vadd.f32 %v1603_v60, %v1876_v44  ;;  %v609_v3 = vadd.f32 %v1639_v61, %v1876_v44  ;;  %v456_v4 = vpop.f32.mrf.mxu0  ;;  %v600_v5 = vpop.f32.mrf.mxu1 }
  0xfd   :  { %1499 = vst [vmem:[%s2064_s3 + $0x28] sm:$0xff] %v1348_v62   ;;  %1517 = vst [vmem:[%s2064_s3 + $0xb8] sm:$0xff] %v1438_v63   ;;  %v1343_v6 = vpack.c.bf16 %v704_v0, %v703_v58  ;;  %v1433_v7 = vpack.c.bf16 %v740_v1, %v739_v59  ;;  %v457_v8 = vadd.f32 %v1876_v44, %v456_v4 }
  0xfe   :  { %v601_v9 = vadd.f32 %v1876_v44, %v600_v5  ;;  %v1604_v10 = vpop.f32.mrf.mxu0  ;;  %v1640_v11 = vpop.f32.mrf.mxu1  ;;  %v709_v14 = vmax.f32 %v465_v2, 0.0  ;;  %v745_v15 = vmax.f32 %v609_v3, 0.0 }
  0xff   :  { %1498 = vst [vmem:[%s2064_s3 + $0x20] sm:$0xff] %v1343_v6   ;;  %1516 = vst [vmem:[%s2064_s3 + $0xb0] sm:$0xff] %v1433_v7   ;;  %v468_v12 = vadd.f32 %v1604_v10, %v1876_v44  ;;  %v612_v13 = vadd.f32 %v1640_v11, %v1876_v44  ;;  %v707_v22 = vmax.f32 %v457_v8, 0.0 }
 0x100   :  { %v459_v16 = vpop.f32.mrf.mxu0  ;;  %v603_v17 = vpop.f32.mrf.mxu1  ;;  %v743_v23 = vmax.f32 %v601_v9, 0.0 }
 0x101   :  { %v710_v18 = vmax.f32 %v468_v12, 0.0  ;;  %v746_v19 = vmax.f32 %v612_v13, 0.0  ;;  %v460_v20 = vadd.f32 %v1876_v44, %v459_v16  ;;  %v604_v21 = vadd.f32 %v1876_v44, %v603_v17 }
 0x102   :  { %v1607_v24 = vpop.f32.mrf.mxu0  ;;  %v1643_v25 = vpop.f32.mrf.mxu1 }
 0x103   :  { %v1358_v26 = vpack.c.bf16 %v710_v18, %v709_v14  ;;  %v1448_v27 = vpack.c.bf16 %v746_v19, %v745_v15  ;;  %v708_v28 = vmax.f32 %v460_v20, 0.0  ;;  %v744_v29 = vmax.f32 %v604_v21, 0.0 }
 0x104   :  { %v481_v30 = vadd.f32 %v1607_v24, %v1876_v44  ;;  %v625_v31 = vadd.f32 %v1643_v25, %v1876_v44  ;;  %v472_v32 = vpop.f32.mrf.mxu0  ;;  %v616_v33 = vpop.f32.mrf.mxu1 }
 0x105   :  { %1501 = vst [vmem:[%s2064_s3 + $0x38] sm:$0xff] %v1358_v26   ;;  %1519 = vst [vmem:[%s2064_s3 + $0xc8] sm:$0xff] %v1448_v27   ;;  %v1353_v34 = vpack.c.bf16 %v708_v28, %v707_v22  ;;  %v1443_v35 = vpack.c.bf16 %v744_v29, %v743_v23  ;;  %v473_v36 = vadd.f32 %v1876_v44, %v472_v32 }
 0x106   :  { %v617_v37 = vadd.f32 %v1876_v44, %v616_v33  ;;  %v1608_v38 = vpop.f32.mrf.mxu0  ;;  %v1644_v39 = vpop.f32.mrf.mxu1  ;;  %v713_v42 = vmax.f32 %v481_v30, 0.0  ;;  %v749_v43 = vmax.f32 %v625_v31, 0.0 }
 0x107   :  { %1500 = vst [vmem:[%s2064_s3 + $0x30] sm:$0xff] %v1353_v34   ;;  %1518 = vst [vmem:[%s2064_s3 + $0xc0] sm:$0xff] %v1443_v35   ;;  %v484_v40 = vadd.f32 %v1608_v38, %v1876_v44  ;;  %v628_v41 = vadd.f32 %v1644_v39, %v1876_v44  ;;  %v711_v51 = vmax.f32 %v473_v36, 0.0 }
 0x108   :  { %v475_v45 = vpop.f32.mrf.mxu0  ;;  %v619_v46 = vpop.f32.mrf.mxu1  ;;  %v747_v52 = vmax.f32 %v617_v37, 0.0 }
 0x109   :  { %v714_v47 = vmax.f32 %v484_v40, 0.0  ;;  %v750_v48 = vmax.f32 %v628_v41, 0.0  ;;  %v476_v49 = vadd.f32 %v1876_v44, %v475_v45  ;;  %v620_v50 = vadd.f32 %v1876_v44, %v619_v46 }
 0x10a   :  { %v1611_v53 = vpop.f32.mrf.mxu0  ;;  %v1647_v54 = vpop.f32.mrf.mxu1 }
 0x10b   :  { %v1368_v55 = vpack.c.bf16 %v714_v47, %v713_v42  ;;  %v1458_v56 = vpack.c.bf16 %v750_v48, %v749_v43  ;;  %v712_v57 = vmax.f32 %v476_v49, 0.0  ;;  %v748_v58 = vmax.f32 %v620_v50, 0.0 }
 0x10c   :  { %v497_v59 = vadd.f32 %v1611_v53, %v1876_v44  ;;  %v641_v60 = vadd.f32 %v1647_v54, %v1876_v44  ;;  %v488_v61 = vpop.f32.mrf.mxu0  ;;  %v632_v62 = vpop.f32.mrf.mxu1 }
 0x10d   :  { %1503 = vst [vmem:[%s2064_s3 + $0x48] sm:$0xff] %v1368_v55   ;;  %1521 = vst [vmem:[%s2064_s3 + $0xd8] sm:$0xff] %v1458_v56   ;;  %v1363_v63 = vpack.c.bf16 %v712_v57, %v711_v51  ;;  %v1453_v0 = vpack.c.bf16 %v748_v58, %v747_v52  ;;  %v489_v1 = vadd.f32 %v1876_v44, %v488_v61 }
 0x10e   :  { %v633_v2 = vadd.f32 %v1876_v44, %v632_v62  ;;  %v1612_v3 = vpop.f32.mrf.mxu0  ;;  %v1648_v4 = vpop.f32.mrf.mxu1  ;;  %v717_v7 = vmax.f32 %v497_v59, 0.0  ;;  %v753_v8 = vmax.f32 %v641_v60, 0.0 }
 0x10f   :  { %1502 = vst [vmem:[%s2064_s3 + $0x40] sm:$0xff] %v1363_v63   ;;  %1520 = vst [vmem:[%s2064_s3 + $0xd0] sm:$0xff] %v1453_v0   ;;  %v500_v5 = vadd.f32 %v1612_v3, %v1876_v44  ;;  %v644_v6 = vadd.f32 %v1648_v4, %v1876_v44  ;;  %v715_v15 = vmax.f32 %v489_v1, 0.0 }
 0x110   :  { %v491_v9 = vpop.f32.mrf.mxu0  ;;  %v635_v10 = vpop.f32.mrf.mxu1  ;;  %v751_v16 = vmax.f32 %v633_v2, 0.0 }
 0x111   :  { %v718_v11 = vmax.f32 %v500_v5, 0.0  ;;  %v754_v12 = vmax.f32 %v644_v6, 0.0  ;;  %v492_v13 = vadd.f32 %v1876_v44, %v491_v9  ;;  %v636_v14 = vadd.f32 %v1876_v44, %v635_v10 }
 0x112   :  { %v1615_v17 = vpop.f32.mrf.mxu0  ;;  %v1651_v18 = vpop.f32.mrf.mxu1 }
 0x113   :  { %v1378_v19 = vpack.c.bf16 %v718_v11, %v717_v7  ;;  %v1468_v20 = vpack.c.bf16 %v754_v12, %v753_v8  ;;  %v716_v21 = vmax.f32 %v492_v13, 0.0  ;;  %v752_v22 = vmax.f32 %v636_v14, 0.0 }
 0x114   :  { %v513_v23 = vadd.f32 %v1615_v17, %v1876_v44  ;;  %v657_v24 = vadd.f32 %v1651_v18, %v1876_v44  ;;  %v504_v25 = vpop.f32.mrf.mxu0  ;;  %v648_v26 = vpop.f32.mrf.mxu1 }
 0x115   :  { %1505 = vst [vmem:[%s2064_s3 + $0x58] sm:$0xff] %v1378_v19   ;;  %1523 = vst [vmem:[%s2064_s3 + $0xe8] sm:$0xff] %v1468_v20   ;;  %v1373_v27 = vpack.c.bf16 %v716_v21, %v715_v15  ;;  %v1463_v28 = vpack.c.bf16 %v752_v22, %v751_v16  ;;  %v505_v29 = vadd.f32 %v1876_v44, %v504_v25 }
 0x116   :  { %v649_v30 = vadd.f32 %v1876_v44, %v648_v26  ;;  %v1616_v31 = vpop.f32.mrf.mxu0  ;;  %v1652_v32 = vpop.f32.mrf.mxu1  ;;  %v721_v35 = vmax.f32 %v513_v23, 0.0  ;;  %v757_v36 = vmax.f32 %v657_v24, 0.0 }
 0x117   :  { %1504 = vst [vmem:[%s2064_s3 + $0x50] sm:$0xff] %v1373_v27   ;;  %1522 = vst [vmem:[%s2064_s3 + $0xe0] sm:$0xff] %v1463_v28   ;;  %v516_v33 = vadd.f32 %v1616_v31, %v1876_v44  ;;  %v660_v34 = vadd.f32 %v1652_v32, %v1876_v44  ;;  %v719_v43 = vmax.f32 %v505_v29, 0.0 }
 0x118   :  { %v507_v37 = vpop.f32.mrf.mxu0  ;;  %v651_v38 = vpop.f32.mrf.mxu1  ;;  %v755_v45 = vmax.f32 %v649_v30, 0.0 }
 0x119   :  { %v722_v39 = vmax.f32 %v516_v33, 0.0  ;;  %v758_v40 = vmax.f32 %v660_v34, 0.0  ;;  %v508_v41 = vadd.f32 %v1876_v44, %v507_v37  ;;  %v652_v42 = vadd.f32 %v1876_v44, %v651_v38 }
 0x11a   :  { %v1619_v46 = vpop.f32.mrf.mxu0  ;;  %v1655_v47 = vpop.f32.mrf.mxu1 }
 0x11b   :  { %v1388_v48 = vpack.c.bf16 %v722_v39, %v721_v35  ;;  %v1478_v49 = vpack.c.bf16 %v758_v40, %v757_v36  ;;  %v720_v50 = vmax.f32 %v508_v41, 0.0  ;;  %v756_v51 = vmax.f32 %v652_v42, 0.0 }
 0x11c   :  { %v529_v52 = vadd.f32 %v1619_v46, %v1876_v44  ;;  %v673_v53 = vadd.f32 %v1655_v47, %v1876_v44  ;;  %v520_v54 = vpop.f32.mrf.mxu0  ;;  %v664_v55 = vpop.f32.mrf.mxu1 }
 0x11d   :  { %1507 = vst [vmem:[%s2064_s3 + $0x68] sm:$0xff] %v1388_v48   ;;  %1525 = vst [vmem:[%s2064_s3 + $0xf8] sm:$0xff] %v1478_v49   ;;  %v1383_v56 = vpack.c.bf16 %v720_v50, %v719_v43  ;;  %v1473_v57 = vpack.c.bf16 %v756_v51, %v755_v45  ;;  %v521_v58 = vadd.f32 %v1876_v44, %v520_v54 }
 0x11e   :  { %v665_v59 = vadd.f32 %v1876_v44, %v664_v55  ;;  %v1620_v60 = vpop.f32.mrf.mxu0  ;;  %v1656_v61 = vpop.f32.mrf.mxu1  ;;  %v725_v0 = vmax.f32 %v529_v52, 0.0  ;;  %v761_v1 = vmax.f32 %v673_v53, 0.0 }
 0x11f   :  { %1506 = vst [vmem:[%s2064_s3 + $0x60] sm:$0xff] %v1383_v56   ;;  %1524 = vst [vmem:[%s2064_s3 + $0xf0] sm:$0xff] %v1473_v57   ;;  %v532_v62 = vadd.f32 %v1620_v60, %v1876_v44  ;;  %v676_v63 = vadd.f32 %v1656_v61, %v1876_v44  ;;  %v723_v8 = vmax.f32 %v521_v58, 0.0 }
 0x120   :  { %v523_v2 = vpop.f32.mrf.mxu0  ;;  %v667_v3 = vpop.f32.mrf.mxu1  ;;  %v759_v9 = vmax.f32 %v665_v59, 0.0 }
 0x121   :  { %v726_v4 = vmax.f32 %v532_v62, 0.0  ;;  %v762_v5 = vmax.f32 %v676_v63, 0.0  ;;  %v524_v6 = vadd.f32 %v1876_v44, %v523_v2  ;;  %v668_v7 = vadd.f32 %v1876_v44, %v667_v3 }
 0x122   :  { %v1623_v10 = vpop.f32.mrf.mxu0  ;;  %v1659_v11 = vpop.f32.mrf.mxu1 }
 0x123   :  { %v1398_v12 = vpack.c.bf16 %v726_v4, %v725_v0  ;;  %v1488_v13 = vpack.c.bf16 %v762_v5, %v761_v1  ;;  %v724_v14 = vmax.f32 %v524_v6, 0.0  ;;  %v760_v15 = vmax.f32 %v668_v7, 0.0 }
 0x124   :  { %v545_v16 = vadd.f32 %v1623_v10, %v1876_v44  ;;  %v689_v17 = vadd.f32 %v1659_v11, %v1876_v44  ;;  %v536_v18 = vpop.f32.mrf.mxu0  ;;  %v680_v19 = vpop.f32.mrf.mxu1 }
 0x125   :  { %1509 = vst [vmem:[%s2064_s3 + $0x78] sm:$0xff] %v1398_v12   ;;  %1527 = vst [vmem:[%s2064_s3 + $0x108] sm:$0xff] %v1488_v13   ;;  %v1393_v20 = vpack.c.bf16 %v724_v14, %v723_v8  ;;  %v1483_v21 = vpack.c.bf16 %v760_v15, %v759_v9  ;;  %v537_v23 = vadd.f32 %v1876_v44, %v536_v18 }
 0x126   :  { %v765_v22 = vmax.f32 %v689_v17, 0.0  ;;  %v681_v24 = vadd.f32 %v1876_v44, %v680_v19  ;;  %v1624_v25 = vpop.f32.mrf.mxu0  ;;  %v1660_v26 = vpop.f32.mrf.mxu1  ;;  %v729_v29 = vmax.f32 %v545_v16, 0.0 }
 0x127   :  { %1508 = vst [vmem:[%s2064_s3 + $0x70] sm:$0xff] %v1393_v20   ;;  %1526 = vst [vmem:[%s2064_s3 + $0x100] sm:$0xff] %v1483_v21   ;;  %v548_v27 = vadd.f32 %v1624_v25, %v1876_v44  ;;  %v692_v28 = vadd.f32 %v1660_v26, %v1876_v44  ;;  %v727_v37 = vmax.f32 %v537_v23, 0.0 }
 0x128   :  { %v1318_v30 = vpack.c.bf16 %v765_v22, %v765_v22  ;;  %v539_v31 = vpop.f32.mrf.mxu0  ;;  %v683_v32 = vpop.f32.mrf.mxu1  ;;  %v763_v38 = vmax.f32 %v681_v24, 0.0 }
 0x129   :  { %v730_v33 = vmax.f32 %v548_v27, 0.0  ;;  %v766_v34 = vmax.f32 %v692_v28, 0.0  ;;  %v540_v35 = vadd.f32 %v1876_v44, %v539_v31  ;;  %v684_v36 = vadd.f32 %v1876_v44, %v683_v32 }
 0x12a   :  { %1125 = vst [vmem:[%s2064_s3 + $0x118] sm:$0xf] %v1318_v30 }
 0x12b   :  { %v1408_v39 = vpack.c.bf16 %v730_v33, %v729_v29  ;;  %v1319_v40 = vpack.c.bf16 %v766_v34, %v766_v34  ;;  %v728_v41 = vmax.f32 %v540_v35, 0.0  ;;  %v764_v42 = vmax.f32 %v684_v36, 0.0 }
 0x12d   :  { %1511 = vst [vmem:[%s2064_s3 + $0x88] sm:$0xff] %v1408_v39   ;;  %1126 = vst [vmem:[%s2064_s3 + $0x11c] sm:$0x1] %v1319_v40  ;;  %v1403_v43 = vpack.c.bf16 %v728_v41, %v727_v37  ;;  %v1493_v44 = vpack.c.bf16 %v764_v42, %v763_v38 }
 0x12f   :  { %1510 = vst [vmem:[%s2064_s3 + $0x80] sm:$0xff] %v1403_v43   ;;  %1528 = vst [vmem:[%s2064_s3 + $0x110] sm:$0xff] %v1493_v44  }

// kernel: dqn_cnn_forward.6
= control target key start
LH: loop header
LB: loop body
LE: loop exit
PB: predicated region body
PF: predicated region fallthrough
CT: control target
= control target key end

     0   :  { %vm1166_vm0 = vmmov 0   ;;  %s1439_s1 = inlined_call_operand.vmem [shape: bf16[1152,128], index: 1, kind: input, shape index: {}]   ;;  %s1440_s0 = inlined_call_operand.vmem [shape: bf16[12,1152], index: 0, kind: input, shape index: {}]   ;;  %s1441_s2 = inlined_call_operand.vmem [shape: f32[1,128], index: 2, kind: input, shape index: {}]   ;;  %s1442_s3 = inlined_call_operand.vmem [shape: bf16[12,128], index: 3, kind: output, shape index: {}]  }
   0x1   :  { %v1080_v0 = vld [vmem:[%s1439_s1 + $0x78] sm:$0xff]   ;;  %v1084_v4 = vld [vmem:[%s1439_s1 + $0x70] sm:$0xff]   ;;  %v1088_v8 = vld [vmem:[%s1439_s1 + $0x68] sm:$0xff]  }
   0x2   :  { %v1081_v1 = vld [vmem:[%s1439_s1 + $0x38] sm:$0xff]   ;;  %961 = vmatprep.subr.bf16.mxu0 %v1080_v0  ;;  %v1085_v5 = vld [vmem:[%s1439_s1 + $0x30] sm:$0xff]   ;;  %v1089_v9 = vld [vmem:[%s1439_s1 + $0x28] sm:$0xff]  }
   0x3   :  { %v1082_v2 = vld [vmem:[%s1439_s1 + $0xf8] sm:$0xff]   ;;  %962 = vmatpush3.bf16.msra.mxu0 %v1081_v1  ;;  %v1086_v6 = vld [vmem:[%s1439_s1 + $0xf0] sm:$0xff]   ;;  %v1090_v10 = vld [vmem:[%s1439_s1 + $0xe8] sm:$0xff]  }
   0x4   :  { %v1083_v3 = vld [vmem:[%s1439_s1 + $0xb8] sm:$0xff]   ;;  %983 = vmatprep.subr.bf16.mxu1 %v1082_v2  ;;  %963 = vmatprep.subr.bf16.mxu0 %v1084_v4  ;;  %v1087_v7 = vld [vmem:[%s1439_s1 + $0xb0] sm:$0xff]   ;;  %v1091_v11 = vld [vmem:[%s1439_s1 + $0xa8] sm:$0xff]  }
   0x5   :  { %984 = vmatpush3.bf16.msra.mxu1 %v1083_v3  ;;  %v1092_v12 = vld [vmem:[%s1439_s1 + $0x60] sm:$0xff]   ;;  %v1096_v16 = vld [vmem:[%s1439_s1 + $0x58] sm:$0xff]   ;;  %v1100_v20 = vld [vmem:[%s1439_s1 + $0x50] sm:$0xff]  }
   0x6   :  { %985 = vmatprep.subr.bf16.mxu1 %v1086_v6  ;;  %v1093_v13 = vld [vmem:[%s1439_s1 + $0x20] sm:$0xff]   ;;  %v1097_v17 = vld [vmem:[%s1439_s1 + $0x18] sm:$0xff]   ;;  %v1101_v21 = vld [vmem:[%s1439_s1 + $0x10] sm:$0xff]   ;;  %v1165_v6 = vmov 0.0  }
   0x7   :  { %964 = vmatpush3.bf16.msra.mxu0 %v1085_v5  ;;  %v1094_v14 = vld [vmem:[%s1439_s1 + $0xe0] sm:$0xff]   ;;  %v1098_v18 = vld [vmem:[%s1439_s1 + $0xd8] sm:$0xff]   ;;  %v1102_v22 = vld [vmem:[%s1439_s1 + $0xd0] sm:$0xff]  }
   0x8   :  { %965 = vmatprep.subr.bf16.mxu0 %v1088_v8  ;;  %v1095_v15 = vld [vmem:[%s1439_s1 + $0xa0] sm:$0xff]   ;;  %v1099_v19 = vld [vmem:[%s1439_s1 + $0x98] sm:$0xff]   ;;  %v1103_v23 = vld [vmem:[%s1439_s1 + $0x90] sm:$0xff]  }
   0x9   :  { %986 = vmatpush3.bf16.msra.mxu1 %v1087_v7  ;;  %v1104_v24 = vld [vmem:[%s1439_s1 + $0x48] sm:$0xff]   ;;  %v1108_v28 = vld [vmem:[%s1439_s1 + $0x40] sm:$0xff]   ;;  %v1115_v34 = vld [vmem:[%s1439_s1 + $0x178] sm:$0xff]  }
   0xa   :  { %987 = vmatprep.subr.bf16.mxu1 %v1090_v10  ;;  %v1105_v25 = vld [vmem:[%s1439_s1 + $0x8] sm:$0xff]   ;;  %v1109_v29 = vld [vmem:[%s1439_s1] sm:$0xff]   ;;  %v1119_v37 = vld [vmem:[%s1439_s1 + $0x138] sm:$0xff]  }
   0xb   :  { %966 = vmatpush3.bf16.msra.mxu0 %v1089_v9  ;;  %v1106_v26 = vld [vmem:[%s1439_s1 + $0xc8] sm:$0xff]   ;;  %v1110_v30 = vld [vmem:[%s1439_s1 + $0xc0] sm:$0xff]   ;;  %v1120_v38 = vld [vmem:[%s1439_s1 + $0x1f8] sm:$0xff]  }
   0xc   :  { %967 = vmatprep.subr.bf16.mxu0 %v1092_v12  ;;  %v1107_v27 = vld [vmem:[%s1439_s1 + $0x88] sm:$0xff]   ;;  %v1111_v31 = vld [vmem:[%s1440_s0] ss:$36 sps:$4 sm:$0x3f]   ;;  %v1121_v39 = vld [vmem:[%s1439_s1 + $0x1b8] sm:$0xff]  }
   0xd   :  { %988 = vmatpush3.bf16.msra.mxu1 %v1091_v11  ;;  %v1113_v32 = vld [vmem:[%s1440_s0 + $0x4] ss:$36 sps:$4 sm:$0x3f]   ;;  %v1118_v36 = vld [vmem:[%s1440_s0 + $0xc] ss:$36 sps:$4 sm:$0x3f]  }
   0xe   :  { %989 = vmatprep.subr.bf16.mxu1 %v1094_v14  ;;  %v1114_v33 = vld [vmem:[%s1439_s1 + $0x80] sm:$0xff]   ;;  %686 = vmatprep.mubr.bf16.mxu0 %v1113_v32  ;;  %v1116_v35 = vld [vmem:[%s1440_s0 + $0x8] ss:$36 sps:$4 sm:$0x3f]   ;;  %v1122_v40 = vld [vmem:[%s1439_s1 + $0x170] sm:$0xff]  }
   0xf   :  { %968 = vmatpush3.bf16.msra.mxu0 %v1093_v13  ;;  %727 = vmatprep.mubr.bf16.mxu1 %v1118_v36  ;;  %v1123_v41 = vld [vmem:[%s1439_s1 + $0x130] sm:$0xff]   ;;  %v1126_v44 = vld [vmem:[%s1439_s1 + $0x168] sm:$0xff]   ;;  %v1130_v48 = vld [vmem:[%s1439_s1 + $0x160] sm:$0xff]  }
  0x10   :  { %969 = vmatprep.subr.bf16.mxu0 %v1096_v16  ;;  %v1124_v42 = vld [vmem:[%s1439_s1 + $0x1f0] sm:$0xff]   ;;  %v1127_v45 = vld [vmem:[%s1439_s1 + $0x128] sm:$0xff]   ;;  %v1131_v49 = vld [vmem:[%s1439_s1 + $0x120] sm:$0xff]  }
  0x11   :  { %990 = vmatpush3.bf16.msra.mxu1 %v1095_v15  ;;  %v1125_v43 = vld [vmem:[%s1439_s1 + $0x1b0] sm:$0xff]   ;;  %v1128_v46 = vld [vmem:[%s1439_s1 + $0x1e8] sm:$0xff]   ;;  %v1132_v50 = vld [vmem:[%s1439_s1 + $0x1e0] sm:$0xff]  }
  0x12   :  { %991 = vmatprep.subr.bf16.mxu1 %v1098_v18  ;;  %v1129_v47 = vld [vmem:[%s1439_s1 + $0x1a8] sm:$0xff]   ;;  %v1133_v51 = vld [vmem:[%s1439_s1 + $0x1a0] sm:$0xff]   ;;  %v1134_v52 = vld [vmem:[%s1439_s1 + $0x158] sm:$0xff]  }
  0x13   :  { %970 = vmatpush3.bf16.msra.mxu0 %v1097_v17  ;;  %v1135_v53 = vld [vmem:[%s1439_s1 + $0x118] sm:$0xff]   ;;  %v1138_v56 = vld [vmem:[%s1439_s1 + $0x150] sm:$0xff]   ;;  %v1142_v60 = vld [vmem:[%s1439_s1 + $0x148] sm:$0xff]  }
  0x14   :  { %971 = vmatprep.subr.bf16.mxu0 %v1100_v20  ;;  %v1136_v54 = vld [vmem:[%s1439_s1 + $0x1d8] sm:$0xff]   ;;  %v1139_v57 = vld [vmem:[%s1439_s1 + $0x110] sm:$0xff]   ;;  %v1143_v61 = vld [vmem:[%s1439_s1 + $0x108] sm:$0xff]  }
  0x15   :  { %992 = vmatpush3.bf16.msra.mxu1 %v1099_v19  ;;  %v1137_v55 = vld [vmem:[%s1439_s1 + $0x198] sm:$0xff]   ;;  %v1140_v58 = vld [vmem:[%s1439_s1 + $0x1d0] sm:$0xff]   ;;  %v1144_v62 = vld [vmem:[%s1439_s1 + $0x1c8] sm:$0xff]  }
  0x16   :  { %993 = vmatprep.subr.bf16.mxu1 %v1102_v22  ;;  %v1141_v59 = vld [vmem:[%s1439_s1 + $0x190] sm:$0xff]   ;;  %v1145_v63 = vld [vmem:[%s1439_s1 + $0x188] sm:$0xff]   ;;  %v1146_v0 = vld [vmem:[%s1439_s1 + $0x140] sm:$0xff]  }
  0x17   :  { %972 = vmatpush3.bf16.msra.mxu0 %v1101_v21  ;;  %v1147_v1 = vld [vmem:[%s1439_s1 + $0x100] sm:$0xff]   ;;  %v1149_v3 = vld [vmem:[%s1440_s0 + $0x10] ss:$36 sps:$4 sm:$0x3f]   ;;  %v1156_v9 = vld [vmem:[%s1439_s1 + $0x238] sm:$0xff]  }
  0x18   :  { %973 = vmatprep.subr.bf16.mxu0 %v1104_v24  ;;  %v1148_v2 = vld [vmem:[%s1439_s1 + $0x1c0] sm:$0xff]   ;;  %v1151_v4 = vld [vmem:[%s1440_s0 + $0x14] ss:$36 sps:$4 sm:$0x3f]   ;;  %v1158_v11 = vld [vmem:[%s1439_s1 + $0x228] sm:$0xff]  }
  0x19   :  { %994 = vmatpush3.bf16.msra.mxu1 %v1103_v23  ;;  %v1152_v5 = vld [vmem:[%s1439_s1 + $0x180] sm:$0xff]   ;;  %v1153_v7 = vld [vmem:[%s1440_s0 + $0x18] ss:$36 sps:$4 sm:$0x3f]   ;;  %v1157_v10 = vld [vmem:[%s1439_s1 + $0x230] sm:$0xff]  }
  0x1a   :  { %995 = vmatprep.subr.bf16.mxu1 %v1106_v26  ;;  %v1155_v8 = vld [vmem:[%s1440_s0 + $0x1c] ss:$36 sps:$4 sm:$0x3f]   ;;  %v1161_v14 = vld [vmem:[%s1439_s1 + $0x210] sm:$0xff]   ;;  %v1162_v15 = vld [vmem:[%s1439_s1 + $0x208] sm:$0xff]  }
  0x1b   :  { %974 = vmatpush3.bf16.msra.mxu0 %v1105_v25  ;;  %v1159_v12 = vld [vmem:[%s1439_s1 + $0x220] sm:$0xff]   ;;  %v1160_v13 = vld [vmem:[%s1439_s1 + $0x218] sm:$0xff]  }
  0x1c   :  { %975 = vmatprep.subr.bf16.mxu0 %v1108_v28  ;;  %v1163_v16 = vld [vmem:[%s1439_s1 + $0x200] sm:$0xff]  }
  0x1d   :  { %996 = vmatpush3.bf16.msra.mxu1 %v1107_v27  ;;  %v1164_v17 = vld [vmem:[%s1440_s0 + $0x20] ss:$36 sps:$4 sm:$0x3f]  }
  0x1e   :  { %997 = vmatprep.subr.bf16.mxu1 %v1110_v30  ;;  %v875_v30 = vld [vmem:[%s1441_s2] ss:$0 sm:$0xff] }
  0x1f   :  { %976 = vmatpush3.bf16.msra.mxu0 %v1109_v29 }
  0x20   :  { %1005 = vmatprep.subr.bf16.mxu0 %v1115_v34 }
  0x21   :  { %998 = vmatpush3.bf16.msra.mxu1 %v1114_v33 }
  0x22   :  { %687 = vmatmul.mubr.bf16.vlgmr.msra.gmra.mxu0 %v1111_v31  ;;  %1027 = vmatprep.subr.bf16.mxu1 %v1120_v38 }
  0x23   :  { %1006 = vmatpush3.bf16.msra.mxu0 %v1119_v37  ;;  %768 = vmatprep.mubr.bf16.mxu0 %v1151_v4 }
  0x24   :  { %728 = vmatmul.mubr.bf16.vlgmr.msra.gmra.mxu1 %v1116_v35  ;;  %1007 = vmatprep.subr.bf16.mxu0 %v1122_v40 }
  0x25   :  { %1028 = vmatpush3.bf16.msra.mxu1 %v1121_v39  ;;  %809 = vmatprep.mubr.bf16.mxu1 %v1155_v8 }
  0x26   :  { %1029 = vmatprep.subr.bf16.mxu1 %v1124_v42 }
  0x27   :  { %1008 = vmatpush3.bf16.msra.mxu0 %v1123_v41 }
  0x28   :  { %1009 = vmatprep.subr.bf16.mxu0 %v1126_v44 }
  0x29   :  { %1030 = vmatpush3.bf16.msra.mxu1 %v1125_v43 }
  0x2a   :  { %1031 = vmatprep.subr.bf16.mxu1 %v1128_v46 }
  0x2b   :  { %1010 = vmatpush3.bf16.msra.mxu0 %v1127_v45 }
  0x2c   :  { %1011 = vmatprep.subr.bf16.mxu0 %v1130_v48 }
  0x2d   :  { %1032 = vmatpush3.bf16.msra.mxu1 %v1129_v47 }
  0x2e   :  { %1033 = vmatprep.subr.bf16.mxu1 %v1132_v50 }
  0x2f   :  { %1012 = vmatpush3.bf16.msra.mxu0 %v1131_v49 }
  0x30   :  { %1013 = vmatprep.subr.bf16.mxu0 %v1134_v52 }
  0x31   :  { %1034 = vmatpush3.bf16.msra.mxu1 %v1133_v51 }
  0x32   :  { %1035 = vmatprep.subr.bf16.mxu1 %v1136_v54 }
  0x33   :  { %1014 = vmatpush3.bf16.msra.mxu0 %v1135_v53 }
  0x34   :  { %1015 = vmatprep.subr.bf16.mxu0 %v1138_v56 }
  0x35   :  { %1036 = vmatpush3.bf16.msra.mxu1 %v1137_v55 }
  0x36   :  { %1037 = vmatprep.subr.bf16.mxu1 %v1140_v58 }
  0x37   :  { %1016 = vmatpush3.bf16.msra.mxu0 %v1139_v57 }
  0x38   :  { %1017 = vmatprep.subr.bf16.mxu0 %v1142_v60 }
  0x39   :  { %1038 = vmatpush3.bf16.msra.mxu1 %v1141_v59 }
  0x3a   :  { %1039 = vmatprep.subr.bf16.mxu1 %v1144_v62 }
  0x3b   :  { %1018 = vmatpush3.bf16.msra.mxu0 %v1143_v61 }
  0x3c   :  { %1019 = vmatprep.subr.bf16.mxu0 %v1146_v0 }
  0x3d   :  { %1040 = vmatpush3.bf16.msra.mxu1 %v1145_v63 }
  0x3e   :  { %1041 = vmatprep.subr.bf16.mxu1 %v1148_v2 }
  0x3f   :  { %1020 = vmatpush3.bf16.msra.mxu0 %v1147_v1 }
  0x40   :  { %1058 = vmatprep.subr.bf16.mxu0 %v1165_v6 }
  0x41   :  { %1042 = vmatpush3.bf16.msra.mxu1 %v1152_v5 }
  0x42   :  { %769 = vmatmul.mubr.bf16.vlgmr.msra.gmra.mxu0 %v1149_v3 }
  0x43   :  { %1074 = vmatprep.mubr.msk.bf16.mxu0 %vm1166_vm0, %v1165_v6  ;;  %1059 = vmatpush3.bf16.msra.mxu0 %v1156_v9 }
  0x44   :  { %810 = vmatmul.mubr.bf16.vlgmr.msra.gmra.mxu1 %v1153_v7  ;;  %1060 = vmatprep.subr.bf16.mxu0 %v1165_v6 }
  0x47   :  { %1061 = vmatpush3.bf16.msra.mxu0 %v1157_v10 }
  0x48   :  { %1062 = vmatprep.subr.bf16.mxu0 %v1165_v6 }
  0x4b   :  { %1063 = vmatpush3.bf16.msra.mxu0 %v1158_v11 }
  0x4c   :  { %1064 = vmatprep.subr.bf16.mxu0 %v1165_v6 }
  0x4f   :  { %1065 = vmatpush3.bf16.msra.mxu0 %v1159_v12 }
  0x50   :  { %1066 = vmatprep.subr.bf16.mxu0 %v1165_v6 }
  0x53   :  { %1067 = vmatpush3.bf16.msra.mxu0 %v1160_v13 }
  0x54   :  { %1068 = vmatprep.subr.bf16.mxu0 %v1165_v6 }
  0x57   :  { %1069 = vmatpush3.bf16.msra.mxu0 %v1161_v14 }
  0x58   :  { %1070 = vmatprep.subr.bf16.mxu0 %v1165_v6 }
  0x5b   :  { %1071 = vmatpush3.bf16.msra.mxu0 %v1162_v15 }
  0x5c   :  { %1072 = vmatprep.subr.bf16.mxu0 %v1165_v6 }
  0x5f   :  { %1073 = vmatpush3.bf16.msra.mxu0 %v1163_v16 }
  0x62   :  { %1075 = vmatmul.mubr.bf16.vlgmr.msra.gmra.mxu0 %v1164_v17 }
  0xe2   :  { %v977_v18 = vpop.f32.mrf.mxu0 }
  0xe4   :  { %v978_v19 = vpop.f32.mrf.mxu0  ;;  %v999_v20 = vpop.f32.mrf.mxu1 }
  0xe5   :  { %v979_v29 = vadd.f32 %v978_v19, %v977_v18 }
  0xe6   :  { %v980_v21 = vpop.f32.mrf.mxu0  ;;  %v1000_v22 = vpop.f32.mrf.mxu1 }
  0xe7   :  { %v689_v33 = vadd.f32 %v979_v29, %v875_v30  ;;  %v1001_v34 = vadd.f32 %v1000_v22, %v999_v20 }
  0xe8   :  { %v981_v23 = vpop.f32.mrf.mxu0  ;;  %v1002_v24 = vpop.f32.mrf.mxu1 }
  0xe9   :  { %v982_v35 = vadd.f32 %v981_v23, %v980_v21  ;;  %v730_v39 = vadd.f32 %v1001_v34, %v689_v33 }
  0xea   :  { %v1003_v26 = vpop.f32.mrf.mxu1 }
  0xeb   :  { %v692_v40 = vadd.f32 %v982_v35, %v875_v30  ;;  %v1004_v41 = vadd.f32 %v1003_v26, %v1002_v24 }
  0xed   :  { %v733_v46 = vadd.f32 %v1004_v41, %v692_v40 }
 0x102   :  { %v1021_v25 = vpop.f32.mrf.mxu0 }
 0x104   :  { %v1022_v27 = vpop.f32.mrf.mxu0  ;;  %v1043_v28 = vpop.f32.mrf.mxu1 }
 0x105   :  { %v1023_v36 = vadd.f32 %v1022_v27, %v1021_v25 }
 0x106   :  { %v1024_v31 = vpop.f32.mrf.mxu0  ;;  %v1044_v32 = vpop.f32.mrf.mxu1 }
 0x107   :  { %v771_v42 = vadd.f32 %v1023_v36, %v730_v39  ;;  %v1045_v43 = vadd.f32 %v1044_v32, %v1043_v28 }
 0x108   :  { %v1025_v37 = vpop.f32.mrf.mxu0  ;;  %v1046_v38 = vpop.f32.mrf.mxu1 }
 0x109   :  { %v1026_v44 = vadd.f32 %v1025_v37, %v1024_v31  ;;  %v812_v49 = vadd.f32 %v1045_v43, %v771_v42 }
 0x10a   :  { %v1047_v45 = vpop.f32.mrf.mxu1 }
 0x10b   :  { %v774_v47 = vadd.f32 %v1026_v44, %v733_v46  ;;  %v1048_v48 = vadd.f32 %v1047_v45, %v1046_v38 }
 0x10d   :  { %v815_v54 = vadd.f32 %v1048_v48, %v774_v47 }
 0x122   :  { %v852_v50 = vpop.f32.mrf.mxu0 }
 0x123   :  { %v853_v51 = vadd.f32 %v852_v50, %v812_v49 }
 0x124   :  { %v1076_v52 = vpop.f32.mrf.mxu0 }
 0x125   :  { %v859_v53 = vmax.f32 %v853_v51, 0.0 }
 0x126   :  { %v855_v55 = vpop.f32.mrf.mxu0 }
 0x127   :  { %v959_v56 = vpack.c.bf16 %v859_v53, %v859_v53  ;;  %v856_v57 = vadd.f32 %v855_v55, %v815_v54 }
 0x128   :  { %v1077_v58 = vpop.f32.mrf.mxu0 }
 0x129   :  { %869 = vst [vmem:[%s1442_s3] sm:$0xf] %v959_v56  ;;  %v860_v59 = vmax.f32 %v856_v57, 0.0 }
 0x12b   :  { %v960_v60 = vpack.c.bf16 %v860_v59, %v860_v59 }
 0x12d   :  { %870 = vst [vmem:[%s1442_s3 + $0x4] sm:$0x3] %v960_v60 }

// kernel: dqn_cnn_forward.5
= control target key start
LH: loop header
LB: loop body
LE: loop exit
PB: predicated region body
PF: predicated region fallthrough
CT: control target
= control target key end

     0   :  { %s6471_s1 = inlined_call_operand.vmem [shape: bf16[3200,128], index: 1, kind: input, shape index: {}]   ;;  %s6472_s0 = inlined_call_operand.vmem [shape: bf16[96,3200], index: 0, kind: input, shape index: {}]   ;;  %s6473_s2 = inlined_call_operand.vmem [shape: f32[1,128], index: 2, kind: input, shape index: {}]   ;;  %s6474_s3 = inlined_call_operand.vmem [shape: bf16[96,128], index: 3, kind: output, shape index: {}]  }
   0x1   :  { %v4755_v0 = vld [vmem:[%s6471_s1 + $0x78] sm:$0xff]   ;;  %v4759_v4 = vld [vmem:[%s6471_s1 + $0x70] sm:$0xff]   ;;  %v4763_v8 = vld [vmem:[%s6471_s1 + $0x68] sm:$0xff]  }
   0x2   :  { %v4756_v1 = vld [vmem:[%s6471_s1 + $0xf8] sm:$0xff]   ;;  %4073 = vmatprep.subr.bf16.mxu0 %v4755_v0  ;;  %v4760_v5 = vld [vmem:[%s6471_s1 + $0xf0] sm:$0xff]   ;;  %v4764_v9 = vld [vmem:[%s6471_s1 + $0xe8] sm:$0xff]  }
   0x3   :  { %v4757_v2 = vld [vmem:[%s6471_s1 + $0x38] sm:$0xff]   ;;  %4125 = vmatprep.subr.bf16.mxu1 %v4756_v1  ;;  %v4761_v6 = vld [vmem:[%s6471_s1 + $0x30] sm:$0xff]   ;;  %v4765_v10 = vld [vmem:[%s6471_s1 + $0x28] sm:$0xff]  }
   0x4   :  { %v4758_v3 = vld [vmem:[%s6471_s1 + $0xb8] sm:$0xff]   ;;  %4074 = vmatpush3.bf16.msra.mxu0 %v4757_v2  ;;  %v4762_v7 = vld [vmem:[%s6471_s1 + $0xb0] sm:$0xff]   ;;  %v4766_v11 = vld [vmem:[%s6471_s1 + $0xa8] sm:$0xff]  }
   0x5   :  { %4126 = vmatpush3.bf16.msra.mxu1 %v4758_v3  ;;  %4075 = vmatprep.subr.bf16.mxu0 %v4759_v4  ;;  %v4767_v12 = vld [vmem:[%s6471_s1 + $0x60] sm:$0xff]   ;;  %v4771_v16 = vld [vmem:[%s6471_s1 + $0x58] sm:$0xff]   ;;  %v4775_v20 = vld [vmem:[%s6471_s1 + $0x50] sm:$0xff]  }
   0x6   :  { %4127 = vmatprep.subr.bf16.mxu1 %v4760_v5  ;;  %v4768_v13 = vld [vmem:[%s6471_s1 + $0xe0] sm:$0xff]   ;;  %v4772_v17 = vld [vmem:[%s6471_s1 + $0xd8] sm:$0xff]   ;;  %v4776_v21 = vld [vmem:[%s6471_s1 + $0xd0] sm:$0xff]  }
   0x7   :  { %v4769_v14 = vld [vmem:[%s6471_s1 + $0x20] sm:$0xff]   ;;  %v4773_v18 = vld [vmem:[%s6471_s1 + $0x18] sm:$0xff]   ;;  %v4777_v22 = vld [vmem:[%s6471_s1 + $0x10] sm:$0xff]  }
   0x8   :  { %4076 = vmatpush3.bf16.msra.mxu0 %v4761_v6  ;;  %v4770_v15 = vld [vmem:[%s6471_s1 + $0xa0] sm:$0xff]   ;;  %v4774_v19 = vld [vmem:[%s6471_s1 + $0x98] sm:$0xff]   ;;  %v4778_v23 = vld [vmem:[%s6471_s1 + $0x90] sm:$0xff]  }
   0x9   :  { %4128 = vmatpush3.bf16.msra.mxu1 %v4762_v7  ;;  %4077 = vmatprep.subr.bf16.mxu0 %v4763_v8  ;;  %v4779_v24 = vld [vmem:[%s6471_s1 + $0x48] sm:$0xff]   ;;  %v4783_v28 = vld [vmem:[%s6471_s1 + $0x40] sm:$0xff]   ;;  %v4793_v36 = vld [vmem:[%s6471_s1 + $0x1f8] sm:$0xff]  }
   0xa   :  { %4129 = vmatprep.subr.bf16.mxu1 %v4764_v9  ;;  %v4780_v25 = vld [vmem:[%s6471_s1 + $0xc8] sm:$0xff]   ;;  %v4784_v29 = vld [vmem:[%s6471_s1 + $0xc0] sm:$0xff]   ;;  %v4794_v37 = vld [vmem:[%s6471_s1 + $0x1b8] sm:$0xff]  }
   0xb   :  { %v4781_v26 = vld [vmem:[%s6471_s1 + $0x8] sm:$0xff]   ;;  %v4785_v30 = vld [vmem:[%s6471_s1] sm:$0xff]   ;;  %v4795_v38 = vld [vmem:[%s6471_s1 + $0x1f0] sm:$0xff]  }
   0xc   :  { %4078 = vmatpush3.bf16.msra.mxu0 %v4765_v10  ;;  %v4782_v27 = vld [vmem:[%s6471_s1 + $0x88] sm:$0xff]   ;;  %v4786_v31 = vld [vmem:[%s6471_s1 + $0x80] sm:$0xff]   ;;  %v4798_v40 = vld [vmem:[%s6472_s0 + $0xd4] ss:$100 sps:$4 sm:$0xff]  }
   0xd   :  { %4130 = vmatpush3.bf16.msra.mxu1 %v4766_v11  ;;  %4079 = vmatprep.subr.bf16.mxu0 %v4767_v12  ;;  %v4787_v32 = vld [vmem:[%s6472_s0] ss:$100 sps:$4 sm:$0xff]   ;;  %v4790_v34 = vld [vmem:[%s6472_s0 + $0x8] ss:$100 sps:$4 sm:$0xff]   ;;  %v4800_v41 = vld [vmem:[%s6471_s1 + $0x1b0] sm:$0xff]  }
   0xe   :  { %4131 = vmatprep.subr.bf16.mxu1 %v4768_v13  ;;  %v4789_v33 = vld [vmem:[%s6472_s0 + $0x4] ss:$100 sps:$4 sm:$0xff]   ;;  %v4792_v35 = vld [vmem:[%s6472_s0 + $0xc] ss:$100 sps:$4 sm:$0xff]   ;;  %v4803_v44 = vld [vmem:[%s6471_s1 + $0x178] sm:$0xff]  }
   0xf   :  { %2566 = vmatprep.mubr.bf16.mxu0 %v4789_v33  ;;  %2647 = vmatprep.mubr.bf16.mxu1 %v4792_v35  ;;  %v4796_v39 = vld [vmem:[%s6472_s0 + $0xcc] ss:$100 sps:$4 sm:$0xff]   ;;  %v4804_v45 = vld [vmem:[%s6471_s1 + $0x138] sm:$0xff]   ;;  %v4815_v54 = vld [vmem:[%s6471_s1 + $0x1e0] sm:$0xff]  }
  0x10   :  { %4080 = vmatpush3.bf16.msra.mxu0 %v4769_v14  ;;  %v4801_v42 = vld [vmem:[%s6472_s0 + $0xc8] ss:$100 sps:$4 sm:$0xff]   ;;  %v4802_v43 = vld [vmem:[%s6472_s0 + $0xd0] ss:$100 sps:$4 sm:$0xff]   ;;  %v4810_v50 = vld [vmem:[%s6472_s0 + $0x19c] ss:$100 sps:$4 sm:$0xff]  }
  0x11   :  { %4132 = vmatpush3.bf16.msra.mxu1 %v4770_v15  ;;  %4081 = vmatprep.subr.bf16.mxu0 %v4771_v16  ;;  %v4805_v46 = vld [vmem:[%s6471_s1 + $0x1e8] sm:$0xff]   ;;  %v4807_v48 = vld [vmem:[%s6471_s1 + $0x170] sm:$0xff]   ;;  %v4814_v53 = vld [vmem:[%s6472_s0 + $0x198] ss:$100 sps:$4 sm:$0xff]  }
  0x12   :  { %4133 = vmatprep.subr.bf16.mxu1 %v4772_v17  ;;  %v4806_v47 = vld [vmem:[%s6471_s1 + $0x1a8] sm:$0xff]   ;;  %v4808_v49 = vld [vmem:[%s6472_s0 + $0x194] ss:$100 sps:$4 sm:$0xff]   ;;  %v4816_v55 = vld [vmem:[%s6471_s1 + $0x1a0] sm:$0xff]  }
  0x13   :  { %v4812_v51 = vld [vmem:[%s6471_s1 + $0x130] sm:$0xff]   ;;  %v4817_v56 = vld [vmem:[%s6471_s1 + $0x168] sm:$0xff]   ;;  %v4819_v58 = vld [vmem:[%s6472_s0 + $0x25c] ss:$100 sps:$4 sm:$0xff]  }
  0x14   :  { %4082 = vmatpush3.bf16.msra.mxu0 %v4773_v18  ;;  %v4813_v52 = vld [vmem:[%s6472_s0 + $0x190] ss:$100 sps:$4 sm:$0xff]   ;;  %v4818_v57 = vld [vmem:[%s6471_s1 + $0x128] sm:$0xff]   ;;  %v4823_v60 = vld [vmem:[%s6472_s0 + $0x258] ss:$100 sps:$4 sm:$0xff]  }
  0x15   :  { %4134 = vmatpush3.bf16.msra.mxu1 %v4774_v19  ;;  %4083 = vmatprep.subr.bf16.mxu0 %v4775_v20  ;;  %v4821_v59 = vld [vmem:[%s6472_s0 + $0x264] ss:$100 sps:$4 sm:$0xff]   ;;  %v4825_v62 = vld [vmem:[%s6471_s1 + $0x1d8] sm:$0xff]   ;;  %v4829_v2 = vld [vmem:[%s6471_s1 + $0x1d0] sm:$0xff]  }
  0x16   :  { %4135 = vmatprep.subr.bf16.mxu1 %v4776_v21  ;;  %v4824_v61 = vld [vmem:[%s6472_s0 + $0x260] ss:$100 sps:$4 sm:$0xff]   ;;  %v4826_v63 = vld [vmem:[%s6471_s1 + $0x198] sm:$0xff]   ;;  %v4832_v4 = vld [vmem:[%s6472_s0 + $0x32c] ss:$100 sps:$4 sm:$0xff]  }
  0x17   :  { %v4827_v0 = vld [vmem:[%s6471_s1 + $0x160] sm:$0xff]   ;;  %v4834_v5 = vld [vmem:[%s6471_s1 + $0x190] sm:$0xff]   ;;  %v4836_v7 = vld [vmem:[%s6472_s0 + $0x328] ss:$100 sps:$4 sm:$0xff]  }
  0x18   :  { %4084 = vmatpush3.bf16.msra.mxu0 %v4777_v22  ;;  %v4828_v1 = vld [vmem:[%s6471_s1 + $0x120] sm:$0xff]   ;;  %v4837_v8 = vld [vmem:[%s6471_s1 + $0x158] sm:$0xff]   ;;  %v4839_v10 = vld [vmem:[%s6471_s1 + $0x150] sm:$0xff]  }
  0x19   :  { %4136 = vmatpush3.bf16.msra.mxu1 %v4778_v23  ;;  %4085 = vmatprep.subr.bf16.mxu0 %v4779_v24  ;;  %v4830_v3 = vld [vmem:[%s6472_s0 + $0x324] ss:$100 sps:$4 sm:$0xff]   ;;  %v4838_v9 = vld [vmem:[%s6471_s1 + $0x118] sm:$0xff]   ;;  %v4841_v12 = vld [vmem:[%s6471_s1 + $0x110] sm:$0xff]  }
  0x1a   :  { %4137 = vmatprep.subr.bf16.mxu1 %v4780_v25  ;;  %v4835_v6 = vld [vmem:[%s6472_s0 + $0x320] ss:$100 sps:$4 sm:$0xff]   ;;  %v4840_v11 = vld [vmem:[%s6471_s1 + $0x1c8] sm:$0xff]   ;;  %v4845_v15 = vld [vmem:[%s6472_s0 + $0x3f4] ss:$100 sps:$4 sm:$0xff]  }
  0x1b   :  { %v4842_v13 = vld [vmem:[%s6471_s1 + $0x188] sm:$0xff]   ;;  %v4848_v17 = vld [vmem:[%s6472_s0 + $0x3f0] ss:$100 sps:$4 sm:$0xff]   ;;  %v4851_v20 = vld [vmem:[%s6471_s1 + $0x1c0] sm:$0xff]  }
  0x1c   :  { %4086 = vmatpush3.bf16.msra.mxu0 %v4781_v26  ;;  %v4843_v14 = vld [vmem:[%s6472_s0 + $0x3ec] ss:$100 sps:$4 sm:$0xff]   ;;  %v4852_v21 = vld [vmem:[%s6471_s1 + $0x180] sm:$0xff]   ;;  %v4857_v25 = vld [vmem:[%s6472_s0 + $0x14] ss:$100 sps:$4 sm:$0xff]  }
  0x1d   :  { %4138 = vmatpush3.bf16.msra.mxu1 %v4782_v27  ;;  %4087 = vmatprep.subr.bf16.mxu0 %v4783_v28  ;;  %v4847_v16 = vld [vmem:[%s6472_s0 + $0x3e8] ss:$100 sps:$4 sm:$0xff]   ;;  %v4853_v22 = vld [vmem:[%s6471_s1 + $0x140] sm:$0xff]   ;;  %v4855_v24 = vld [vmem:[%s6472_s0 + $0x10] ss:$100 sps:$4 sm:$0xff]  }
  0x1e   :  { %4139 = vmatprep.subr.bf16.mxu1 %v4784_v29  ;;  %v4849_v18 = vld [vmem:[%s6471_s1 + $0x148] sm:$0xff]   ;;  %v4854_v23 = vld [vmem:[%s6471_s1 + $0x100] sm:$0xff]   ;;  %v4858_v26 = vld [vmem:[%s6472_s0 + $0x18] ss:$100 sps:$4 sm:$0xff]  }
  0x1f   :  { %v4850_v19 = vld [vmem:[%s6471_s1 + $0x108] sm:$0xff]   ;;  %v4860_v27 = vld [vmem:[%s6472_s0 + $0x1c] ss:$100 sps:$4 sm:$0xff]   ;;  %v4868_v33 = vld [vmem:[%s6471_s1 + $0x2b0] sm:$0xff]  }
  0x20   :  { %4088 = vmatpush3.bf16.msra.mxu0 %v4785_v30  ;;  %v4861_v28 = vld [vmem:[%s6471_s1 + $0x2f8] sm:$0xff]   ;;  %v4863_v30 = vld [vmem:[%s6471_s1 + $0x2f0] sm:$0xff]   ;;  %v4870_v35 = vld [vmem:[%s6472_s0 + $0xe0] ss:$100 sps:$4 sm:$0xff]  }
  0x21   :  { %4140 = vmatpush3.bf16.msra.mxu1 %v4786_v31  ;;  %4177 = vmatprep.subr.bf16.mxu0 %v4803_v44  ;;  %v4862_v29 = vld [vmem:[%s6471_s1 + $0x2b8] sm:$0xff]   ;;  %v4881_v44 = vld [vmem:[%s6472_s0 + $0x1a0] ss:$100 sps:$4 sm:$0xff]  }
  0x22   :  { %4229 = vmatprep.subr.bf16.mxu1 %v4793_v36  ;;  %v4864_v31 = vld [vmem:[%s6472_s0 + $0xdc] ss:$100 sps:$4 sm:$0xff]  }
  0x23   :  { %2567 = vmatmul.mubr.bf16.vlgmr.msra.gmra.mxu0 %v4787_v32  ;;  %v4866_v32 = vld [vmem:[%s6472_s0 + $0xe4] ss:$100 sps:$4 sm:$0xff]   ;;  %v4871_v36 = vld [vmem:[%s6471_s1 + $0x278] sm:$0xff]  }
  0x24   :  { %2648 = vmatmul.mubr.bf16.vlgmr.msra.gmra.mxu1 %v4790_v34  ;;  %2574 = vmatprep.mubr.bf16.mxu0 %v4796_v39  ;;  %v4869_v34 = vld [vmem:[%s6472_s0 + $0xd8] ss:$100 sps:$4 sm:$0xff]   ;;  %v4874_v39 = vld [vmem:[%s6471_s1 + $0x2a8] sm:$0xff]  }
  0x25   :  { %4230 = vmatpush3.bf16.msra.mxu1 %v4794_v37  ;;  %2655 = vmatprep.mubr.bf16.mxu1 %v4798_v40  ;;  %v4872_v37 = vld [vmem:[%s6471_s1 + $0x238] sm:$0xff]   ;;  %v4875_v40 = vld [vmem:[%s6471_s1 + $0x270] sm:$0xff]  }
  0x26   :  { %4231 = vmatprep.subr.bf16.mxu1 %v4795_v38  ;;  %4178 = vmatpush3.bf16.msra.mxu0 %v4804_v45  ;;  %v4873_v38 = vld [vmem:[%s6471_s1 + $0x2e8] sm:$0xff]  }
  0x27   :  { %4179 = vmatprep.subr.bf16.mxu0 %v4807_v48  ;;  %v4882_v45 = vld [vmem:[%s6472_s0 + $0x1a8] ss:$100 sps:$4 sm:$0xff]  }
  0x28   :  { %v4885_v48 = vld [vmem:[%s6471_s1 + $0x268] sm:$0xff]  }
  0x29   :  { %4232 = vmatpush3.bf16.msra.mxu1 %v4800_v41  ;;  %v4876_v41 = vld [vmem:[%s6472_s0 + $0x1a4] ss:$100 sps:$4 sm:$0xff]  }
  0x2a   :  { %4233 = vmatprep.subr.bf16.mxu1 %v4805_v46  ;;  %4180 = vmatpush3.bf16.msra.mxu0 %v4812_v51  ;;  %v4883_v46 = vld [vmem:[%s6471_s1 + $0x2e0] sm:$0xff]   ;;  %v4889_v51 = vld [vmem:[%s6472_s0 + $0x274] ss:$100 sps:$4 sm:$0xff]  }
  0x2b   :  { %2575 = vmatmul.mubr.bf16.gmra.mxu0 %v4801_v42  ;;  %4181 = vmatprep.subr.bf16.mxu0 %v4817_v56  ;;  %v4878_v42 = vld [vmem:[%s6472_s0 + $0x1ac] ss:$100 sps:$4 sm:$0xff]   ;;  %v4895_v56 = vld [vmem:[%s6471_s1 + $0x260] sm:$0xff]  }
  0x2c   :  { %2656 = vmatmul.mubr.bf16.gmra.mxu1 %v4802_v43  ;;  %2582 = vmatprep.mubr.bf16.mxu0 %v4808_v49  ;;  %v4880_v43 = vld [vmem:[%s6471_s1 + $0x230] sm:$0xff]   ;;  %v4886_v49 = vld [vmem:[%s6471_s1 + $0x228] sm:$0xff]  }
  0x2d   :  { %4234 = vmatpush3.bf16.msra.mxu1 %v4806_v47  ;;  %2663 = vmatprep.mubr.bf16.mxu1 %v4810_v50  ;;  %v4884_v47 = vld [vmem:[%s6471_s1 + $0x2a0] sm:$0xff]   ;;  %v4887_v50 = vld [vmem:[%s6472_s0 + $0x26c] ss:$100 sps:$4 sm:$0xff]  }
  0x2e   :  { %4235 = vmatprep.subr.bf16.mxu1 %v4815_v54  ;;  %4182 = vmatpush3.bf16.msra.mxu0 %v4818_v57  ;;  %v4893_v54 = vld [vmem:[%s6471_s1 + $0x2d8] sm:$0xff]   ;;  %v4896_v57 = vld [vmem:[%s6471_s1 + $0x220] sm:$0xff]  }
  0x2f   :  { %4183 = vmatprep.subr.bf16.mxu0 %v4827_v0  ;;  %v4905_v0 = vld [vmem:[%s6471_s1 + $0x258] sm:$0xff]  }
  0x31   :  { %4236 = vmatpush3.bf16.msra.mxu1 %v4816_v55  ;;  %v4894_v55 = vld [vmem:[%s6471_s1 + $0x298] sm:$0xff]  }
  0x32   :  { %4237 = vmatprep.subr.bf16.mxu1 %v4825_v62  ;;  %4184 = vmatpush3.bf16.msra.mxu0 %v4828_v1  ;;  %v4903_v62 = vld [vmem:[%s6472_s0 + $0x330] ss:$100 sps:$4 sm:$0xff]   ;;  %v4906_v1 = vld [vmem:[%s6471_s1 + $0x218] sm:$0xff]  }
  0x33   :  { %2583 = vmatmul.mubr.bf16.gmra.mxu0 %v4813_v52  ;;  %4185 = vmatprep.subr.bf16.mxu0 %v4837_v8  ;;  %v4891_v52 = vld [vmem:[%s6472_s0 + $0x268] ss:$100 sps:$4 sm:$0xff]   ;;  %v4915_v8 = vld [vmem:[%s6472_s0 + $0x3f8] ss:$100 sps:$4 sm:$0xff]  }
  0x34   :  { %2664 = vmatmul.mubr.bf16.gmra.mxu1 %v4814_v53  ;;  %2590 = vmatprep.mubr.bf16.mxu0 %v4819_v58  ;;  %v4892_v53 = vld [vmem:[%s6472_s0 + $0x270] ss:$100 sps:$4 sm:$0xff]  }
  0x35   :  { %2671 = vmatprep.mubr.bf16.mxu1 %v4821_v59  ;;  %4238 = vmatpush3.bf16.msra.mxu1 %v4826_v63  ;;  %v4897_v58 = vld [vmem:[%s6471_s1 + $0x2d0] sm:$0xff]   ;;  %v4904_v63 = vld [vmem:[%s6472_s0 + $0x338] ss:$100 sps:$4 sm:$0xff]  }
  0x36   :  { %4239 = vmatprep.subr.bf16.mxu1 %v4829_v2  ;;  %4186 = vmatpush3.bf16.msra.mxu0 %v4838_v9  ;;  %v4898_v59 = vld [vmem:[%s6472_s0 + $0x334] ss:$100 sps:$4 sm:$0xff]   ;;  %v4916_v9 = vld [vmem:[%s6472_s0 + $0x400] ss:$100 sps:$4 sm:$0xff]  }
  0x37   :  { %4187 = vmatprep.subr.bf16.mxu0 %v4839_v10  ;;  %v4907_v2 = vld [vmem:[%s6471_s1 + $0x250] sm:$0xff]   ;;  %v4917_v10 = vld [vmem:[%s6471_s1 + $0x248] sm:$0xff]  }
  0x39   :  { %4240 = vmatpush3.bf16.msra.mxu1 %v4834_v5  ;;  %v4910_v5 = vld [vmem:[%s6471_s1 + $0x288] sm:$0xff]  }
  0x3a   :  { %4241 = vmatprep.subr.bf16.mxu1 %v4840_v11  ;;  %4188 = vmatpush3.bf16.msra.mxu0 %v4841_v12  ;;  %v4918_v11 = vld [vmem:[%s6471_s1 + $0x208] sm:$0xff]   ;;  %v4919_v12 = vld [vmem:[%s6471_s1 + $0x2c0] sm:$0xff]  }
  0x3b   :  { %2591 = vmatmul.mubr.bf16.gmra.mxu0 %v4823_v60  ;;  %4189 = vmatprep.subr.bf16.mxu0 %v4849_v18  ;;  %v4900_v60 = vld [vmem:[%s6472_s0 + $0x33c] ss:$100 sps:$4 sm:$0xff]   ;;  %v4926_v18 = vld [vmem:[%s6472_s0 + $0x28] ss:$100 sps:$4 sm:$0xff]  }
  0x3c   :  { %2672 = vmatmul.mubr.bf16.gmra.mxu1 %v4824_v61  ;;  %2598 = vmatprep.mubr.bf16.mxu0 %v4830_v3  ;;  %v4902_v61 = vld [vmem:[%s6471_s1 + $0x290] sm:$0xff]   ;;  %v4908_v3 = vld [vmem:[%s6471_s1 + $0x2c8] sm:$0xff]  }
  0x3d   :  { %2679 = vmatprep.mubr.bf16.mxu1 %v4832_v4  ;;  %4242 = vmatpush3.bf16.msra.mxu1 %v4842_v13  ;;  %v4909_v4 = vld [vmem:[%s6471_s1 + $0x210] sm:$0xff]   ;;  %v4920_v13 = vld [vmem:[%s6471_s1 + $0x280] sm:$0xff]  }
  0x3e   :  { %4190 = vmatpush3.bf16.msra.mxu0 %v4850_v19  ;;  %4243 = vmatprep.subr.bf16.mxu1 %v4851_v20  ;;  %v4928_v19 = vld [vmem:[%s6472_s0 + $0x2c] ss:$100 sps:$4 sm:$0xff]   ;;  %v4929_v20 = vld [vmem:[%s6471_s1 + $0x3f8] sm:$0xff]  }
  0x3f   :  { %4191 = vmatprep.subr.bf16.mxu0 %v4853_v22  ;;  %v4931_v22 = vld [vmem:[%s6471_s1 + $0x3f0] sm:$0xff]  }
  0x41   :  { %4244 = vmatpush3.bf16.msra.mxu1 %v4852_v21  ;;  %v4930_v21 = vld [vmem:[%s6471_s1 + $0x3b8] sm:$0xff]  }
  0x42   :  { %4192 = vmatpush3.bf16.msra.mxu0 %v4854_v23  ;;  %4333 = vmatprep.subr.bf16.mxu1 %v4861_v28  ;;  %v4932_v23 = vld [vmem:[%s6472_s0 + $0xec] ss:$100 sps:$4 sm:$0xff]   ;;  %v4939_v28 = vld [vmem:[%s6471_s1 + $0x378] sm:$0xff]  }
  0x43   :  { %2599 = vmatmul.mubr.bf16.gmra.mxu0 %v4835_v6  ;;  %4281 = vmatprep.subr.bf16.mxu0 %v4871_v36  ;;  %v4911_v6 = vld [vmem:[%s6472_s0 + $0x3fc] ss:$100 sps:$4 sm:$0xff]   ;;  %v4949_v36 = vld [vmem:[%s6472_s0 + $0x1b0] ss:$100 sps:$4 sm:$0xff]  }
  0x44   :  { %2680 = vmatmul.mubr.bf16.gmra.mxu1 %v4836_v7  ;;  %2606 = vmatprep.mubr.bf16.mxu0 %v4843_v14  ;;  %v4913_v7 = vld [vmem:[%s6472_s0 + $0x404] ss:$100 sps:$4 sm:$0xff]  }
  0x45   :  { %2687 = vmatprep.mubr.bf16.mxu1 %v4845_v15  ;;  %v4921_v14 = vld [vmem:[%s6471_s1 + $0x240] sm:$0xff]  }
  0x46   :  { %v4922_v15 = vld [vmem:[%s6471_s1 + $0x200] sm:$0xff]  }
  0x4b   :  { %2607 = vmatmul.mubr.bf16.gmra.mxu0 %v4847_v16  ;;  %v4923_v16 = vld [vmem:[%s6472_s0 + $0x20] ss:$100 sps:$4 sm:$0xff]  }
  0x4c   :  { %2688 = vmatmul.mubr.bf16.gmra.mxu1 %v4848_v17  ;;  %2728 = vmatprep.mubr.bf16.mxu0 %v4857_v25  ;;  %v4925_v17 = vld [vmem:[%s6472_s0 + $0x24] ss:$100 sps:$4 sm:$0xff]   ;;  %v4936_v25 = vld [vmem:[%s6471_s1 + $0x3b0] sm:$0xff]  }
  0x4d   :  { %2809 = vmatprep.mubr.bf16.mxu1 %v4860_v27  ;;  %v4938_v27 = vld [vmem:[%s6472_s0 + $0xf0] ss:$100 sps:$4 sm:$0xff]  }
  0x53   :  { %2729 = vmatmul.mubr.bf16.vlgmr.msra.gmra.mxu0 %v4855_v24  ;;  %v4934_v24 = vld [vmem:[%s6472_s0 + $0xf4] ss:$100 sps:$4 sm:$0xff]  }
  0x54   :  { %2810 = vmatmul.mubr.bf16.vlgmr.msra.gmra.mxu1 %v4858_v26  ;;  %2736 = vmatprep.mubr.bf16.mxu0 %v4864_v31  ;;  %v4937_v26 = vld [vmem:[%s6472_s0 + $0xe8] ss:$100 sps:$4 sm:$0xff]  }
  0x55   :  { %4334 = vmatpush3.bf16.msra.mxu1 %v4862_v29  ;;  %2817 = vmatprep.mubr.bf16.mxu1 %v4866_v32  ;;  %v4940_v29 = vld [vmem:[%s6471_s1 + $0x338] sm:$0xff]   ;;  %v4942_v31 = vld [vmem:[%s6471_s1 + $0x3a8] sm:$0xff]   ;;  %v4943_v32 = vld [vmem:[%s6471_s1 + $0x370] sm:$0xff]  }
  0x56   :  { %4335 = vmatprep.subr.bf16.mxu1 %v4863_v30  ;;  %4282 = vmatpush3.bf16.msra.mxu0 %v4872_v37  ;;  %v4941_v30 = vld [vmem:[%s6471_s1 + $0x3e8] sm:$0xff]   ;;  %v4950_v37 = vld [vmem:[%s6472_s0 + $0x1b8] ss:$100 sps:$4 sm:$0xff]  }
  0x57   :  { %4283 = vmatprep.subr.bf16.mxu0 %v4875_v40  ;;  %v4953_v40 = vld [vmem:[%s6471_s1 + $0x368] sm:$0xff]  }
  0x59   :  { %4336 = vmatpush3.bf16.msra.mxu1 %v4868_v33  ;;  %v4944_v33 = vld [vmem:[%s6472_s0 + $0x1b4] ss:$100 sps:$4 sm:$0xff]  }
  0x5a   :  { %4337 = vmatprep.subr.bf16.mxu1 %v4873_v38  ;;  %4284 = vmatpush3.bf16.msra.mxu0 %v4880_v43  ;;  %v4951_v38 = vld [vmem:[%s6471_s1 + $0x3e0] sm:$0xff]  }
  0x5b   :  { %2737 = vmatmul.mubr.bf16.gmra.mxu0 %v4869_v34  ;;  %4285 = vmatprep.subr.bf16.mxu0 %v4885_v48  ;;  %v4946_v34 = vld [vmem:[%s6472_s0 + $0x1bc] ss:$100 sps:$4 sm:$0xff]   ;;  %v4957_v43 = vld [vmem:[%s6472_s0 + $0x284] ss:$100 sps:$4 sm:$0xff]  }
  0x5c   :  { %2818 = vmatmul.mubr.bf16.gmra.mxu1 %v4870_v35  ;;  %2744 = vmatprep.mubr.bf16.mxu0 %v4876_v41  ;;  %v4948_v35 = vld [vmem:[%s6471_s1 + $0x330] sm:$0xff]   ;;  %v4954_v41 = vld [vmem:[%s6471_s1 + $0x328] sm:$0xff]   ;;  %v4963_v48 = vld [vmem:[%s6471_s1 + $0x360] sm:$0xff]  }
  0x5d   :  { %4338 = vmatpush3.bf16.msra.mxu1 %v4874_v39  ;;  %2825 = vmatprep.mubr.bf16.mxu1 %v4878_v42  ;;  %v4952_v39 = vld [vmem:[%s6471_s1 + $0x3a0] sm:$0xff]  }
  0x5e   :  { %4339 = vmatprep.subr.bf16.mxu1 %v4883_v46  ;;  %4286 = vmatpush3.bf16.msra.mxu0 %v4886_v49  ;;  %v4955_v42 = vld [vmem:[%s6472_s0 + $0x27c] ss:$100 sps:$4 sm:$0xff]  }
  0x5f   :  { %4287 = vmatprep.subr.bf16.mxu0 %v4895_v56  ;;  %v4961_v46 = vld [vmem:[%s6471_s1 + $0x3d8] sm:$0xff]   ;;  %v4964_v49 = vld [vmem:[%s6471_s1 + $0x320] sm:$0xff]  }
  0x60   :  { %v4973_v56 = vld [vmem:[%s6471_s1 + $0x358] sm:$0xff]  }
  0x61   :  { %4340 = vmatpush3.bf16.msra.mxu1 %v4884_v47  ;;  %v4962_v47 = vld [vmem:[%s6471_s1 + $0x398] sm:$0xff]  }
  0x62   :  { %4341 = vmatprep.subr.bf16.mxu1 %v4893_v54  ;;  %4288 = vmatpush3.bf16.msra.mxu0 %v4896_v57  ;;  %v4971_v54 = vld [vmem:[%s6472_s0 + $0x340] ss:$100 sps:$4 sm:$0xff]   ;;  %v4974_v57 = vld [vmem:[%s6471_s1 + $0x318] sm:$0xff]  }
  0x63   :  { %2745 = vmatmul.mubr.bf16.gmra.mxu0 %v4881_v44  ;;  %4289 = vmatprep.subr.bf16.mxu0 %v4905_v0  ;;  %v4959_v44 = vld [vmem:[%s6472_s0 + $0x278] ss:$100 sps:$4 sm:$0xff]   ;;  %v4983_v0 = vld [vmem:[%s6472_s0 + $0x408] ss:$100 sps:$4 sm:$0xff]  }
  0x64   :  { %2826 = vmatmul.mubr.bf16.gmra.mxu1 %v4882_v45  ;;  %2752 = vmatprep.mubr.bf16.mxu0 %v4887_v50  ;;  %v4960_v45 = vld [vmem:[%s6472_s0 + $0x280] ss:$100 sps:$4 sm:$0xff]   ;;  %v4965_v50 = vld [vmem:[%s6471_s1 + $0x3d0] sm:$0xff]  }
  0x65   :  { %2833 = vmatprep.mubr.bf16.mxu1 %v4889_v51  ;;  %4342 = vmatpush3.bf16.msra.mxu1 %v4894_v55  ;;  %v4966_v51 = vld [vmem:[%s6472_s0 + $0x344] ss:$100 sps:$4 sm:$0xff]  }
  0x66   :  { %4343 = vmatprep.subr.bf16.mxu1 %v4897_v58  ;;  %4290 = vmatpush3.bf16.msra.mxu0 %v4906_v1  ;;  %v4972_v55 = vld [vmem:[%s6472_s0 + $0x348] ss:$100 sps:$4 sm:$0xff]   ;;  %v4975_v58 = vld [vmem:[%s6471_s1 + $0x350] sm:$0xff]  }
  0x67   :  { %4291 = vmatprep.subr.bf16.mxu0 %v4907_v2  ;;  %v4984_v1 = vld [vmem:[%s6472_s0 + $0x410] ss:$100 sps:$4 sm:$0xff]   ;;  %v4985_v2 = vld [vmem:[%s6471_s1 + $0x348] sm:$0xff]  }
  0x69   :  { %4344 = vmatpush3.bf16.msra.mxu1 %v4902_v61  ;;  %v4978_v61 = vld [vmem:[%s6471_s1 + $0x388] sm:$0xff]  }
  0x6a   :  { %4345 = vmatprep.subr.bf16.mxu1 %v4908_v3  ;;  %4292 = vmatpush3.bf16.msra.mxu0 %v4909_v4  ;;  %v4986_v3 = vld [vmem:[%s6471_s1 + $0x308] sm:$0xff]   ;;  %v4987_v4 = vld [vmem:[%s6471_s1 + $0x3c0] sm:$0xff]  }
  0x6b   :  { %2753 = vmatmul.mubr.bf16.gmra.mxu0 %v4891_v52  ;;  %4293 = vmatprep.subr.bf16.mxu0 %v4917_v10  ;;  %v4968_v52 = vld [vmem:[%s6472_s0 + $0x34c] ss:$100 sps:$4 sm:$0xff]   ;;  %v4994_v10 = vld [vmem:[%s6472_s0 + $0x38] ss:$100 sps:$4 sm:$0xff]  }
  0x6c   :  { %2834 = vmatmul.mubr.bf16.gmra.mxu1 %v4892_v53  ;;  %2760 = vmatprep.mubr.bf16.mxu0 %v4898_v59  ;;  %v4970_v53 = vld [vmem:[%s6471_s1 + $0x390] sm:$0xff]   ;;  %v4976_v59 = vld [vmem:[%s6471_s1 + $0x3c8] sm:$0xff]  }
  0x6d   :  { %2841 = vmatprep.mubr.bf16.mxu1 %v4900_v60  ;;  %4346 = vmatpush3.bf16.msra.mxu1 %v4910_v5  ;;  %v4977_v60 = vld [vmem:[%s6471_s1 + $0x310] sm:$0xff]   ;;  %v4988_v5 = vld [vmem:[%s6471_s1 + $0x380] sm:$0xff]  }
  0x6e   :  { %4294 = vmatpush3.bf16.msra.mxu0 %v4918_v11  ;;  %4347 = vmatprep.subr.bf16.mxu1 %v4919_v12  ;;  %v4996_v11 = vld [vmem:[%s6472_s0 + $0x3c] ss:$100 sps:$4 sm:$0xff]  }
  0x6f   :  { %4295 = vmatprep.subr.bf16.mxu0 %v4921_v14  ;;  %v4997_v12 = vld [vmem:[%s6471_s1 + $0x4f8] sm:$0xff]   ;;  %v4999_v14 = vld [vmem:[%s6471_s1 + $0x4f0] sm:$0xff]  }
  0x71   :  { %4348 = vmatpush3.bf16.msra.mxu1 %v4920_v13  ;;  %v4998_v13 = vld [vmem:[%s6471_s1 + $0x4b8] sm:$0xff]  }
  0x72   :  { %4296 = vmatpush3.bf16.msra.mxu0 %v4922_v15  ;;  %4437 = vmatprep.subr.bf16.mxu1 %v4929_v20  ;;  %v5000_v15 = vld [vmem:[%s6472_s0 + $0xfc] ss:$100 sps:$4 sm:$0xff]  }
  0x73   :  { %2761 = vmatmul.mubr.bf16.gmra.mxu0 %v4903_v62  ;;  %4385 = vmatprep.subr.bf16.mxu0 %v4939_v28  ;;  %v4979_v62 = vld [vmem:[%s6472_s0 + $0x40c] ss:$100 sps:$4 sm:$0xff]   ;;  %v5007_v20 = vld [vmem:[%s6471_s1 + $0x478] sm:$0xff]   ;;  %v5017_v28 = vld [vmem:[%s6472_s0 + $0x1c0] ss:$100 sps:$4 sm:$0xff]  }
  0x74   :  { %2842 = vmatmul.mubr.bf16.gmra.mxu1 %v4904_v63  ;;  %2768 = vmatprep.mubr.bf16.mxu0 %v4911_v6  ;;  %v4981_v63 = vld [vmem:[%s6472_s0 + $0x414] ss:$100 sps:$4 sm:$0xff]   ;;  %v4989_v6 = vld [vmem:[%s6471_s1 + $0x340] sm:$0xff]  }
  0x75   :  { %2849 = vmatprep.mubr.bf16.mxu1 %v4913_v7  ;;  %v4990_v7 = vld [vmem:[%s6471_s1 + $0x300] sm:$0xff]  }
  0x7b   :  { %2769 = vmatmul.mubr.bf16.gmra.mxu0 %v4915_v8  ;;  %v4991_v8 = vld [vmem:[%s6472_s0 + $0x30] ss:$100 sps:$4 sm:$0xff]  }
  0x7c   :  { %2850 = vmatmul.mubr.bf16.gmra.mxu1 %v4916_v9  ;;  %2890 = vmatprep.mubr.bf16.mxu0 %v4925_v17  ;;  %v4993_v9 = vld [vmem:[%s6472_s0 + $0x34] ss:$100 sps:$4 sm:$0xff]  }
  0x7d   :  { %2971 = vmatprep.mubr.bf16.mxu1 %v4928_v19  ;;  %v5004_v17 = vld [vmem:[%s6471_s1 + $0x4b0] sm:$0xff]   ;;  %v5006_v19 = vld [vmem:[%s6472_s0 + $0x100] ss:$100 sps:$4 sm:$0xff]  }
  0x83   :  { %2891 = vmatmul.mubr.bf16.vlgmr.msra.gmra.mxu0 %v4923_v16  ;;  %v5002_v16 = vld [vmem:[%s6472_s0 + $0x104] ss:$100 sps:$4 sm:$0xff]  }
  0x84   :  { %2972 = vmatmul.mubr.bf16.vlgmr.msra.gmra.mxu1 %v4926_v18  ;;  %2898 = vmatprep.mubr.bf16.mxu0 %v4932_v23  ;;  %v5005_v18 = vld [vmem:[%s6472_s0 + $0xf8] ss:$100 sps:$4 sm:$0xff]   ;;  %v5010_v23 = vld [vmem:[%s6471_s1 + $0x4a8] sm:$0xff]  }
  0x85   :  { %4438 = vmatpush3.bf16.msra.mxu1 %v4930_v21  ;;  %2979 = vmatprep.mubr.bf16.mxu1 %v4934_v24  ;;  %v5008_v21 = vld [vmem:[%s6471_s1 + $0x438] sm:$0xff]   ;;  %v5011_v24 = vld [vmem:[%s6471_s1 + $0x470] sm:$0xff]  }
  0x86   :  { %4439 = vmatprep.subr.bf16.mxu1 %v4931_v22  ;;  %4386 = vmatpush3.bf16.msra.mxu0 %v4940_v29  ;;  %v5009_v22 = vld [vmem:[%s6471_s1 + $0x4e8] sm:$0xff]  }
  0x87   :  { %4387 = vmatprep.subr.bf16.mxu0 %v4943_v32  ;;  %v5018_v29 = vld [vmem:[%s6472_s0 + $0x1c8] ss:$100 sps:$4 sm:$0xff]  }
  0x88   :  { %v5021_v32 = vld [vmem:[%s6471_s1 + $0x468] sm:$0xff]  }
  0x89   :  { %4440 = vmatpush3.bf16.msra.mxu1 %v4936_v25  ;;  %v5012_v25 = vld [vmem:[%s6472_s0 + $0x1c4] ss:$100 sps:$4 sm:$0xff]  }
  0x8a   :  { %4441 = vmatprep.subr.bf16.mxu1 %v4941_v30  ;;  %4388 = vmatpush3.bf16.msra.mxu0 %v4948_v35  ;;  %v5019_v30 = vld [vmem:[%s6471_s1 + $0x4e0] sm:$0xff]   ;;  %v5025_v35 = vld [vmem:[%s6472_s0 + $0x294] ss:$100 sps:$4 sm:$0xff]  }
  0x8b   :  { %2899 = vmatmul.mubr.bf16.gmra.mxu0 %v4937_v26  ;;  %4389 = vmatprep.subr.bf16.mxu0 %v4953_v40  ;;  %v5014_v26 = vld [vmem:[%s6472_s0 + $0x1cc] ss:$100 sps:$4 sm:$0xff]   ;;  %v5031_v40 = vld [vmem:[%s6471_s1 + $0x460] sm:$0xff]  }
  0x8c   :  { %2980 = vmatmul.mubr.bf16.gmra.mxu1 %v4938_v27  ;;  %2906 = vmatprep.mubr.bf16.mxu0 %v4944_v33  ;;  %v5016_v27 = vld [vmem:[%s6471_s1 + $0x430] sm:$0xff]   ;;  %v5022_v33 = vld [vmem:[%s6471_s1 + $0x428] sm:$0xff]  }
  0x8d   :  { %4442 = vmatpush3.bf16.msra.mxu1 %v4942_v31  ;;  %2987 = vmatprep.mubr.bf16.mxu1 %v4946_v34  ;;  %v5020_v31 = vld [vmem:[%s6471_s1 + $0x4a0] sm:$0xff]   ;;  %v5023_v34 = vld [vmem:[%s6472_s0 + $0x28c] ss:$100 sps:$4 sm:$0xff]  }
  0x8e   :  { %4443 = vmatprep.subr.bf16.mxu1 %v4951_v38  ;;  %4390 = vmatpush3.bf16.msra.mxu0 %v4954_v41  ;;  %v5029_v38 = vld [vmem:[%s6471_s1 + $0x4d8] sm:$0xff]   ;;  %v5032_v41 = vld [vmem:[%s6471_s1 + $0x420] sm:$0xff]  }
  0x8f   :  { %4391 = vmatprep.subr.bf16.mxu0 %v4963_v48  ;;  %v5041_v48 = vld [vmem:[%s6471_s1 + $0x458] sm:$0xff]  }
  0x91   :  { %4444 = vmatpush3.bf16.msra.mxu1 %v4952_v39  ;;  %v5030_v39 = vld [vmem:[%s6471_s1 + $0x498] sm:$0xff]  }
  0x92   :  { %4445 = vmatprep.subr.bf16.mxu1 %v4961_v46  ;;  %4392 = vmatpush3.bf16.msra.mxu0 %v4964_v49  ;;  %v5039_v46 = vld [vmem:[%s6472_s0 + $0x350] ss:$100 sps:$4 sm:$0xff]   ;;  %v5042_v49 = vld [vmem:[%s6471_s1 + $0x418] sm:$0xff]  }
  0x93   :  { %2907 = vmatmul.mubr.bf16.gmra.mxu0 %v4949_v36  ;;  %4393 = vmatprep.subr.bf16.mxu0 %v4973_v56  ;;  %v5027_v36 = vld [vmem:[%s6472_s0 + $0x288] ss:$100 sps:$4 sm:$0xff]   ;;  %v5051_v56 = vld [vmem:[%s6472_s0 + $0x418] ss:$100 sps:$4 sm:$0xff]  }
  0x94   :  { %2988 = vmatmul.mubr.bf16.gmra.mxu1 %v4950_v37  ;;  %2914 = vmatprep.mubr.bf16.mxu0 %v4955_v42  ;;  %v5028_v37 = vld [vmem:[%s6472_s0 + $0x290] ss:$100 sps:$4 sm:$0xff]  }
  0x95   :  { %2995 = vmatprep.mubr.bf16.mxu1 %v4957_v43  ;;  %4446 = vmatpush3.bf16.msra.mxu1 %v4962_v47  ;;  %v5033_v42 = vld [vmem:[%s6471_s1 + $0x4d0] sm:$0xff]   ;;  %v5040_v47 = vld [vmem:[%s6472_s0 + $0x358] ss:$100 sps:$4 sm:$0xff]  }
  0x96   :  { %4447 = vmatprep.subr.bf16.mxu1 %v4965_v50  ;;  %4394 = vmatpush3.bf16.msra.mxu0 %v4974_v57  ;;  %v5034_v43 = vld [vmem:[%s6472_s0 + $0x354] ss:$100 sps:$4 sm:$0xff]   ;;  %v5052_v57 = vld [vmem:[%s6472_s0 + $0x420] ss:$100 sps:$4 sm:$0xff]  }
  0x97   :  { %4395 = vmatprep.subr.bf16.mxu0 %v4975_v58  ;;  %v5043_v50 = vld [vmem:[%s6471_s1 + $0x450] sm:$0xff]   ;;  %v5053_v58 = vld [vmem:[%s6471_s1 + $0x448] sm:$0xff]  }
  0x99   :  { %4448 = vmatpush3.bf16.msra.mxu1 %v4970_v53  ;;  %v5046_v53 = vld [vmem:[%s6471_s1 + $0x488] sm:$0xff]  }
  0x9a   :  { %4449 = vmatprep.subr.bf16.mxu1 %v4976_v59  ;;  %4396 = vmatpush3.bf16.msra.mxu0 %v4977_v60  ;;  %v5054_v59 = vld [vmem:[%s6471_s1 + $0x408] sm:$0xff]   ;;  %v5055_v60 = vld [vmem:[%s6471_s1 + $0x4c0] sm:$0xff]  }
  0x9b   :  { %2915 = vmatmul.mubr.bf16.gmra.mxu0 %v4959_v44  ;;  %4397 = vmatprep.subr.bf16.mxu0 %v4985_v2  ;;  %v5036_v44 = vld [vmem:[%s6472_s0 + $0x35c] ss:$100 sps:$4 sm:$0xff]   ;;  %v5062_v2 = vld [vmem:[%s6472_s0 + $0x48] ss:$100 sps:$4 sm:$0xff]  }
  0x9c   :  { %2996 = vmatmul.mubr.bf16.gmra.mxu1 %v4960_v45  ;;  %2922 = vmatprep.mubr.bf16.mxu0 %v4966_v51  ;;  %v5038_v45 = vld [vmem:[%s6471_s1 + $0x490] sm:$0xff]   ;;  %v5044_v51 = vld [vmem:[%s6471_s1 + $0x4c8] sm:$0xff]  }
  0x9d   :  { %3003 = vmatprep.mubr.bf16.mxu1 %v4968_v52  ;;  %4450 = vmatpush3.bf16.msra.mxu1 %v4978_v61  ;;  %v5045_v52 = vld [vmem:[%s6471_s1 + $0x410] sm:$0xff]   ;;  %v5056_v61 = vld [vmem:[%s6471_s1 + $0x480] sm:$0xff]  }
  0x9e   :  { %4398 = vmatpush3.bf16.msra.mxu0 %v4986_v3  ;;  %4451 = vmatprep.subr.bf16.mxu1 %v4987_v4  ;;  %v5064_v3 = vld [vmem:[%s6472_s0 + $0x4c] ss:$100 sps:$4 sm:$0xff]   ;;  %v5065_v4 = vld [vmem:[%s6471_s1 + $0x5f8] sm:$0xff]  }
  0x9f   :  { %4399 = vmatprep.subr.bf16.mxu0 %v4989_v6  ;;  %v5066_v6 = vld [vmem:[%s6471_s1 + $0x5b8] sm:$0xff]  }
  0xa1   :  { %4452 = vmatpush3.bf16.msra.mxu1 %v4988_v5 }
  0xa2   :  { %4400 = vmatpush3.bf16.msra.mxu0 %v4990_v7  ;;  %4541 = vmatprep.subr.bf16.mxu1 %v4997_v12  ;;  %v5986_v7 = vld [vmem:[%s6473_s2] ss:$0 sm:$0xff] }
  0xa3   :  { %2923 = vmatmul.mubr.bf16.gmra.mxu0 %v4971_v54  ;;  %4489 = vmatprep.subr.bf16.mxu0 %v5007_v20  ;;  %v5047_v54 = vld [vmem:[%s6472_s0 + $0x41c] ss:$100 sps:$4 sm:$0xff]   ;;  %v5073_v20 = vld [vmem:[%s6472_s0 + $0x108] ss:$100 sps:$4 sm:$0xff]  }
  0xa4   :  { %3004 = vmatmul.mubr.bf16.gmra.mxu1 %v4972_v55  ;;  %2930 = vmatprep.mubr.bf16.mxu0 %v4979_v62  ;;  %v5049_v55 = vld [vmem:[%s6472_s0 + $0x424] ss:$100 sps:$4 sm:$0xff]  }
  0xa5   :  { %3011 = vmatprep.mubr.bf16.mxu1 %v4981_v63  ;;  %v5057_v62 = vld [vmem:[%s6471_s1 + $0x440] sm:$0xff]  }
  0xa6   :  { %v5058_v63 = vld [vmem:[%s6471_s1 + $0x400] sm:$0xff]  }
  0xab   :  { %2931 = vmatmul.mubr.bf16.gmra.mxu0 %v4983_v0  ;;  %v5059_v0 = vld [vmem:[%s6472_s0 + $0x40] ss:$100 sps:$4 sm:$0xff]  }
  0xac   :  { %3012 = vmatmul.mubr.bf16.gmra.mxu1 %v4984_v1  ;;  %3052 = vmatprep.mubr.bf16.mxu0 %v4993_v9  ;;  %v5061_v1 = vld [vmem:[%s6472_s0 + $0x44] ss:$100 sps:$4 sm:$0xff]   ;;  %v5067_v9 = vld [vmem:[%s6471_s1 + $0x5f0] sm:$0xff]  }
  0xad   :  { %3133 = vmatprep.mubr.bf16.mxu1 %v4996_v11  ;;  %v5068_v11 = vld [vmem:[%s6472_s0 + $0x10c] ss:$100 sps:$4 sm:$0xff]  }
  0xb3   :  { %3053 = vmatmul.mubr.bf16.vlgmr.msra.gmra.mxu0 %v4991_v8 }
  0xb4   :  { %3134 = vmatmul.mubr.bf16.vlgmr.msra.gmra.mxu1 %v4994_v10  ;;  %3060 = vmatprep.mubr.bf16.mxu0 %v5000_v15 }
  0xb5   :  { %4542 = vmatpush3.bf16.msra.mxu1 %v4998_v13  ;;  %3141 = vmatprep.mubr.bf16.mxu1 %v5002_v16 }
  0xb6   :  { %4543 = vmatprep.subr.bf16.mxu1 %v4999_v14  ;;  %4490 = vmatpush3.bf16.msra.mxu0 %v5008_v21  ;;  %v5070_v14 = vld [vmem:[%s6472_s0 + $0x114] ss:$100 sps:$4 sm:$0xff]  }
  0xb7   :  { %4491 = vmatprep.subr.bf16.mxu0 %v5011_v24  ;;  %v5074_v21 = vld [vmem:[%s6472_s0 + $0x110] ss:$100 sps:$4 sm:$0xff]  }
  0xb9   :  { %4544 = vmatpush3.bf16.msra.mxu1 %v5004_v17  ;;  %v5072_v17 = vld [vmem:[%s6471_s1 + $0x5b0] sm:$0xff]  }
  0xba   :  { %4545 = vmatprep.subr.bf16.mxu1 %v5009_v22  ;;  %4492 = vmatpush3.bf16.msra.mxu0 %v5016_v27  ;;  %v5076_v27 = vld [vmem:[%s6471_s1 + $0x538] sm:$0xff]  }
  0xbb   :  { %3061 = vmatmul.mubr.bf16.gmra.mxu0 %v5005_v18  ;;  %4493 = vmatprep.subr.bf16.mxu0 %v5021_v32 }
  0xbc   :  { %3142 = vmatmul.mubr.bf16.gmra.mxu1 %v5006_v19  ;;  %3068 = vmatprep.mubr.bf16.mxu0 %v5012_v25 }
  0xbd   :  { %4546 = vmatpush3.bf16.msra.mxu1 %v5010_v23  ;;  %3149 = vmatprep.mubr.bf16.mxu1 %v5014_v26  ;;  %v5075_v23 = vld [vmem:[%s6471_s1 + $0x578] sm:$0xff]  }
  0xbe   :  { %4547 = vmatprep.subr.bf16.mxu1 %v5019_v30  ;;  %4494 = vmatpush3.bf16.msra.mxu0 %v5022_v33  ;;  %v5077_v30 = vld [vmem:[%s6471_s1 + $0x5e8] sm:$0xff]  }
  0xbf   :  { %4495 = vmatprep.subr.bf16.mxu0 %v5031_v40  ;;  %v5078_v33 = vld [vmem:[%s6471_s1 + $0x5a8] sm:$0xff]  }
  0xc1   :  { %4548 = vmatpush3.bf16.msra.mxu1 %v5020_v31 }
  0xc2   :  { %4549 = vmatprep.subr.bf16.mxu1 %v5029_v38  ;;  %4496 = vmatpush3.bf16.msra.mxu0 %v5032_v41 }
  0xc3   :  { %3069 = vmatmul.mubr.bf16.gmra.mxu0 %v5017_v28  ;;  %4497 = vmatprep.subr.bf16.mxu0 %v5041_v48  ;;  %v5086_v48 = vld [vmem:[%s6472_s0 + $0x1d8] ss:$100 sps:$4 sm:$0xff]  }
  0xc4   :  { %3150 = vmatmul.mubr.bf16.gmra.mxu1 %v5018_v29  ;;  %3076 = vmatprep.mubr.bf16.mxu0 %v5023_v34 }
  0xc5   :  { %3157 = vmatprep.mubr.bf16.mxu1 %v5025_v35  ;;  %4550 = vmatpush3.bf16.msra.mxu1 %v5030_v39  ;;  %v5079_v35 = vld [vmem:[%s6471_s1 + $0x570] sm:$0xff]  }
  0xc6   :  { %4551 = vmatprep.subr.bf16.mxu1 %v5033_v42  ;;  %4498 = vmatpush3.bf16.msra.mxu0 %v5042_v49  ;;  %v5080_v39 = vld [vmem:[%s6472_s0 + $0x1d4] ss:$100 sps:$4 sm:$0xff]   ;;  %v5082_v42 = vld [vmem:[%s6472_s0 + $0x1dc] ss:$100 sps:$4 sm:$0xff]  }
  0xc7   :  { %4499 = vmatprep.subr.bf16.mxu0 %v5043_v50 }
  0xc9   :  { %4552 = vmatpush3.bf16.msra.mxu1 %v5038_v45  ;;  %v5084_v45 = vld [vmem:[%s6471_s1 + $0x530] sm:$0xff]  }
  0xca   :  { %4553 = vmatprep.subr.bf16.mxu1 %v5044_v51  ;;  %4500 = vmatpush3.bf16.msra.mxu0 %v5045_v52  ;;  %v5087_v52 = vld [vmem:[%s6471_s1 + $0x5e0] sm:$0xff]  }
  0xcb   :  { %3077 = vmatmul.mubr.bf16.gmra.mxu0 %v5027_v36  ;;  %4501 = vmatprep.subr.bf16.mxu0 %v5053_v58  ;;  %v5089_v58 = vld [vmem:[%s6471_s1 + $0x568] sm:$0xff]  }
  0xcc   :  { %3158 = vmatmul.mubr.bf16.gmra.mxu1 %v5028_v37  ;;  %3084 = vmatprep.mubr.bf16.mxu0 %v5034_v43 }
  0xcd   :  { %3165 = vmatprep.mubr.bf16.mxu1 %v5036_v44  ;;  %4554 = vmatpush3.bf16.msra.mxu1 %v5046_v53 }
  0xce   :  { %4502 = vmatpush3.bf16.msra.mxu0 %v5054_v59  ;;  %4555 = vmatprep.subr.bf16.mxu1 %v5055_v60  ;;  %v5090_v60 = vld [vmem:[%s6471_s1 + $0x528] sm:$0xff]  }
  0xcf   :  { %4503 = vmatprep.subr.bf16.mxu0 %v5057_v62 }
  0xd1   :  { %4556 = vmatpush3.bf16.msra.mxu1 %v5056_v61 }
  0xd2   :  { %4504 = vmatpush3.bf16.msra.mxu0 %v5058_v63  ;;  %4645 = vmatprep.subr.bf16.mxu1 %v5065_v4  ;;  %v5095_v4 = vld [vmem:[%s6472_s0 + $0x298] ss:$100 sps:$4 sm:$0xff]  }
  0xd3   :  { %3085 = vmatmul.mubr.bf16.gmra.mxu0 %v5039_v46  ;;  %4593 = vmatprep.subr.bf16.mxu0 %v5075_v23  ;;  %v5085_v46 = vld [vmem:[%s6472_s0 + $0x1d0] ss:$100 sps:$4 sm:$0xff]   ;;  %v5102_v23 = vld [vmem:[%s6472_s0 + $0x360] ss:$100 sps:$4 sm:$0xff]  }
  0xd4   :  { %3166 = vmatmul.mubr.bf16.gmra.mxu1 %v5040_v47  ;;  %3092 = vmatprep.mubr.bf16.mxu0 %v5047_v54 }
  0xd5   :  { %3173 = vmatprep.mubr.bf16.mxu1 %v5049_v55  ;;  %v5088_v55 = vld [vmem:[%s6471_s1 + $0x5a0] sm:$0xff]  }
  0xdb   :  { %3093 = vmatmul.mubr.bf16.gmra.mxu0 %v5051_v56 }
  0xdc   :  { %3174 = vmatmul.mubr.bf16.gmra.mxu1 %v5052_v57  ;;  %3214 = vmatprep.mubr.bf16.mxu0 %v5061_v1 }
  0xdd   :  { %3295 = vmatprep.mubr.bf16.mxu1 %v5064_v3  ;;  %v5093_v3 = vld [vmem:[%s6472_s0 + $0x2a4] ss:$100 sps:$4 sm:$0xff]  }
  0xe3   :  { %v4089_v5 = vpop.f32.mrf.mxu0  ;;  %3215 = vmatmul.mubr.bf16.vlgmr.msra.gmra.mxu0 %v5059_v0  ;;  %v5091_v0 = vld [vmem:[%s6472_s0 + $0x29c] ss:$100 sps:$4 sm:$0xff]  }
  0xe4   :  { %v4141_v8 = vpop.f32.mrf.mxu1  ;;  %3296 = vmatmul.mubr.bf16.vlgmr.msra.gmra.mxu1 %v5062_v2  ;;  %3222 = vmatprep.mubr.bf16.mxu0 %v5068_v11  ;;  %v5098_v11 = vld [vmem:[%s6471_s1 + $0x598] sm:$0xff]  }
  0xe5   :  { %4646 = vmatpush3.bf16.msra.mxu1 %v5066_v6  ;;  %v4090_v10 = vpop.f32.mrf.mxu0  ;;  %3303 = vmatprep.mubr.bf16.mxu1 %v5070_v14 }
  0xe6   :  { %v4091_v12 = vadd.f32 %v4090_v10, %v4089_v5  ;;  %v4142_v13 = vpop.f32.mrf.mxu1  ;;  %4647 = vmatprep.subr.bf16.mxu1 %v5067_v9  ;;  %4594 = vmatpush3.bf16.msra.mxu0 %v5076_v27  ;;  %v5096_v5 = vld [vmem:[%s6472_s0 + $0x2a0] ss:$100 sps:$4 sm:$0xff]   ;;  %v5097_v9 = vld [vmem:[%s6471_s1 + $0x5d8] sm:$0xff]  }
  0xe7   :  { %v4143_v15 = vadd.f32 %v4142_v13, %v4141_v8  ;;  %v4092_v16 = vpop.f32.mrf.mxu0  ;;  %4595 = vmatprep.subr.bf16.mxu0 %v5079_v35  ;;  %v5108_v35 = vld [vmem:[%s6471_s1 + $0x590] sm:$0xff]  }
  0xe8   :  { %v2569_v18 = vadd.f32 %v4091_v12, %v5986_v7  ;;  %v4144_v19 = vpop.f32.mrf.mxu1 }
  0xe9   :  { %v4093_v22 = vpop.f32.mrf.mxu0  ;;  %4648 = vmatpush3.bf16.msra.mxu1 %v5072_v17 }
  0xea   :  { %v6010_v24 = vadd.f32 %v4143_v15, %v2569_v18  ;;  %v4094_v25 = vadd.f32 %v4093_v22, %v4092_v16  ;;  %v4145_v26 = vpop.f32.mrf.mxu1  ;;  %4649 = vmatprep.subr.bf16.mxu1 %v5077_v30  ;;  %4596 = vmatpush3.bf16.msra.mxu0 %v5084_v45  ;;  %v5099_v15 = vld [vmem:[%s6471_s1 + $0x560] sm:$0xff]   ;;  %v5111_v45 = vld [vmem:[%s6471_s1 + $0x550] sm:$0xff]  }
  0xeb   :  { %v4146_v28 = vadd.f32 %v4145_v26, %v4144_v19  ;;  %v4095_v29 = vpop.f32.mrf.mxu0  ;;  %3223 = vmatmul.mubr.bf16.gmra.mxu0 %v5073_v20  ;;  %4597 = vmatprep.subr.bf16.mxu0 %v5089_v58  ;;  %v5100_v18 = vld [vmem:[%s6471_s1 + $0x520] sm:$0xff]   ;;  %v5115_v58 = vld [vmem:[%s6472_s0 + $0x428] ss:$100 sps:$4 sm:$0xff]  }
  0xec   :  { %v2572_v31 = vadd.f32 %v4094_v25, %v5986_v7  ;;  %v4147_v32 = vpop.f32.mrf.mxu1  ;;  %3304 = vmatmul.mubr.bf16.gmra.mxu1 %v5074_v21  ;;  %3230 = vmatprep.mubr.bf16.mxu0 %v5080_v39  ;;  %v5101_v21 = vld [vmem:[%s6471_s1 + $0x5d0] sm:$0xff]  }
  0xed   :  { %v4096_v34 = vpop.f32.mrf.mxu0  ;;  %4650 = vmatpush3.bf16.msra.mxu1 %v5078_v33  ;;  %3311 = vmatprep.mubr.bf16.mxu1 %v5082_v42  ;;  %v5110_v42 = vld [vmem:[%s6471_s1 + $0x518] sm:$0xff]  }
  0xee   :  { %v6025_v36 = vadd.f32 %v4146_v28, %v2572_v31  ;;  %v4097_v37 = vadd.f32 %v4096_v34, %v4095_v29  ;;  %v4148_v38 = vpop.f32.mrf.mxu1  ;;  %4651 = vmatprep.subr.bf16.mxu1 %v5087_v52  ;;  %4598 = vmatpush3.bf16.msra.mxu0 %v5090_v60  ;;  %v5104_v28 = vld [vmem:[%s6472_s0 + $0x364] ss:$100 sps:$4 sm:$0xff]  }
  0xef   :  { %v4149_v40 = vadd.f32 %v4148_v38, %v4147_v32  ;;  %v4098_v41 = vpop.f32.mrf.mxu0  ;;  %4599 = vmatprep.subr.bf16.mxu0 %v5099_v15  ;;  %v5105_v31 = vld [vmem:[%s6472_s0 + $0x368] ss:$100 sps:$4 sm:$0xff]   ;;  %v5109_v38 = vld [vmem:[%s6471_s1 + $0x558] sm:$0xff]   ;;  %v5124_v15 = vld [vmem:[%s6471_s1 + $0x580] sm:$0xff]  }
  0xf0   :  { %v2577_v43 = vadd.f32 %v4097_v37, %v5986_v7  ;;  %v4150_v44 = vpop.f32.mrf.mxu1  ;;  %v5107_v32 = vld [vmem:[%s6472_s0 + $0x36c] ss:$100 sps:$4 sm:$0xff]  }
  0xf1   :  { %v4099_v47 = vpop.f32.mrf.mxu0  ;;  %4652 = vmatpush3.bf16.msra.mxu1 %v5088_v55  ;;  %v5114_v55 = vld [vmem:[%s6471_s1 + $0x588] sm:$0xff]  }
  0xf2   :  { %v6043_v49 = vadd.f32 %v4149_v40, %v2577_v43  ;;  %v4100_v50 = vadd.f32 %v4099_v47, %v4098_v41  ;;  %v4151_v51 = vpop.f32.mrf.mxu1  ;;  %4653 = vmatprep.subr.bf16.mxu1 %v5097_v9  ;;  %4600 = vmatpush3.bf16.msra.mxu0 %v5100_v18  ;;  %v5122_v9 = vld [vmem:[%s6471_s1 + $0x508] sm:$0xff]  }
  0xf3   :  { %v4152_v53 = vadd.f32 %v4151_v51, %v4150_v44  ;;  %v4101_v54 = vpop.f32.mrf.mxu0  ;;  %3231 = vmatmul.mubr.bf16.gmra.mxu0 %v5085_v46  ;;  %4601 = vmatprep.subr.bf16.mxu0 %v5109_v38  ;;  %v5113_v51 = vld [vmem:[%s6471_s1 + $0x510] sm:$0xff]  }
  0xf4   :  { %v2580_v56 = vadd.f32 %v4100_v50, %v5986_v7  ;;  %v4153_v57 = vpop.f32.mrf.mxu1  ;;  %3312 = vmatmul.mubr.bf16.gmra.mxu1 %v5086_v48  ;;  %3238 = vmatprep.mubr.bf16.mxu0 %v5091_v0  ;;  %v5112_v48 = vld [vmem:[%s6471_s1 + $0x5c8] sm:$0xff]  }
  0xf5   :  { %v4102_v59 = vpop.f32.mrf.mxu0  ;;  %3319 = vmatprep.mubr.bf16.mxu1 %v5093_v3  ;;  %4654 = vmatpush3.bf16.msra.mxu1 %v5098_v11 }
  0xf6   :  { %v6058_v61 = vadd.f32 %v4152_v53, %v2580_v56  ;;  %v4103_v62 = vadd.f32 %v4102_v59, %v4101_v54  ;;  %v4154_v63 = vpop.f32.mrf.mxu1  ;;  %4655 = vmatprep.subr.bf16.mxu1 %v5101_v21  ;;  %4602 = vmatpush3.bf16.msra.mxu0 %v5110_v42  ;;  %v5117_v59 = vld [vmem:[%s6472_s0 + $0x42c] ss:$100 sps:$4 sm:$0xff]  }
  0xf7   :  { %v4155_v1 = vadd.f32 %v4154_v63, %v4153_v57  ;;  %v4104_v2 = vpop.f32.mrf.mxu0  ;;  %4603 = vmatprep.subr.bf16.mxu0 %v5111_v45  ;;  %v5118_v63 = vld [vmem:[%s6472_s0 + $0x430] ss:$100 sps:$4 sm:$0xff]  }
  0xf8   :  { %v2585_v6 = vadd.f32 %v4103_v62, %v5986_v7  ;;  %v4156_v8 = vpop.f32.mrf.mxu1 }
  0xf9   :  { %v4105_v10 = vpop.f32.mrf.mxu0  ;;  %4656 = vmatpush3.bf16.msra.mxu1 %v5108_v35  ;;  %v5133_v35 = vld [vmem:[%s6471_s1 + $0x638] sm:$0xff]  }
  0xfa   :  { %v6079_v12 = vadd.f32 %v4155_v1, %v2585_v6  ;;  %v4106_v13 = vadd.f32 %v4105_v10, %v4104_v2  ;;  %v4157_v14 = vpop.f32.mrf.mxu1  ;;  %4657 = vmatprep.subr.bf16.mxu1 %v5112_v48  ;;  %4604 = vmatpush3.bf16.msra.mxu0 %v5113_v51  ;;  %v5120_v1 = vld [vmem:[%s6472_s0 + $0x434] ss:$100 sps:$4 sm:$0xff]   ;;  %v5140_v48 = vld [vmem:[%s6472_s0 + $0x124] ss:$100 sps:$4 sm:$0xff]  }
  0xfb   :  { %v4158_v16 = vadd.f32 %v4157_v14, %v4156_v8  ;;  %v4107_v17 = vpop.f32.mrf.mxu0  ;;  %3239 = vmatmul.mubr.bf16.gmra.mxu0 %v5095_v4  ;;  %v5141_v51 = vld [vmem:[%s6471_s1 + $0x628] sm:$0xff]  }
  0xfc   :  { %v2588_v19 = vadd.f32 %v4106_v13, %v5986_v7  ;;  %v4159_v20 = vpop.f32.mrf.mxu1  ;;  %3320 = vmatmul.mubr.bf16.gmra.mxu1 %v5096_v5  ;;  %3246 = vmatprep.mubr.bf16.mxu0 %v5104_v28  ;;  %v5121_v5 = vld [vmem:[%s6471_s1 + $0x548] sm:$0xff]   ;;  %v5123_v13 = vld [vmem:[%s6471_s1 + $0x5c0] sm:$0xff]   ;;  %v5129_v28 = vld [vmem:[%s6472_s0 + $0x54] ss:$100 sps:$4 sm:$0xff]  }
  0xfd   :  { %v4108_v22 = vpop.f32.mrf.mxu0  ;;  %3327 = vmatprep.mubr.bf16.mxu1 %v5107_v32  ;;  %4658 = vmatpush3.bf16.msra.mxu1 %v5114_v55  ;;  %v5135_v55 = vld [vmem:[%s6472_s0 + $0x118] ss:$100 sps:$4 sm:$0xff]  }
  0xfe   :  { %v6094_v25 = vadd.f32 %v4158_v16, %v2588_v19  ;;  %v4109_v26 = vadd.f32 %v4108_v22, %v4107_v17  ;;  %v4160_v27 = vpop.f32.mrf.mxu1  ;;  %4605 = vmatprep.subr.bf16.mxu0 %v5121_v5  ;;  %4659 = vmatprep.subr.bf16.mxu1 %v5123_v13  ;;  %v5125_v19 = vld [vmem:[%s6471_s1 + $0x540] sm:$0xff]  }
  0xff   :  { %v4161_v29 = vadd.f32 %v4160_v27, %v4159_v20  ;;  %v4110_v30 = vpop.f32.mrf.mxu0  ;;  %4606 = vmatpush3.bf16.msra.mxu0 %v5122_v9  ;;  %v5126_v22 = vld [vmem:[%s6471_s1 + $0x500] sm:$0xff]   ;;  %v5127_v27 = vld [vmem:[%s6472_s0 + $0x50] ss:$100 sps:$4 sm:$0xff]  }
 0x100   :  { %v2593_v33 = vadd.f32 %v4109_v26, %v5986_v7  ;;  %v4162_v34 = vpop.f32.mrf.mxu1  ;;  %4607 = vmatprep.subr.bf16.mxu0 %v5125_v19 }
 0x101   :  { %v4111_v37 = vpop.f32.mrf.mxu0  ;;  %4660 = vmatpush3.bf16.msra.mxu1 %v5124_v15 }
 0x102   :  { %v6112_v39 = vadd.f32 %v4161_v29, %v2593_v33  ;;  %v4112_v40 = vadd.f32 %v4111_v37, %v4110_v30  ;;  %v4163_v41 = vpop.f32.mrf.mxu1  ;;  %v5130_v30 = vld [vmem:[%s6472_s0 + $0x58] ss:$100 sps:$4 sm:$0xff]   ;;  %4739 = vmatprep.subr.bf16.mxu1 %v5133_v35 }
 0x103   :  { %v4164_v43 = vadd.f32 %v4163_v41, %v4162_v34  ;;  %v4113_v44 = vpop.f32.mrf.mxu0  ;;  %3247 = vmatmul.mubr.bf16.gmra.mxu0 %v5102_v23 }
 0x104   :  { %v2596_v46 = vadd.f32 %v4112_v40, %v5986_v7  ;;  %v4165_v47 = vpop.f32.mrf.mxu1  ;;  %3328 = vmatmul.mubr.bf16.gmra.mxu1 %v5105_v31  ;;  %3254 = vmatprep.mubr.bf16.mxu0 %v5117_v59  ;;  %v5132_v31 = vld [vmem:[%s6472_s0 + $0x5c] ss:$100 sps:$4 sm:$0xff]   ;;  %v5134_v40 = vld [vmem:[%s6471_s1 + $0x630] sm:$0xff]  }
 0x105   :  { %v4114_v50 = vpop.f32.mrf.mxu0  ;;  %3335 = vmatprep.mubr.bf16.mxu1 %v5120_v1  ;;  %4608 = vmatpush3.bf16.msra.mxu0 %v5126_v22  ;;  %v5148_v1 = vld [vmem:[%s6471_s1 + $0x620] sm:$0xff]  }
 0x106   :  { %v6127_v52 = vadd.f32 %v4164_v43, %v2596_v46  ;;  %v4115_v53 = vadd.f32 %v4114_v50, %v4113_v44  ;;  %v4166_v54 = vpop.f32.mrf.mxu1  ;;  %v5137_v44 = vld [vmem:[%s6472_s0 + $0x11c] ss:$100 sps:$4 sm:$0xff]   ;;  %4711 = vmatprep.subr.bf16.mxu0 %v5133_v35 }
 0x107   :  { %v4167_v56 = vadd.f32 %v4166_v54, %v4165_v47  ;;  %v4116_v57 = vpop.f32.mrf.mxu0 }
 0x108   :  { %v2601_v60 = vadd.f32 %v4115_v53, %v5986_v7  ;;  %v4168_v62 = vpop.f32.mrf.mxu1 }
 0x109   :  { %v4117_v0 = vpop.f32.mrf.mxu0 }
 0x10a   :  { %v6145_v2 = vadd.f32 %v4167_v56, %v2601_v60  ;;  %v4118_v3 = vadd.f32 %v4117_v0, %v4116_v57  ;;  %v4169_v4 = vpop.f32.mrf.mxu1  ;;  %v5138_v56 = vld [vmem:[%s6472_s0 + $0x120] ss:$100 sps:$4 sm:$0xff]  }
 0x10b   :  { %v4170_v6 = vadd.f32 %v4169_v4, %v4168_v62  ;;  %v4119_v8 = vpop.f32.mrf.mxu0  ;;  %3255 = vmatmul.mubr.bf16.gmra.mxu0 %v5115_v58  ;;  %v5144_v58 = vld [vmem:[%s6472_s0 + $0x1e4] ss:$100 sps:$4 sm:$0xff]   ;;  %v5147_v62 = vld [vmem:[%s6472_s0 + $0x1ec] ss:$100 sps:$4 sm:$0xff]  }
 0x10c   :  { %v2604_v10 = vadd.f32 %v4118_v3, %v5986_v7  ;;  %v4171_v11 = vpop.f32.mrf.mxu1  ;;  %3336 = vmatmul.mubr.bf16.gmra.mxu1 %v5118_v63  ;;  %3376 = vmatprep.mubr.bf16.mxu0 %v5129_v28 }
 0x10d   :  { %v4120_v14 = vpop.f32.mrf.mxu0  ;;  %3457 = vmatprep.mubr.bf16.mxu1 %v5132_v31 }
 0x10e   :  { %v6160_v16 = vadd.f32 %v4170_v6, %v2604_v10  ;;  %v4121_v17 = vadd.f32 %v4120_v14, %v4119_v8  ;;  %v4172_v18 = vpop.f32.mrf.mxu1  ;;  %v5142_v10 = vld [vmem:[%s6472_s0 + $0x1e0] ss:$100 sps:$4 sm:$0xff]   ;;  %v5155_v14 = vld [vmem:[%s6471_s1 + $0x618] sm:$0xff]  }
 0x10f   :  { %v4173_v20 = vadd.f32 %v4172_v18, %v4171_v11  ;;  %v4122_v21 = vpop.f32.mrf.mxu0  ;;  %v5145_v11 = vld [vmem:[%s6472_s0 + $0x1e8] ss:$100 sps:$4 sm:$0xff]  }
 0x110   :  { %v2609_v23 = vadd.f32 %v4121_v17, %v5986_v7  ;;  %v4174_v26 = vpop.f32.mrf.mxu1  ;;  %v5151_v18 = vld [vmem:[%s6472_s0 + $0x2ac] ss:$100 sps:$4 sm:$0xff]  }
 0x111   :  { %v4123_v29 = vpop.f32.mrf.mxu0 }
 0x112   :  { %v6181_v32 = vadd.f32 %v4173_v20, %v2609_v23  ;;  %v4124_v33 = vadd.f32 %v4123_v29, %v4122_v21  ;;  %v4175_v34 = vpop.f32.mrf.mxu1  ;;  %v5154_v20 = vld [vmem:[%s6472_s0 + $0x2b4] ss:$100 sps:$4 sm:$0xff]  }
 0x113   :  { %v4176_v37 = vadd.f32 %v4175_v34, %v4174_v26  ;;  %v4193_v38 = vpop.f32.mrf.mxu0  ;;  %3377 = vmatmul.mubr.bf16.vlgmr.msra.gmra.mxu0 %v5127_v27 }
 0x114   :  { %v2612_v41 = vadd.f32 %v4124_v33, %v5986_v7  ;;  %v4245_v42 = vpop.f32.mrf.mxu1  ;;  %3458 = vmatmul.mubr.bf16.vlgmr.msra.gmra.mxu1 %v5130_v30  ;;  %4712 = vmatpush3.bf16.msra.mxu0 %v5133_v35 }
 0x115   :  { %v4194_v43 = vpop.f32.mrf.mxu0  ;;  %4747 = vmatpush3.bf16.msra.mxu1 %v5133_v35  ;;  %3384 = vmatprep.mubr.bf16.mxu0 %v5137_v44  ;;  %v5149_v35 = vld [vmem:[%s6472_s0 + $0x2a8] ss:$100 sps:$4 sm:$0xff]  }
 0x116   :  { %v6193_v45 = vadd.f32 %v4176_v37, %v2612_v41  ;;  %v4195_v46 = vadd.f32 %v4194_v43, %v4193_v38  ;;  %v4246_v47 = vpop.f32.mrf.mxu1  ;;  %4740 = vmatprep.subr.bf16.mxu1 %v5134_v40  ;;  %3465 = vmatprep.mubr.bf16.mxu1 %v5140_v48  ;;  %v5152_v37 = vld [vmem:[%s6472_s0 + $0x2b0] ss:$100 sps:$4 sm:$0xff]  }
 0x117   :  { %v4247_v7 = vadd.f32 %v4246_v47, %v4245_v42  ;;  %v4196_v50 = vpop.f32.mrf.mxu0  ;;  %4713 = vmatprep.subr.bf16.mxu0 %v5134_v40  ;;  %v5159_v43 = vld [vmem:[%s6472_s0 + $0x374] ss:$100 sps:$4 sm:$0xff]  }
 0x118   :  { %v2731_v53 = vadd.f32 %v4195_v46, %v6010_v24  ;;  %v4248_v54 = vpop.f32.mrf.mxu1  ;;  %4714 = vmatpush3.bf16.msra.mxu0 %v5134_v40  ;;  %v5162_v46 = vld [vmem:[%s6472_s0 + $0x37c] ss:$100 sps:$4 sm:$0xff]  }
 0x119   :  { %v4197_v57 = vpop.f32.mrf.mxu0  ;;  %4748 = vmatpush3.bf16.msra.mxu1 %v5134_v40  ;;  %4715 = vmatprep.subr.bf16.mxu0 %v5141_v51  ;;  %v5163_v40 = vld [vmem:[%s6471_s1 + $0x608] sm:$0xff]  }
 0x11a   :  { %v6211_v59 = vadd.f32 %v4247_v7, %v2731_v53  ;;  %v4198_v60 = vadd.f32 %v4197_v57, %v4196_v50  ;;  %v4249_v24 = vpop.f32.mrf.mxu1  ;;  %4741 = vmatprep.subr.bf16.mxu1 %v5141_v51 }
 0x11b   :  { %v4250_v63 = vadd.f32 %v4249_v24, %v4248_v54  ;;  %v4199_v0 = vpop.f32.mrf.mxu0  ;;  %3385 = vmatmul.mubr.bf16.gmra.mxu0 %v5135_v55 }
 0x11c   :  { %v2734_v3 = vadd.f32 %v4198_v60, %v6025_v36  ;;  %v4251_v4 = vpop.f32.mrf.mxu1  ;;  %3466 = vmatmul.mubr.bf16.gmra.mxu1 %v5138_v56  ;;  %3392 = vmatprep.mubr.bf16.mxu0 %v5144_v58 }
 0x11d   :  { %v4200_v5 = vpop.f32.mrf.mxu0  ;;  %3473 = vmatprep.mubr.bf16.mxu1 %v5147_v62  ;;  %4749 = vmatpush3.bf16.msra.mxu1 %v5141_v51 }
 0x11e   :  { %v6220_v6 = vadd.f32 %v4250_v63, %v2734_v3  ;;  %v4201_v8 = vadd.f32 %v4200_v5, %v4199_v0  ;;  %v4252_v9 = vpop.f32.mrf.mxu1  ;;  %4716 = vmatpush3.bf16.msra.mxu0 %v5141_v51  ;;  %4742 = vmatprep.subr.bf16.mxu1 %v5148_v1  ;;  %v5160_v0 = vld [vmem:[%s6472_s0 + $0x378] ss:$100 sps:$4 sm:$0xff]  }
 0x11f   :  { %v4253_v36 = vadd.f32 %v4252_v9, %v4251_v4  ;;  %v4202_v13 = vpop.f32.mrf.mxu0  ;;  %4717 = vmatprep.subr.bf16.mxu0 %v5148_v1  ;;  %v5166_v3 = vld [vmem:[%s6472_s0 + $0x43c] ss:$100 sps:$4 sm:$0xff]   ;;  %v5169_v4 = vld [vmem:[%s6472_s0 + $0x444] ss:$100 sps:$4 sm:$0xff]  }
 0x120   :  { %v2739_v15 = vadd.f32 %v4201_v8, %v6043_v49  ;;  %v4254_v17 = vpop.f32.mrf.mxu1  ;;  %v5156_v49 = vld [vmem:[%s6471_s1 + $0x610] sm:$0xff]  }
 0x121   :  { %v4203_v19 = vpop.f32.mrf.mxu0  ;;  %4750 = vmatpush3.bf16.msra.mxu1 %v5148_v1 }
 0x122   :  { %v6238_v21 = vadd.f32 %v4253_v36, %v2739_v15  ;;  %v4204_v22 = vadd.f32 %v4203_v19, %v4202_v13  ;;  %v4255_v23 = vpop.f32.mrf.mxu1  ;;  %4718 = vmatpush3.bf16.msra.mxu0 %v5148_v1  ;;  %4743 = vmatprep.subr.bf16.mxu1 %v5155_v14 }
 0x123   :  { %v4256_v26 = vadd.f32 %v4255_v23, %v4254_v17  ;;  %v4205_v27 = vpop.f32.mrf.mxu0  ;;  %4719 = vmatprep.subr.bf16.mxu0 %v5155_v14  ;;  %3393 = vmatmul.mubr.bf16.gmra.mxu0 %v5142_v10  ;;  %v5164_v23 = vld [vmem:[%s6472_s0 + $0x438] ss:$100 sps:$4 sm:$0xff]  }
 0x124   :  { %v2742_v28 = vadd.f32 %v4204_v22, %v6058_v61  ;;  %v4257_v29 = vpop.f32.mrf.mxu1  ;;  %3474 = vmatmul.mubr.bf16.gmra.mxu1 %v5145_v11  ;;  %3400 = vmatprep.mubr.bf16.mxu0 %v5151_v18 }
 0x125   :  { %v4206_v30 = vpop.f32.mrf.mxu0  ;;  %3481 = vmatprep.mubr.bf16.mxu1 %v5154_v20  ;;  %4751 = vmatpush3.bf16.msra.mxu1 %v5155_v14 }
 0x126   :  { %v6244_v31 = vadd.f32 %v4256_v26, %v2742_v28  ;;  %v4207_v33 = vadd.f32 %v4206_v30, %v4205_v27  ;;  %v4258_v34 = vpop.f32.mrf.mxu1  ;;  %4720 = vmatpush3.bf16.msra.mxu0 %v5155_v14  ;;  %4744 = vmatprep.subr.bf16.mxu1 %v5156_v49  ;;  %v5171_v27 = vld [vmem:[%s6472_s0 + $0x60] ss:$100 sps:$4 sm:$0xff]  }
 0x127   :  { %v4259_v61 = vadd.f32 %v4258_v34, %v4257_v29  ;;  %v4208_v38 = vpop.f32.mrf.mxu0  ;;  %4721 = vmatprep.subr.bf16.mxu0 %v5156_v49 }
 0x128   :  { %v2747_v41 = vadd.f32 %v4207_v33, %v6079_v12  ;;  %v4260_v42 = vpop.f32.mrf.mxu1  ;;  %v5170_v12 = vld [vmem:[%s6471_s1 + $0x600] sm:$0xff]  }
 0x129   :  { %v4209_v44 = vpop.f32.mrf.mxu0  ;;  %4752 = vmatpush3.bf16.msra.mxu1 %v5156_v49 }
 0x12a   :  { %v6262_v47 = vadd.f32 %v4259_v61, %v2747_v41  ;;  %v4210_v48 = vadd.f32 %v4209_v44, %v4208_v38  ;;  %v4261_v7 = vpop.f32.mrf.mxu1  ;;  %4722 = vmatpush3.bf16.msra.mxu0 %v5156_v49  ;;  %4745 = vmatprep.subr.bf16.mxu1 %v5163_v40  ;;  %v5172_v49 = vld [vmem:[%s6472_s0 + $0x1f0] ss:$100 sps:$4 sm:$0xff]  }
 0x12b   :  { %v4262_v50 = vadd.f32 %v4261_v7, %v4260_v42  ;;  %v4211_v51 = vpop.f32.mrf.mxu0  ;;  %4723 = vmatprep.subr.bf16.mxu0 %v5163_v40  ;;  %3401 = vmatmul.mubr.bf16.gmra.mxu0 %v5149_v35  ;;  %v5175_v7 = vld [vmem:[%s6472_s0 + $0x380] ss:$100 sps:$4 sm:$0xff]  }
 0x12c   :  { %v2750_v53 = vadd.f32 %v4210_v48, %v6094_v25  ;;  %v4263_v54 = vpop.f32.mrf.mxu1  ;;  %3482 = vmatmul.mubr.bf16.gmra.mxu1 %v5152_v37  ;;  %3408 = vmatprep.mubr.bf16.mxu0 %v5159_v43  ;;  %v5157_v25 = vld [vmem:[%s6472_s0 + $0x370] ss:$100 sps:$4 sm:$0xff]  }
 0x12d   :  { %v4212_v55 = vpop.f32.mrf.mxu0  ;;  %3489 = vmatprep.mubr.bf16.mxu1 %v5162_v46  ;;  %4753 = vmatpush3.bf16.msra.mxu1 %v5163_v40  ;;  %v5173_v46 = vld [vmem:[%s6472_s0 + $0x128] ss:$100 sps:$4 sm:$0xff]  }
 0x12e   :  { %v6268_v56 = vadd.f32 %v4262_v50, %v2750_v53  ;;  %v4213_v57 = vadd.f32 %v4212_v55, %v4211_v51  ;;  %v4264_v58 = vpop.f32.mrf.mxu1  ;;  %4724 = vmatpush3.bf16.msra.mxu0 %v5163_v40  ;;  %4746 = vmatprep.subr.bf16.mxu1 %v5170_v12 }
 0x12f   :  { %v4265_v60 = vadd.f32 %v4264_v58, %v4263_v54  ;;  %v4214_v24 = vpop.f32.mrf.mxu0  ;;  %4725 = vmatprep.subr.bf16.mxu0 %v5170_v12 }
 0x130   :  { %v2755_v62 = vadd.f32 %v4213_v57, %v6112_v39  ;;  %v4266_v63 = vpop.f32.mrf.mxu1 }
 0x131   :  { %v4215_v1 = vpop.f32.mrf.mxu0  ;;  %4754 = vmatpush3.bf16.msra.mxu1 %v5170_v12 }
 0x132   :  { %v6283_v5 = vadd.f32 %v4265_v60, %v2755_v62  ;;  %v4216_v39 = vadd.f32 %v4215_v1, %v4214_v24  ;;  %v4267_v8 = vpop.f32.mrf.mxu1  ;;  %4726 = vmatpush3.bf16.msra.mxu0 %v5170_v12  ;;  %v5176_v1 = vld [vmem:[%s6472_s0 + $0x448] ss:$100 sps:$4 sm:$0xff]  }
 0x133   :  { %v4268_v9 = vadd.f32 %v4267_v8, %v4266_v63  ;;  %v4217_v10 = vpop.f32.mrf.mxu0  ;;  %3409 = vmatmul.mubr.bf16.gmra.mxu0 %v5157_v25 }
 0x134   :  { %v2758_v11 = vadd.f32 %v4216_v39, %v6127_v52  ;;  %v4269_v36 = vpop.f32.mrf.mxu1  ;;  %3490 = vmatmul.mubr.bf16.gmra.mxu1 %v5160_v0  ;;  %3416 = vmatprep.mubr.bf16.mxu0 %v5166_v3  ;;  %v5167_v52 = vld [vmem:[%s6472_s0 + $0x440] ss:$100 sps:$4 sm:$0xff]  }
 0x135   :  { %v4218_v13 = vpop.f32.mrf.mxu0  ;;  %3497 = vmatprep.mubr.bf16.mxu1 %v5169_v4 }
 0x136   :  { %v6286_v14 = vadd.f32 %v4268_v9, %v2758_v11  ;;  %v4219_v15 = vadd.f32 %v4218_v13, %v4217_v10  ;;  %v4270_v17 = vpop.f32.mrf.mxu1 }
 0x137   :  { %v4271_v18 = vadd.f32 %v4270_v17, %v4269_v36  ;;  %v4220_v19 = vpop.f32.mrf.mxu0 }
 0x138   :  { %v2763_v20 = vadd.f32 %v4219_v15, %v6145_v2  ;;  %v4272_v22 = vpop.f32.mrf.mxu1 }
 0x139   :  { %v4221_v26 = vpop.f32.mrf.mxu0 }
 0x13a   :  { %v6301_v28 = vadd.f32 %v4271_v18, %v2763_v20  ;;  %v4222_v2 = vadd.f32 %v4221_v26, %v4220_v19  ;;  %v4273_v29 = vpop.f32.mrf.mxu1 }
 0x13b   :  { %v4274_v30 = vadd.f32 %v4273_v29, %v4272_v22  ;;  %v4223_v33 = vpop.f32.mrf.mxu0  ;;  %3417 = vmatmul.mubr.bf16.gmra.mxu0 %v5164_v23 }
 0x13c   :  { %v2766_v34 = vadd.f32 %v4222_v2, %v6160_v16  ;;  %v4275_v35 = vpop.f32.mrf.mxu1  ;;  %3498 = vmatmul.mubr.bf16.gmra.mxu1 %v5167_v52  ;;  %4727 = vmatprep.mubr.bf16.mxu0 %v5171_v27  ;;  %v5174_v16 = vld [vmem:[%s6472_s0 + $0x2b8] ss:$100 sps:$4 sm:$0xff]  }
 0x13d   :  { %v4224_v37 = vpop.f32.mrf.mxu0  ;;  %4731 = vmatprep.mubr.bf16.mxu1 %v5172_v49 }
 0x13e   :  { %v6304_v61 = vadd.f32 %v4274_v30, %v2766_v34  ;;  %v4225_v38 = vadd.f32 %v4224_v37, %v4223_v33  ;;  %v4276_v40 = vpop.f32.mrf.mxu1 }
 0x13f   :  { %v4277_v41 = vadd.f32 %v4276_v40, %v4275_v35  ;;  %v4226_v42 = vpop.f32.mrf.mxu0 }
 0x140   :  { %v2771_v43 = vadd.f32 %v4225_v38, %v6181_v32  ;;  %v4278_v44 = vpop.f32.mrf.mxu1 }
 0x141   :  { %v4227_v48 = vpop.f32.mrf.mxu0 }
 0x142   :  { %v6316_v50 = vadd.f32 %v4277_v41, %v2771_v43  ;;  %v4228_v51 = vadd.f32 %v4227_v48, %v4226_v42  ;;  %v4279_v12 = vpop.f32.mrf.mxu1 }
 0x143   :  { %v4280_v53 = vadd.f32 %v4279_v12, %v4278_v44  ;;  %v4297_v32 = vpop.f32.mrf.mxu0  ;;  %4728 = vmatmul.mubr.bf16.vlgmr.msra.gmra.mxu0 %v5173_v46 }
 0x144   :  { %v2774_v54 = vadd.f32 %v4228_v51, %v6193_v45  ;;  %v4349_v55 = vpop.f32.mrf.mxu1  ;;  %4732 = vmatmul.mubr.bf16.vlgmr.msra.gmra.mxu1 %v5174_v16 }
 0x145   :  { %v4298_v57 = vpop.f32.mrf.mxu0  ;;  %4735 = vmatprep.mubr.bf16.mxu1 %v5175_v7 }
 0x146   :  { %v6319_v58 = vadd.f32 %v4280_v53, %v2774_v54  ;;  %v4299_v60 = vadd.f32 %v4298_v57, %v4297_v32  ;;  %v4350_v24 = vpop.f32.mrf.mxu1 }
 0x147   :  { %v4351_v62 = vadd.f32 %v4350_v24, %v4349_v55  ;;  %v4300_v63 = vpop.f32.mrf.mxu0 }
 0x148   :  { %v2893_v25 = vadd.f32 %v4299_v60, %v6211_v59  ;;  %v4352_v0 = vpop.f32.mrf.mxu1 }
 0x149   :  { %v4301_v3 = vpop.f32.mrf.mxu0 }
 0x14a   :  { %v6325_v45 = vadd.f32 %v4351_v62, %v2893_v25  ;;  %v4302_v4 = vadd.f32 %v4301_v3, %v4300_v63  ;;  %v4353_v39 = vpop.f32.mrf.mxu1 }
 0x14b   :  { %v4354_v8 = vadd.f32 %v4353_v39, %v4352_v0  ;;  %v4303_v9 = vpop.f32.mrf.mxu0 }
 0x14c   :  { %v2896_v10 = vadd.f32 %v4302_v4, %v6220_v6  ;;  %v4355_v11 = vpop.f32.mrf.mxu1  ;;  %4736 = vmatmul.mubr.bf16.gmra.mxu1 %v5176_v1 }
 0x14d   :  { %v4304_v36 = vpop.f32.mrf.mxu0 }
 0x14e   :  { %v6328_v13 = vadd.f32 %v4354_v8, %v2896_v10  ;;  %v4305_v59 = vadd.f32 %v4304_v36, %v4303_v9  ;;  %v4356_v15 = vpop.f32.mrf.mxu1 }
 0x14f   :  { %v4357_v17 = vadd.f32 %v4356_v15, %v4355_v11  ;;  %v4306_v18 = vpop.f32.mrf.mxu0 }
 0x150   :  { %v2901_v19 = vadd.f32 %v4305_v59, %v6238_v21  ;;  %v4358_v20 = vpop.f32.mrf.mxu1 }
 0x151   :  { %v4307_v22 = vpop.f32.mrf.mxu0 }
 0x152   :  { %v6331_v23 = vadd.f32 %v4357_v17, %v2901_v19  ;;  %v4308_v52 = vadd.f32 %v4307_v22, %v4306_v18  ;;  %v4359_v26 = vpop.f32.mrf.mxu1 }
 0x153   :  { %v4360_v27 = vadd.f32 %v4359_v26, %v4358_v20  ;;  %v4309_v49 = vpop.f32.mrf.mxu0 }
 0x154   :  { %v2904_v6 = vadd.f32 %v4308_v52, %v6244_v31  ;;  %v4361_v2 = vpop.f32.mrf.mxu1 }
 0x155   :  { %v4310_v29 = vpop.f32.mrf.mxu0 }
 0x156   :  { %v6334_v30 = vadd.f32 %v4360_v27, %v2904_v6  ;;  %v4311_v33 = vadd.f32 %v4310_v29, %v4309_v49  ;;  %v4362_v34 = vpop.f32.mrf.mxu1 }
 0x157   :  { %v4363_v35 = vadd.f32 %v4362_v34, %v4361_v2  ;;  %v4312_v37 = vpop.f32.mrf.mxu0 }
 0x158   :  { %v2909_v21 = vadd.f32 %v4311_v33, %v6262_v47  ;;  %v4364_v38 = vpop.f32.mrf.mxu1 }
 0x159   :  { %v4313_v40 = vpop.f32.mrf.mxu0 }
 0x15a   :  { %v6337_v41 = vadd.f32 %v4363_v35, %v2909_v21  ;;  %v4314_v42 = vadd.f32 %v4313_v40, %v4312_v37  ;;  %v4365_v43 = vpop.f32.mrf.mxu1 }
 0x15b   :  { %v4366_v44 = vadd.f32 %v4365_v43, %v4364_v38  ;;  %v4315_v46 = vpop.f32.mrf.mxu0 }
 0x15c   :  { %v2912_v31 = vadd.f32 %v4314_v42, %v6268_v56  ;;  %v4367_v16 = vpop.f32.mrf.mxu1 }
 0x15d   :  { %v4316_v48 = vpop.f32.mrf.mxu0 }
 0x15e   :  { %v6340_v7 = vadd.f32 %v4366_v44, %v2912_v31  ;;  %v4317_v51 = vadd.f32 %v4316_v48, %v4315_v46  ;;  %v4368_v12 = vpop.f32.mrf.mxu1 }
 0x15f   :  { %v4369_v53 = vadd.f32 %v4368_v12, %v4367_v16  ;;  %v4318_v32 = vpop.f32.mrf.mxu0 }
 0x160   :  { %v2917_v47 = vadd.f32 %v4317_v51, %v6283_v5  ;;  %v4370_v54 = vpop.f32.mrf.mxu1 }
 0x161   :  { %v4319_v55 = vpop.f32.mrf.mxu0 }
 0x162   :  { %v6343_v57 = vadd.f32 %v4369_v53, %v2917_v47  ;;  %v4320_v60 = vadd.f32 %v4319_v55, %v4318_v32  ;;  %v4371_v24 = vpop.f32.mrf.mxu1 }
 0x163   :  { %v4372_v62 = vadd.f32 %v4371_v24, %v4370_v54  ;;  %v4321_v63 = vpop.f32.mrf.mxu0 }
 0x164   :  { %v2920_v56 = vadd.f32 %v4320_v60, %v6286_v14  ;;  %v4373_v25 = vpop.f32.mrf.mxu1 }
 0x165   :  { %v4322_v0 = vpop.f32.mrf.mxu0 }
 0x166   :  { %v6346_v1 = vadd.f32 %v4372_v62, %v2920_v56  ;;  %v4323_v3 = vadd.f32 %v4322_v0, %v4321_v63  ;;  %v4374_v4 = vpop.f32.mrf.mxu1 }
 0x167   :  { %v4375_v39 = vadd.f32 %v4374_v4, %v4373_v25  ;;  %v4324_v8 = vpop.f32.mrf.mxu0 }
 0x168   :  { %v2925_v5 = vadd.f32 %v4323_v3, %v6301_v28  ;;  %v4376_v9 = vpop.f32.mrf.mxu1 }
 0x169   :  { %v4325_v10 = vpop.f32.mrf.mxu0 }
 0x16a   :  { %v6349_v11 = vadd.f32 %v4375_v39, %v2925_v5  ;;  %v4326_v36 = vadd.f32 %v4325_v10, %v4324_v8  ;;  %v4377_v59 = vpop.f32.mrf.mxu1 }
 0x16b   :  { %v4378_v15 = vadd.f32 %v4377_v59, %v4376_v9  ;;  %v4327_v17 = vpop.f32.mrf.mxu0 }
 0x16c   :  { %v2928_v14 = vadd.f32 %v4326_v36, %v6304_v61  ;;  %v4379_v18 = vpop.f32.mrf.mxu1 }
 0x16d   :  { %v4328_v19 = vpop.f32.mrf.mxu0 }
 0x16e   :  { %v6352_v20 = vadd.f32 %v4378_v15, %v2928_v14  ;;  %v4329_v22 = vadd.f32 %v4328_v19, %v4327_v17  ;;  %v4380_v52 = vpop.f32.mrf.mxu1 }
 0x16f   :  { %v4381_v26 = vadd.f32 %v4380_v52, %v4379_v18  ;;  %v4330_v27 = vpop.f32.mrf.mxu0 }
 0x170   :  { %v2933_v28 = vadd.f32 %v4329_v22, %v6316_v50  ;;  %v4382_v49 = vpop.f32.mrf.mxu1 }
 0x171   :  { %v4331_v6 = vpop.f32.mrf.mxu0 }
 0x172   :  { %v6355_v2 = vadd.f32 %v4381_v26, %v2933_v28  ;;  %v4332_v29 = vadd.f32 %v4331_v6, %v4330_v27  ;;  %v4383_v33 = vpop.f32.mrf.mxu1 }
 0x173   :  { %v4384_v34 = vadd.f32 %v4383_v33, %v4382_v49  ;;  %v4401_v35 = vpop.f32.mrf.mxu0 }
 0x174   :  { %v2936_v61 = vadd.f32 %v4332_v29, %v6319_v58  ;;  %v4453_v37 = vpop.f32.mrf.mxu1 }
 0x175   :  { %v4402_v21 = vpop.f32.mrf.mxu0 }
 0x176   :  { %v6358_v38 = vadd.f32 %v4384_v34, %v2936_v61  ;;  %v4403_v40 = vadd.f32 %v4402_v21, %v4401_v35  ;;  %v4454_v42 = vpop.f32.mrf.mxu1 }
 0x177   :  { %v4455_v43 = vadd.f32 %v4454_v42, %v4453_v37  ;;  %v4404_v44 = vpop.f32.mrf.mxu0 }
 0x178   :  { %v3055_v50 = vadd.f32 %v4403_v40, %v6325_v45  ;;  %v4456_v46 = vpop.f32.mrf.mxu1 }
 0x179   :  { %v4405_v31 = vpop.f32.mrf.mxu0 }
 0x17a   :  { %v6361_v16 = vadd.f32 %v4455_v43, %v3055_v50  ;;  %v4406_v48 = vadd.f32 %v4405_v31, %v4404_v44  ;;  %v4457_v51 = vpop.f32.mrf.mxu1 }
 0x17b   :  { %v4458_v12 = vadd.f32 %v4457_v51, %v4456_v46  ;;  %v4407_v53 = vpop.f32.mrf.mxu0 }
 0x17c   :  { %v3058_v58 = vadd.f32 %v4406_v48, %v6328_v13  ;;  %v4459_v32 = vpop.f32.mrf.mxu1 }
 0x17d   :  { %v4408_v47 = vpop.f32.mrf.mxu0 }
 0x17e   :  { %v6364_v54 = vadd.f32 %v4458_v12, %v3058_v58  ;;  %v4409_v55 = vadd.f32 %v4408_v47, %v4407_v53  ;;  %v4460_v60 = vpop.f32.mrf.mxu1 }
 0x17f   :  { %v4461_v24 = vadd.f32 %v4460_v60, %v4459_v32  ;;  %v4410_v62 = vpop.f32.mrf.mxu0 }
 0x180   :  { %v3063_v45 = vadd.f32 %v4409_v55, %v6331_v23  ;;  %v4462_v63 = vpop.f32.mrf.mxu1 }
 0x181   :  { %v4411_v56 = vpop.f32.mrf.mxu0 }
 0x182   :  { %v6367_v25 = vadd.f32 %v4461_v24, %v3063_v45  ;;  %v4412_v0 = vadd.f32 %v4411_v56, %v4410_v62  ;;  %v4463_v3 = vpop.f32.mrf.mxu1 }
 0x183   :  { %v4464_v4 = vadd.f32 %v4463_v3, %v4462_v63  ;;  %v4413_v39 = vpop.f32.mrf.mxu0 }
 0x184   :  { %v3066_v13 = vadd.f32 %v4412_v0, %v6334_v30  ;;  %v4465_v8 = vpop.f32.mrf.mxu1 }
 0x185   :  { %v4414_v5 = vpop.f32.mrf.mxu0 }
 0x186   :  { %v6370_v9 = vadd.f32 %v4464_v4, %v3066_v13  ;;  %v4415_v10 = vadd.f32 %v4414_v5, %v4413_v39  ;;  %v4466_v36 = vpop.f32.mrf.mxu1 }
 0x187   :  { %v4467_v59 = vadd.f32 %v4466_v36, %v4465_v8  ;;  %v4416_v15 = vpop.f32.mrf.mxu0 }
 0x188   :  { %v3071_v23 = vadd.f32 %v4415_v10, %v6337_v41  ;;  %v4468_v17 = vpop.f32.mrf.mxu1 }
 0x189   :  { %v4417_v14 = vpop.f32.mrf.mxu0 }
 0x18a   :  { %v6373_v18 = vadd.f32 %v4467_v59, %v3071_v23  ;;  %v4418_v19 = vadd.f32 %v4417_v14, %v4416_v15  ;;  %v4469_v22 = vpop.f32.mrf.mxu1 }
 0x18b   :  { %v4470_v52 = vadd.f32 %v4469_v22, %v4468_v17  ;;  %v4419_v26 = vpop.f32.mrf.mxu0 }
 0x18c   :  { %v3074_v30 = vadd.f32 %v4418_v19, %v6340_v7  ;;  %v4471_v27 = vpop.f32.mrf.mxu1 }
 0x18d   :  { %v4420_v28 = vpop.f32.mrf.mxu0 }
 0x18e   :  { %v6376_v49 = vadd.f32 %v4470_v52, %v3074_v30  ;;  %v4421_v6 = vadd.f32 %v4420_v28, %v4419_v26  ;;  %v4472_v29 = vpop.f32.mrf.mxu1 }
 0x18f   :  { %v4473_v33 = vadd.f32 %v4472_v29, %v4471_v27  ;;  %v4422_v34 = vpop.f32.mrf.mxu0 }
 0x190   :  { %v3079_v41 = vadd.f32 %v4421_v6, %v6343_v57  ;;  %v4474_v35 = vpop.f32.mrf.mxu1 }
 0x191   :  { %v4423_v61 = vpop.f32.mrf.mxu0 }
 0x192   :  { %v6379_v37 = vadd.f32 %v4473_v33, %v3079_v41  ;;  %v4424_v21 = vadd.f32 %v4423_v61, %v4422_v34  ;;  %v4475_v40 = vpop.f32.mrf.mxu1 }
 0x193   :  { %v4476_v42 = vadd.f32 %v4475_v40, %v4474_v35  ;;  %v4425_v43 = vpop.f32.mrf.mxu0 }
 0x194   :  { %v3082_v7 = vadd.f32 %v4424_v21, %v6346_v1  ;;  %v4477_v44 = vpop.f32.mrf.mxu1 }
 0x195   :  { %v4426_v50 = vpop.f32.mrf.mxu0 }
 0x196   :  { %v6382_v46 = vadd.f32 %v4476_v42, %v3082_v7  ;;  %v4427_v31 = vadd.f32 %v4426_v50, %v4425_v43  ;;  %v4478_v48 = vpop.f32.mrf.mxu1 }
 0x197   :  { %v4479_v51 = vadd.f32 %v4478_v48, %v4477_v44  ;;  %v4428_v12 = vpop.f32.mrf.mxu0 }
 0x198   :  { %v3087_v57 = vadd.f32 %v4427_v31, %v6349_v11  ;;  %v4480_v53 = vpop.f32.mrf.mxu1 }
 0x199   :  { %v4429_v58 = vpop.f32.mrf.mxu0 }
 0x19a   :  { %v6385_v32 = vadd.f32 %v4479_v51, %v3087_v57  ;;  %v4430_v47 = vadd.f32 %v4429_v58, %v4428_v12  ;;  %v4481_v55 = vpop.f32.mrf.mxu1 }
 0x19b   :  { %v4482_v60 = vadd.f32 %v4481_v55, %v4480_v53  ;;  %v4431_v24 = vpop.f32.mrf.mxu0 }
 0x19c   :  { %v3090_v1 = vadd.f32 %v4430_v47, %v6352_v20  ;;  %v4483_v62 = vpop.f32.mrf.mxu1 }
 0x19d   :  { %v4432_v45 = vpop.f32.mrf.mxu0 }
 0x19e   :  { %v6388_v63 = vadd.f32 %v4482_v60, %v3090_v1  ;;  %v4433_v56 = vadd.f32 %v4432_v45, %v4431_v24  ;;  %v4484_v0 = vpop.f32.mrf.mxu1 }
 0x19f   :  { %v4485_v3 = vadd.f32 %v4484_v0, %v4483_v62  ;;  %v4434_v4 = vpop.f32.mrf.mxu0 }
 0x1a0   :  { %v3095_v11 = vadd.f32 %v4433_v56, %v6355_v2  ;;  %v4486_v39 = vpop.f32.mrf.mxu1 }
 0x1a1   :  { %v4435_v13 = vpop.f32.mrf.mxu0 }
 0x1a2   :  { %v6391_v8 = vadd.f32 %v4485_v3, %v3095_v11  ;;  %v4436_v5 = vadd.f32 %v4435_v13, %v4434_v4  ;;  %v4487_v10 = vpop.f32.mrf.mxu1 }
 0x1a3   :  { %v4488_v36 = vadd.f32 %v4487_v10, %v4486_v39  ;;  %v4505_v59 = vpop.f32.mrf.mxu0 }
 0x1a4   :  { %v3098_v20 = vadd.f32 %v4436_v5, %v6358_v38  ;;  %v4557_v15 = vpop.f32.mrf.mxu1 }
 0x1a5   :  { %v4506_v23 = vpop.f32.mrf.mxu0 }
 0x1a6   :  { %v6394_v17 = vadd.f32 %v4488_v36, %v3098_v20  ;;  %v4507_v14 = vadd.f32 %v4506_v23, %v4505_v59  ;;  %v4558_v19 = vpop.f32.mrf.mxu1 }
 0x1a7   :  { %v4559_v22 = vadd.f32 %v4558_v19, %v4557_v15  ;;  %v4508_v52 = vpop.f32.mrf.mxu0 }
 0x1a8   :  { %v3217_v2 = vadd.f32 %v4507_v14, %v6361_v16  ;;  %v4560_v26 = vpop.f32.mrf.mxu1 }
 0x1a9   :  { %v4509_v30 = vpop.f32.mrf.mxu0 }
 0x1aa   :  { %v6397_v27 = vadd.f32 %v4559_v22, %v3217_v2  ;;  %v4510_v28 = vadd.f32 %v4509_v30, %v4508_v52  ;;  %v4561_v6 = vpop.f32.mrf.mxu1 }
 0x1ab   :  { %v4562_v29 = vadd.f32 %v4561_v6, %v4560_v26  ;;  %v4511_v33 = vpop.f32.mrf.mxu0 }
 0x1ac   :  { %v3220_v38 = vadd.f32 %v4510_v28, %v6364_v54  ;;  %v4563_v34 = vpop.f32.mrf.mxu1 }
 0x1ad   :  { %v4512_v41 = vpop.f32.mrf.mxu0 }
 0x1ae   :  { %v6400_v35 = vadd.f32 %v4562_v29, %v3220_v38  ;;  %v4513_v61 = vadd.f32 %v4512_v41, %v4511_v33  ;;  %v4564_v21 = vpop.f32.mrf.mxu1 }
 0x1af   :  { %v4565_v40 = vadd.f32 %v4564_v21, %v4563_v34  ;;  %v4514_v42 = vpop.f32.mrf.mxu0 }
 0x1b0   :  { %v3225_v16 = vadd.f32 %v4513_v61, %v6367_v25  ;;  %v4566_v43 = vpop.f32.mrf.mxu1 }
 0x1b1   :  { %v4515_v7 = vpop.f32.mrf.mxu0 }
 0x1b2   :  { %v6403_v44 = vadd.f32 %v4565_v40, %v3225_v16  ;;  %v4516_v50 = vadd.f32 %v4515_v7, %v4514_v42  ;;  %v4567_v31 = vpop.f32.mrf.mxu1 }
 0x1b3   :  { %v4568_v48 = vadd.f32 %v4567_v31, %v4566_v43  ;;  %v4517_v51 = vpop.f32.mrf.mxu0 }
 0x1b4   :  { %v3228_v54 = vadd.f32 %v4516_v50, %v6370_v9  ;;  %v4569_v12 = vpop.f32.mrf.mxu1 }
 0x1b5   :  { %v4518_v57 = vpop.f32.mrf.mxu0 }
 0x1b6   :  { %v6406_v53 = vadd.f32 %v4568_v48, %v3228_v54  ;;  %v4519_v58 = vadd.f32 %v4518_v57, %v4517_v51  ;;  %v4570_v47 = vpop.f32.mrf.mxu1 }
 0x1b7   :  { %v4571_v55 = vadd.f32 %v4570_v47, %v4569_v12  ;;  %v4520_v60 = vpop.f32.mrf.mxu0 }
 0x1b8   :  { %6475 = vst [vmem:[#allocation2_spill] sm:$0xff] %v6406_v53  ;;  %v3233_v25 = vadd.f32 %v4519_v58, %v6373_v18  ;;  %v4572_v24 = vpop.f32.mrf.mxu1 }
 0x1b9   :  { %v4521_v1 = vpop.f32.mrf.mxu0 }
 0x1ba   :  { %v6409_v62 = vadd.f32 %v4571_v55, %v3233_v25  ;;  %v4522_v45 = vadd.f32 %v4521_v1, %v4520_v60  ;;  %v4573_v56 = vpop.f32.mrf.mxu1 }
 0x1bb   :  { %v4574_v0 = vadd.f32 %v4573_v56, %v4572_v24  ;;  %v4523_v3 = vpop.f32.mrf.mxu0 }
 0x1bc   :  { %6476 = vst [vmem:[#allocation3_spill] sm:$0xff] %v6409_v62  ;;  %v3236_v9 = vadd.f32 %v4522_v45, %v6376_v49  ;;  %v4575_v4 = vpop.f32.mrf.mxu1 }
 0x1bd   :  { %v4524_v11 = vpop.f32.mrf.mxu0 }
 0x1be   :  { %v6412_v39 = vadd.f32 %v4574_v0, %v3236_v9  ;;  %v4525_v13 = vadd.f32 %v4524_v11, %v4523_v3  ;;  %v4576_v5 = vpop.f32.mrf.mxu1 }
 0x1bf   :  { %v4577_v10 = vadd.f32 %v4576_v5, %v4575_v4  ;;  %v4526_v36 = vpop.f32.mrf.mxu0 }
 0x1c0   :  { %6477 = vst [vmem:[#allocation4_spill] sm:$0xff] %v6412_v39  ;;  %v3241_v18 = vadd.f32 %v4525_v13, %v6379_v37  ;;  %v4578_v59 = vpop.f32.mrf.mxu1 }
 0x1c1   :  { %v4527_v20 = vpop.f32.mrf.mxu0 }
 0x1c2   :  { %v6415_v15 = vadd.f32 %v4577_v10, %v3241_v18  ;;  %v4528_v23 = vadd.f32 %v4527_v20, %v4526_v36  ;;  %v4579_v14 = vpop.f32.mrf.mxu1 }
 0x1c3   :  { %v4529_v19 = vpop.f32.mrf.mxu0  ;;  %v4580_v49 = vadd.f32 %v4579_v14, %v4578_v59 }
 0x1c4   :  { %v3244_v22 = vadd.f32 %v4528_v23, %v6382_v46  ;;  %v4581_v52 = vpop.f32.mrf.mxu1 }
 0x1c5   :  { %v4530_v2 = vpop.f32.mrf.mxu0 }
 0x1c6   :  { %v6418_v26 = vadd.f32 %v4580_v49, %v3244_v22  ;;  %v4531_v30 = vadd.f32 %v4530_v2, %v4529_v19  ;;  %v4582_v28 = vpop.f32.mrf.mxu1 }
 0x1c7   :  { %v4583_v6 = vadd.f32 %v4582_v28, %v4581_v52  ;;  %v4532_v29 = vpop.f32.mrf.mxu0 }
 0x1c8   :  { %6478 = vst [vmem:[#allocation5_spill] sm:$0xff] %v6418_v26  ;;  %v3249_v37 = vadd.f32 %v4531_v30, %v6385_v32  ;;  %v4584_v33 = vpop.f32.mrf.mxu1 }
 0x1c9   :  { %v4533_v38 = vpop.f32.mrf.mxu0 }
 0x1ca   :  { %v6421_v34 = vadd.f32 %v4583_v6, %v3249_v37  ;;  %v4534_v41 = vadd.f32 %v4533_v38, %v4532_v29  ;;  %v4585_v61 = vpop.f32.mrf.mxu1 }
 0x1cb   :  { %v4586_v21 = vadd.f32 %v4585_v61, %v4584_v33  ;;  %v4535_v40 = vpop.f32.mrf.mxu0 }
 0x1cc   :  { %6479 = vst [vmem:[#allocation6_spill] sm:$0xff] %v6421_v34  ;;  %v3252_v46 = vadd.f32 %v4534_v41, %v6388_v63  ;;  %v4587_v42 = vpop.f32.mrf.mxu1 }
 0x1cd   :  { %v4536_v16 = vpop.f32.mrf.mxu0 }
 0x1ce   :  { %v6424_v43 = vadd.f32 %v4586_v21, %v3252_v46  ;;  %v4588_v7 = vpop.f32.mrf.mxu1  ;;  %v4537_v33 = vadd.f32 %v4536_v16, %v4535_v40 }
 0x1cf   :  { %v4538_v50 = vpop.f32.mrf.mxu0 }
 0x1d0   :  { %6480 = vst [vmem:[#allocation7_spill] sm:$0xff] %v6424_v43  ;;  %v4590_v31 = vpop.f32.mrf.mxu1  ;;  %v3257_v26 = vadd.f32 %v4537_v33, %v6391_v8 }
 0x1d1   :  { %v4539_v48 = vpop.f32.mrf.mxu0 }
 0x1d2   :  { %v4591_v51 = vpop.f32.mrf.mxu1  ;;  %v4540_v38 = vadd.f32 %v4539_v48, %v4538_v50 }
 0x1d3   :  { %v4609_v32 = vpop.f32.mrf.mxu0  ;;  %v4592_v53 = vadd.f32 %v4591_v51, %v4590_v31  ;;  %v6485_v31 = vld [vmem:[#allocation3_spill] sm:$0xff] }
 0x1d4   :  { %v4661_v54 = vpop.f32.mrf.mxu1 }
 0x1d5   :  { %v4610_v12 = vpop.f32.mrf.mxu0 }
 0x1d6   :  { %v4662_v57 = vpop.f32.mrf.mxu1  ;;  %v4611_v41 = vadd.f32 %v4610_v12, %v4609_v32 }
 0x1d7   :  { %v4612_v58 = vpop.f32.mrf.mxu0  ;;  %v4663_v50 = vadd.f32 %v4662_v57, %v4661_v54 }
 0x1d8   :  { %v4664_v47 = vpop.f32.mrf.mxu1  ;;  %v3379_v39 = vadd.f32 %v4611_v41, %v6397_v27 }
 0x1d9   :  { %v4613_v55 = vpop.f32.mrf.mxu0 }
 0x1da   :  { %v4665_v60 = vpop.f32.mrf.mxu1  ;;  %v4614_v62 = vadd.f32 %v4613_v55, %v4612_v58  ;;  %v3460_v27 = vadd.f32 %v4663_v50, %v3379_v39  ;;  %v6486_v55 = vld [vmem:[#allocation2_spill] sm:$0xff] }
 0x1db   :  { %v4615_v25 = vpop.f32.mrf.mxu0  ;;  %v4666_v33 = vadd.f32 %v4665_v60, %v4664_v47 }
 0x1dc   :  { %v4667_v24 = vpop.f32.mrf.mxu1 }
 0x1dd   :  { %v4616_v63 = vpop.f32.mrf.mxu0 }
 0x1de   :  { %v4668_v1 = vpop.f32.mrf.mxu1  ;;  %v4617_v46 = vadd.f32 %v4616_v63, %v4615_v25 }
 0x1df   :  { %v4618_v45 = vpop.f32.mrf.mxu0 }
 0x1e0   :  { %v4670_v56 = vpop.f32.mrf.mxu1  ;;  %v3387_v25 = vadd.f32 %v4617_v46, %v6403_v44  ;;  %v6487_v44 = vld [vmem:[#allocation4_spill] sm:$0xff] }
 0x1e1   :  { %v4619_v0 = vpop.f32.mrf.mxu0 }
 0x1e2   :  { %v4671_v3 = vpop.f32.mrf.mxu1  ;;  %v4620_v48 = vadd.f32 %v4619_v0, %v4618_v45 }
 0x1e3   :  { %v4621_v9 = vpop.f32.mrf.mxu0  ;;  %v4672_v0 = vadd.f32 %v4671_v3, %v4670_v56 }
 0x1e4   :  { %v4673_v4 = vpop.f32.mrf.mxu1  ;;  %v3390_v45 = vadd.f32 %v4620_v48, %v6486_v55 }
 0x1e5   :  { %v4622_v11 = vpop.f32.mrf.mxu0 }
 0x1e6   :  { %v4674_v13 = vpop.f32.mrf.mxu1 }
 0x1e7   :  { %v4624_v5 = vpop.f32.mrf.mxu0 }
 0x1e8   :  { %v6426_v10 = vpop.f32.mrf.mxu1 }
 0x1e9   :  { %6481 = vst [vmem:[#allocation8_spill] sm:$0xff] %v6426_v10  ;;  %v4625_v36 = vpop.f32.mrf.mxu0 }
 0x1ea   :  { %v4677_v18 = vpop.f32.mrf.mxu1  ;;  %v4626_v32 = vadd.f32 %v4625_v36, %v4624_v5 }
 0x1eb   :  { %v4627_v59 = vpop.f32.mrf.mxu0 }
 0x1ec   :  { %v4679_v20 = vpop.f32.mrf.mxu1 }
 0x1ed   :  { %v4628_v23 = vpop.f32.mrf.mxu0 }
 0x1ee   :  { %v4680_v14 = vpop.f32.mrf.mxu1  ;;  %v4629_v43 = vadd.f32 %v4628_v23, %v4627_v59 }
 0x1ef   :  { %v4630_v19 = vpop.f32.mrf.mxu0  ;;  %v4681_v58 = vadd.f32 %v4680_v14, %v4679_v20 }
 0x1f0   :  { %v4682_v22 = vpop.f32.mrf.mxu1  ;;  %v3403_v63 = vadd.f32 %v4629_v43, %v6415_v15  ;;  %v6488_v15 = vld [vmem:[#allocation5_spill] sm:$0xff] }
 0x1f1   :  { %v4631_v49 = vpop.f32.mrf.mxu0 }
 0x1f2   :  { %v4683_v52 = vpop.f32.mrf.mxu1  ;;  %v4632_v12 = vadd.f32 %v4631_v49, %v4630_v19  ;;  %v3484_v39 = vadd.f32 %v4681_v58, %v3403_v63  ;;  %v3471_v49 = vadd.f32 %v4672_v0, %v3390_v45 }
 0x1f3   :  { %v4633_v2 = vpop.f32.mrf.mxu0 }
 0x1f4   :  { %v6428_v30 = vpop.f32.mrf.mxu1  ;;  %v3406_v43 = vadd.f32 %v4632_v12, %v6488_v15 }
 0x1f5   :  { %6482 = vst [vmem:[#allocation9_spill] sm:$0xff] %v6428_v30  ;;  %v4634_v28 = vpop.f32.mrf.mxu0  ;;  %v3260_v30 = vadd.f32 %v4540_v38, %v6394_v17 }
 0x1f6   :  { %v6430_v6 = vpop.f32.mrf.mxu1 }
 0x1f7   :  { %6483 = vst [vmem:[#allocation10_spill] sm:$0xff] %v6430_v6  ;;  %v4636_v29 = vpop.f32.mrf.mxu0  ;;  %v4589_v6 = vadd.f32 %v4588_v7, %v4587_v42  ;;  %v3341_v17 = vadd.f32 %v4592_v53, %v3260_v30  ;;  %v3382_v42 = vadd.f32 %v4614_v62, %v6400_v35  ;;  %v4669_v7 = vadd.f32 %v4668_v1, %v4667_v24  ;;  %v6489_v35 = vld [vmem:[#allocation8_spill] sm:$0xff] }
 0x1f8   :  { %v6432_v37 = vpop.f32.mrf.mxu1  ;;  %v4678_v62 = vadd.f32 %v4677_v18, %v6489_v35  ;;  %v4684_v24 = vadd.f32 %v4683_v52, %v4682_v22  ;;  %v4635_v1 = vadd.f32 %v4634_v28, %v4633_v2  ;;  %v6492_v52 = vld [vmem:[#allocation6_spill] sm:$0xff]  ;;  %v6493_v28 = vld [vmem:[#allocation7_spill] sm:$0xff] }
 0x1f9   :  { %6484 = vst [vmem:[#allocation11_spill] sm:$0xff] %v6432_v37  ;;  %v4637_v61 = vpop.f32.mrf.mxu0  ;;  %v4623_v37 = vadd.f32 %v4622_v11, %v4621_v9  ;;  %v3338_v23 = vadd.f32 %v4589_v6, %v3257_v26  ;;  %v3398_v9 = vadd.f32 %v4626_v32, %v6487_v44  ;;  %v4675_v11 = vadd.f32 %v4674_v13, %v4673_v4 }
 0x1fa   :  { %v6434_v21 = vpop.f32.mrf.mxu1  ;;  %v3468_v53 = vadd.f32 %v4669_v7, %v3387_v25  ;;  %v4638_v5 = vadd.f32 %v4637_v61, %v4636_v29  ;;  %v3487_v30 = vadd.f32 %v4684_v24, %v3406_v43  ;;  %v3463_v6 = vadd.f32 %v4666_v33, %v3382_v42 }
 0x1fb   :  { %v4639_v34 = vpop.f32.mrf.mxu0  ;;  %v3395_v51 = vadd.f32 %v4623_v37, %v6485_v31  ;;  %v3479_v4 = vadd.f32 %v4678_v62, %v3398_v9  ;;  %v3411_v2 = vadd.f32 %v4635_v1, %v6492_v52 }
 0x1fc   :  { %v4691_v10 = vpop.f32.mrf.mxu1  ;;  %v3414_v29 = vadd.f32 %v4638_v5, %v6493_v28 }
 0x1fd   :  { %v4640_v40 = vpop.f32.mrf.mxu0  ;;  %v3476_v56 = vadd.f32 %v4675_v11, %v3395_v51 }
 0x1fe   :  { %v4692_v16 = vpop.f32.mrf.mxu1  ;;  %v4641_v26 = vadd.f32 %v4640_v40, %v4639_v34  ;;  %v6490_v34 = vld [vmem:[#allocation9_spill] sm:$0xff]  ;;  %v6491_v13 = vld [vmem:[#allocation10_spill] sm:$0xff] }
 0x1ff   :  { %v4642_v59 = vpop.f32.mrf.mxu0  ;;  %v4687_v37 = vadd.f32 %v6491_v13, %v6490_v34  ;;  %v4693_v50 = vadd.f32 %v4692_v16, %v4691_v10 }
 0x200   :  { %v4694_v8 = vpop.f32.mrf.mxu1  ;;  %v3419_v38 = vadd.f32 %v4641_v26, %v3338_v23  ;;  %v6494_v44 = vld [vmem:[#allocation11_spill] sm:$0xff] }
 0x201   :  { %v4643_v54 = vpop.f32.mrf.mxu0  ;;  %v4690_v10 = vadd.f32 %v6434_v21, %v6494_v44  ;;  %v3492_v16 = vadd.f32 %v4687_v37, %v3411_v2 }
 0x202   :  { %v4695_v57 = vpop.f32.mrf.mxu1  ;;  %v4644_v36 = vadd.f32 %v4643_v54, %v4642_v59  ;;  %v3500_v51 = vadd.f32 %v4693_v50, %v3419_v38 }
 0x203   :  { %v4729_v47 = vpop.f32.mrf.mxu0  ;;  %v3495_v26 = vadd.f32 %v4690_v10, %v3414_v29 }
 0x204   :  { %v4733_v60 = vpop.f32.mrf.mxu1  ;;  %v3549_v20 = vadd.f32 %v4729_v47, %v3468_v53  ;;  %v3422_v48 = vadd.f32 %v4644_v36, %v3341_v17 }
 0x205   :  { %v3565_v14 = vadd.f32 %v4733_v60, %v3484_v39  ;;  %v3540_v19 = vpop.f32.mrf.mxu0 }
 0x206   :  { %v3556_v3 = vpop.f32.mrf.mxu1  ;;  %v3541_v41 = vadd.f32 %v3540_v19, %v3460_v27  ;;  %v3589_v32 = vmax.f32 %v3549_v20, 0.0  ;;  %v4696_v27 = vadd.f32 %v4695_v57, %v4694_v8 }
 0x207   :  { %v3557_v46 = vadd.f32 %v3556_v3, %v3476_v56  ;;  %v4730_v18 = vpop.f32.mrf.mxu0  ;;  %v3593_v12 = vmax.f32 %v3565_v14, 0.0 }
 0x208   :  { %v4734_v22 = vpop.f32.mrf.mxu1  ;;  %v3552_v61 = vadd.f32 %v4730_v18, %v3471_v49  ;;  %v3587_v7 = vmax.f32 %v3541_v41, 0.0  ;;  %v3503_v15 = vadd.f32 %v4696_v27, %v3422_v48 }
 0x209   :  { %v3568_v40 = vadd.f32 %v4734_v22, %v3487_v30  ;;  %v3543_v25 = vpop.f32.mrf.mxu0  ;;  %v3591_v31 = vmax.f32 %v3557_v46, 0.0 }
 0x20a   :  { %v3559_v63 = vpop.f32.mrf.mxu1  ;;  %v3590_v59 = vmax.f32 %v3552_v61, 0.0  ;;  %v3544_v42 = vadd.f32 %v3543_v25, %v3463_v6 }
 0x20b   :  { %v3594_v33 = vmax.f32 %v3568_v40, 0.0  ;;  %v3560_v23 = vadd.f32 %v3559_v63, %v3479_v4 }
 0x20c   :  { %v4737_v58 = vpop.f32.mrf.mxu1  ;;  %v4046_v54 = vpack.c.bf16 %v3590_v59, %v3589_v32  ;;  %v3588_v45 = vmax.f32 %v3544_v42, 0.0 }
 0x20d   :  { %v4056_v55 = vpack.c.bf16 %v3594_v33, %v3593_v12  ;;  %v3592_v0 = vmax.f32 %v3560_v23, 0.0  ;;  %v3581_v9 = vadd.f32 %v4737_v58, %v3500_v51 }
 0x20e   :  { %v3572_v17 = vpop.f32.mrf.mxu1  ;;  %4068 = vst [vmem:[%s6474_s3 + $0x8] sm:$0xff] %v4046_v54   ;;  %v4041_v8 = vpack.c.bf16 %v3588_v45, %v3587_v7 }
 0x20f   :  { %4070 = vst [vmem:[%s6474_s3 + $0x18] sm:$0xff] %v4056_v55   ;;  %v4051_v57 = vpack.c.bf16 %v3592_v0, %v3591_v31  ;;  %v3573_v21 = vadd.f32 %v3572_v17, %v3492_v16  ;;  %v3597_v47 = vmax.f32 %v3581_v9, 0.0 }
 0x210   :  { %v4738_v43 = vpop.f32.mrf.mxu1  ;;  %4042 = vst [vmem:[%s6474_s3] sm:$0xff] %v4041_v8  }
 0x211   :  { %4069 = vst [vmem:[%s6474_s3 + $0x10] sm:$0xff] %v4051_v57   ;;  %v3584_v11 = vadd.f32 %v4738_v43, %v3503_v15  ;;  %v3595_v35 = vmax.f32 %v3573_v21, 0.0 }
 0x212   :  { %v3575_v53 = vpop.f32.mrf.mxu1 }
 0x213   :  { %v3598_v39 = vmax.f32 %v3584_v11, 0.0  ;;  %v3576_v60 = vadd.f32 %v3575_v53, %v3495_v26 }
 0x215   :  { %v4066_v62 = vpack.c.bf16 %v3598_v39, %v3597_v47  ;;  %v3596_v24 = vmax.f32 %v3576_v60, 0.0 }
 0x217   :  { %4072 = vst [vmem:[%s6474_s3 + $0x28] sm:$0xff] %v4066_v62   ;;  %v4061_v1 = vpack.c.bf16 %v3596_v24, %v3595_v35 }
 0x219   :  { %4071 = vst [vmem:[%s6474_s3 + $0x20] sm:$0xff] %v4061_v1  }

// kernel: dqn_cnn_forward.7
= control target key start
LH: loop header
LB: loop body
LE: loop exit
PB: predicated region body
PF: predicated region fallthrough
CT: control target
= control target key end

     0   :  { %v217_v36 = vlaneseq  ;;  %v2477_v37 = vmov 1966171168   ;;  %s3230_s0 = inlined_call_operand.vmem [shape: bf16[2,768], index: 0, kind: input, shape index: {}]   ;;  %s3231_s1 = inlined_call_operand.vmem [shape: bf16[768,512], index: 1, kind: input, shape index: {}]   ;;  %s3232_s2 = inlined_call_operand.vmem [shape: f32[1,512], index: 2, kind: input, shape index: {}]   ;;  %s3233_s3 = inlined_call_operand.vmem [shape: bf16[512,128], index: 3, kind: input, shape index: {}]   ;;  %s3234_s4 = inlined_call_operand.vmem [shape: f32[1,128], index: 4, kind: input, shape index: {}]   ;;  %s3235_s5 = inlined_call_operand.hbm [shape: f32[2,128], index: 5, kind: output, shape index: {}]  }
   0x1   :  { %v2134_v0 = vld [vmem:[%s3231_s1 + $0xe4] ss:$16 sps:$4 sm:$0xff]   ;;  %v2138_v2 = vld [vmem:[%s3231_s1 + $0xe0] ss:$16 sps:$4 sm:$0xff]   ;;  %v240_v38 = vunpack.c.l.s4 %v2477_v37  ;;  %v2257_v37 = vld [vmem:[%s3231_s1 + $0x68] ss:$16 sps:$4 sm:$0xff]  }
   0x2   :  { %v2136_v1 = vld [vmem:[%s3231_s1 + $0x2e4] ss:$16 sps:$4 sm:$0xff]   ;;  %1251 = vmatprep.subr.bf16.mxu0 %v2134_v0  ;;  %v2139_v3 = vld [vmem:[%s3231_s1 + $0x2e0] ss:$16 sps:$4 sm:$0xff]   ;;  %v2626_v42 = vshrl.u32 %v217_v36, 7 }
   0x3   :  { %1292 = vmatprep.subr.bf16.mxu1 %v2136_v1  ;;  %v2140_v4 = vld [vmem:[%s3231_s1 + $0xc4] ss:$16 sps:$4 sm:$0xff]   ;;  %1252 = vmatpush1.bf16.msra.mxu0 %v2138_v2  ;;  %v2144_v6 = vld [vmem:[%s3231_s1 + $0xc0] ss:$16 sps:$4 sm:$0xff]   ;;  %v241_v43 = vunpack.c.0.s8 %v240_v38 }
   0x4   :  { %1293 = vmatpush1.bf16.msra.mxu1 %v2139_v3  ;;  %v2142_v5 = vld [vmem:[%s3231_s1 + $0x2c4] ss:$16 sps:$4 sm:$0xff]   ;;  %1253 = vmatprep.subr.bf16.mxu0 %v2140_v4  ;;  %v2145_v7 = vld [vmem:[%s3231_s1 + $0x2c0] ss:$16 sps:$4 sm:$0xff]  }
   0x5   :  { %1294 = vmatprep.subr.bf16.mxu1 %v2142_v5  ;;  %v2146_v8 = vld [vmem:[%s3231_s1 + $0xa4] ss:$16 sps:$4 sm:$0xff]   ;;  %v2150_v10 = vld [vmem:[%s3231_s1 + $0xa0] ss:$16 sps:$4 sm:$0xff]   ;;  %v2644_v49 = vsub.s32 %v241_v43, %v2626_v42 }
   0x6   :  { %v2148_v9 = vld [vmem:[%s3231_s1 + $0x2a4] ss:$16 sps:$4 sm:$0xff]   ;;  %v2151_v11 = vld [vmem:[%s3231_s1 + $0x2a0] ss:$16 sps:$4 sm:$0xff]  }
   0x7   :  { %1254 = vmatpush1.bf16.msra.mxu0 %v2144_v6  ;;  %v2152_v12 = vld [vmem:[%s3231_s1 + $0x84] ss:$16 sps:$4 sm:$0xff]   ;;  %v2156_v14 = vld [vmem:[%s3231_s1 + $0x80] ss:$16 sps:$4 sm:$0xff]  }
   0x8   :  { %1295 = vmatpush1.bf16.msra.mxu1 %v2145_v7  ;;  %1255 = vmatprep.subr.bf16.mxu0 %v2146_v8  ;;  %v2154_v13 = vld [vmem:[%s3231_s1 + $0x284] ss:$16 sps:$4 sm:$0xff]   ;;  %v2157_v15 = vld [vmem:[%s3231_s1 + $0x280] ss:$16 sps:$4 sm:$0xff]  }
   0x9   :  { %1296 = vmatprep.subr.bf16.mxu1 %v2148_v9  ;;  %v2158_v16 = vld [vmem:[%s3231_s1 + $0x64] ss:$16 sps:$4 sm:$0xff]   ;;  %v2162_v18 = vld [vmem:[%s3231_s1 + $0x60] ss:$16 sps:$4 sm:$0xff]  }
   0xa   :  { %v2160_v17 = vld [vmem:[%s3231_s1 + $0x264] ss:$16 sps:$4 sm:$0xff]   ;;  %v2163_v19 = vld [vmem:[%s3231_s1 + $0x260] ss:$16 sps:$4 sm:$0xff]  }
   0xb   :  { %1256 = vmatpush1.bf16.msra.mxu0 %v2150_v10  ;;  %v2164_v20 = vld [vmem:[%s3231_s1 + $0x44] ss:$16 sps:$4 sm:$0xff]   ;;  %v2168_v22 = vld [vmem:[%s3231_s1 + $0x40] ss:$16 sps:$4 sm:$0xff]  }
   0xc   :  { %1297 = vmatpush1.bf16.msra.mxu1 %v2151_v11  ;;  %1257 = vmatprep.subr.bf16.mxu0 %v2152_v12  ;;  %v2166_v21 = vld [vmem:[%s3231_s1 + $0x244] ss:$16 sps:$4 sm:$0xff]   ;;  %v2169_v23 = vld [vmem:[%s3231_s1 + $0x240] ss:$16 sps:$4 sm:$0xff]  }
   0xd   :  { %1298 = vmatprep.subr.bf16.mxu1 %v2154_v13  ;;  %v2170_v24 = vld [vmem:[%s3231_s1 + $0x24] ss:$16 sps:$4 sm:$0xff]   ;;  %v2174_v26 = vld [vmem:[%s3231_s1 + $0x20] ss:$16 sps:$4 sm:$0xff]  }
   0xe   :  { %v2172_v25 = vld [vmem:[%s3231_s1 + $0x224] ss:$16 sps:$4 sm:$0xff]   ;;  %v2175_v27 = vld [vmem:[%s3231_s1 + $0x220] ss:$16 sps:$4 sm:$0xff]  }
   0xf   :  { %1258 = vmatpush1.bf16.msra.mxu0 %v2156_v14  ;;  %v2176_v28 = vld [vmem:[%s3231_s1 + $0x4] ss:$16 sps:$4 sm:$0xff]   ;;  %v2180_v30 = vld [vmem:[%s3231_s1] ss:$16 sps:$4 sm:$0xff]  }
  0x10   :  { %1299 = vmatpush1.bf16.msra.mxu1 %v2157_v15  ;;  %1259 = vmatprep.subr.bf16.mxu0 %v2158_v16  ;;  %v2178_v29 = vld [vmem:[%s3231_s1 + $0x204] ss:$16 sps:$4 sm:$0xff]   ;;  %v2181_v31 = vld [vmem:[%s3231_s1 + $0x200] ss:$16 sps:$4 sm:$0xff]   ;;  %v2235_v16 = vld [vmem:[%s3231_s1 + $0xec] ss:$16 sps:$4 sm:$0xff]  }
  0x11   :  { %1300 = vmatprep.subr.bf16.mxu1 %v2160_v17  ;;  %v2182_v32 = vld [vmem:[%s3231_s1 + $0x1e4] ss:$16 sps:$4 sm:$0xff]   ;;  %v2186_v34 = vld [vmem:[%s3231_s1 + $0x1e0] ss:$16 sps:$4 sm:$0xff]  }
  0x12   :  { %v2184_v33 = vld [vmem:[%s3231_s1 + $0x3e4] ss:$16 sps:$4 sm:$0xff]   ;;  %v2187_v35 = vld [vmem:[%s3231_s1 + $0x3e0] ss:$16 sps:$4 sm:$0xff]  }
  0x13   :  { %1260 = vmatpush1.bf16.msra.mxu0 %v2162_v18  ;;  %v2188_v39 = vld [vmem:[%s3231_s1 + $0x1c4] ss:$16 sps:$4 sm:$0xff]   ;;  %v2192_v41 = vld [vmem:[%s3231_s1 + $0x1c0] ss:$16 sps:$4 sm:$0xff]  }
  0x14   :  { %1301 = vmatpush1.bf16.msra.mxu1 %v2163_v19  ;;  %1261 = vmatprep.subr.bf16.mxu0 %v2164_v20  ;;  %v2190_v40 = vld [vmem:[%s3231_s1 + $0x3c4] ss:$16 sps:$4 sm:$0xff]   ;;  %v2193_v44 = vld [vmem:[%s3231_s1 + $0x3c0] ss:$16 sps:$4 sm:$0xff]   ;;  %v2233_v20 = vld [vmem:[%s3231_s1 + $0xe8] ss:$16 sps:$4 sm:$0xff]  }
  0x15   :  { %1302 = vmatprep.subr.bf16.mxu1 %v2166_v21  ;;  %v2194_v45 = vld [vmem:[%s3231_s1 + $0x1a4] ss:$16 sps:$4 sm:$0xff]   ;;  %v2198_v47 = vld [vmem:[%s3231_s1 + $0x1a0] ss:$16 sps:$4 sm:$0xff]  }
  0x16   :  { %v2196_v46 = vld [vmem:[%s3231_s1 + $0x3a4] ss:$16 sps:$4 sm:$0xff]   ;;  %v2199_v48 = vld [vmem:[%s3231_s1 + $0x3a0] ss:$16 sps:$4 sm:$0xff]  }
  0x17   :  { %1262 = vmatpush1.bf16.msra.mxu0 %v2168_v22  ;;  %v2200_v50 = vld [vmem:[%s3231_s1 + $0x184] ss:$16 sps:$4 sm:$0xff]   ;;  %v2204_v53 = vld [vmem:[%s3231_s1 + $0x180] ss:$16 sps:$4 sm:$0xff]   ;;  %v2241_v22 = vld [vmem:[%s3231_s1 + $0xcc] ss:$16 sps:$4 sm:$0xff]  }
  0x18   :  { %1303 = vmatpush1.bf16.msra.mxu1 %v2169_v23  ;;  %1263 = vmatprep.subr.bf16.mxu0 %v2170_v24  ;;  %v2202_v51 = vld [vmem:[%s3231_s1 + $0x384] ss:$16 sps:$4 sm:$0xff]   ;;  %v2205_v56 = vld [vmem:[%s3231_s1 + $0x380] ss:$16 sps:$4 sm:$0xff]  }
  0x19   :  { %1304 = vmatprep.subr.bf16.mxu1 %v2172_v25  ;;  %v22_v52 = vld [vmem:[%s3230_s0] sm:$0x3f]  ;;  %v2239_v25 = vld [vmem:[%s3231_s1 + $0xc8] ss:$16 sps:$4 sm:$0xff]  }
  0x1a   :  { %v245_v54 = vrot.slane %v22_v52, %v2644_v49  ;;  %v238_v55 = vcombine.high %v22_v52, %v22_v52  ;;  %v2206_v57 = vld [vmem:[%s3231_s1 + $0x164] ss:$16 sps:$4 sm:$0xff]   ;;  %v2210_v61 = vld [vmem:[%s3231_s1 + $0x160] ss:$16 sps:$4 sm:$0xff]   ;;  %v2283_v52 = vld [vmem:[%s3231_s1 + $0x1ec] ss:$16 sps:$4 sm:$0xff]  }
  0x1b   :  { %1264 = vmatpush1.bf16.msra.mxu0 %v2174_v26  ;;  %v2208_v58 = vld [vmem:[%s3231_s1 + $0x364] ss:$16 sps:$4 sm:$0xff]   ;;  %v2211_v0 = vld [vmem:[%s3231_s1 + $0x360] ss:$16 sps:$4 sm:$0xff]  }
  0x1c   :  { %1305 = vmatpush1.bf16.msra.mxu1 %v2175_v27  ;;  %1265 = vmatprep.subr.bf16.mxu0 %v2176_v28  ;;  %v253_v59 = vcombine.high %v245_v54, %v245_v54  ;;  %v252_v60 = vrot.slane %v238_v55, %v2644_v49  ;;  %v2212_v1 = vld [vmem:[%s3231_s1 + $0x144] ss:$16 sps:$4 sm:$0xff]   ;;  %v2216_v4 = vld [vmem:[%s3231_s1 + $0x140] ss:$16 sps:$4 sm:$0xff]   ;;  %v2716_v13 = vrot.slane %v245_v54, %v2644_v49  ;;  %v2247_v27 = vld [vmem:[%s3231_s1 + $0xac] ss:$16 sps:$4 sm:$0xff]  }
  0x1d   :  { %1306 = vmatprep.subr.bf16.mxu1 %v2178_v29  ;;  %v2214_v2 = vld [vmem:[%s3231_s1 + $0x344] ss:$16 sps:$4 sm:$0xff]   ;;  %v2217_v5 = vld [vmem:[%s3231_s1 + $0x340] ss:$16 sps:$4 sm:$0xff]   ;;  %v2245_v29 = vld [vmem:[%s3231_s1 + $0xa8] ss:$16 sps:$4 sm:$0xff]  }
  0x1e   :  { %v275_v62 = vrot.slane %v253_v59, %v2644_v49  ;;  %v2674_v63 = vrot.slane %v252_v60, %v2644_v49  ;;  %v2218_v6 = vld [vmem:[%s3231_s1 + $0x124] ss:$16 sps:$4 sm:$0xff]   ;;  %v2222_v8 = vld [vmem:[%s3231_s1 + $0x120] ss:$16 sps:$4 sm:$0xff]   ;;  %v254_v17 = vcombine.high %v252_v60, %v252_v60  ;;  %v2729_v18 = vcombine.high %v2716_v13, %v2716_v13  ;;  %v2281_v54 = vld [vmem:[%s3231_s1 + $0x1e8] ss:$16 sps:$4 sm:$0xff]  }
  0x1f   :  { %1266 = vmatpush1.bf16.msra.mxu0 %v2180_v30  ;;  %v2220_v7 = vld [vmem:[%s3231_s1 + $0x324] ss:$16 sps:$4 sm:$0xff]   ;;  %v2223_v9 = vld [vmem:[%s3231_s1 + $0x320] ss:$16 sps:$4 sm:$0xff]   ;;  %v2295_v60 = vld [vmem:[%s3231_s1 + $0x1ac] ss:$16 sps:$4 sm:$0xff]  }
  0x20   :  { %1307 = vmatpush1.bf16.msra.mxu1 %v2181_v31  ;;  %1267 = vmatprep.subr.bf16.mxu0 %v2182_v32  ;;  %v2685_v3 = vcombine.high %v275_v62, %v275_v62  ;;  %v2224_v10 = vld [vmem:[%s3231_s1 + $0x104] ss:$16 sps:$4 sm:$0xff]   ;;  %v2228_v12 = vld [vmem:[%s3231_s1 + $0x100] ss:$16 sps:$4 sm:$0xff]   ;;  %v2744_v23 = vrot.slane %v254_v17, %v2644_v49  ;;  %v2253_v31 = vld [vmem:[%s3231_s1 + $0x8c] ss:$16 sps:$4 sm:$0xff]  }
  0x21   :  { %1308 = vmatprep.subr.bf16.mxu1 %v2184_v33  ;;  %1283 = vmatprep.mubr.bf16.mxu0 %v275_v62  ;;  %v2226_v11 = vld [vmem:[%s3231_s1 + $0x304] ss:$16 sps:$4 sm:$0xff]   ;;  %v2229_v14 = vld [vmem:[%s3231_s1 + $0x300] ss:$16 sps:$4 sm:$0xff]   ;;  %v2251_v33 = vld [vmem:[%s3231_s1 + $0x88] ss:$16 sps:$4 sm:$0xff]  }
  0x22   :  { %1324 = vmatprep.mubr.bf16.mxu1 %v2685_v3  ;;  %v2232_v15 = vld [vmem:[%s3231_s1 + $0x4e4] ss:$16 sps:$4 sm:$0xff]   ;;  %v2230_v19 = vld [vmem:[%s3231_s1 + $0x4e0] ss:$16 sps:$4 sm:$0xff]   ;;  %v2317_v17 = vld [vmem:[%s3231_s1 + $0x128] ss:$16 sps:$4 sm:$0xff]  }
  0x23   :  { %1268 = vmatpush2.bf16.msra.mxu0 %v2186_v34  ;;  %v2238_v21 = vld [vmem:[%s3231_s1 + $0x4c4] ss:$16 sps:$4 sm:$0xff]   ;;  %v2236_v24 = vld [vmem:[%s3231_s1 + $0x4c0] ss:$16 sps:$4 sm:$0xff]  }
  0x24   :  { %1309 = vmatpush2.bf16.msra.mxu1 %v2187_v35  ;;  %1269 = vmatprep.subr.bf16.mxu0 %v2188_v39  ;;  %v2244_v26 = vld [vmem:[%s3231_s1 + $0x4a4] ss:$16 sps:$4 sm:$0xff]   ;;  %v2242_v28 = vld [vmem:[%s3231_s1 + $0x4a0] ss:$16 sps:$4 sm:$0xff]   ;;  %v2259_v35 = vld [vmem:[%s3231_s1 + $0x6c] ss:$16 sps:$4 sm:$0xff]  }
  0x25   :  { %1310 = vmatprep.subr.bf16.mxu1 %v2190_v40  ;;  %v2250_v30 = vld [vmem:[%s3231_s1 + $0x484] ss:$16 sps:$4 sm:$0xff]   ;;  %v2248_v32 = vld [vmem:[%s3231_s1 + $0x480] ss:$16 sps:$4 sm:$0xff]   ;;  %v2265_v39 = vld [vmem:[%s3231_s1 + $0x4c] ss:$16 sps:$4 sm:$0xff]  }
  0x26   :  { %v2256_v34 = vld [vmem:[%s3231_s1 + $0x464] ss:$16 sps:$4 sm:$0xff]   ;;  %v2254_v36 = vld [vmem:[%s3231_s1 + $0x460] ss:$16 sps:$4 sm:$0xff]  }
  0x27   :  { %1270 = vmatpush2.bf16.msra.mxu0 %v2192_v41  ;;  %v2262_v38 = vld [vmem:[%s3231_s1 + $0x444] ss:$16 sps:$4 sm:$0xff]   ;;  %v2260_v40 = vld [vmem:[%s3231_s1 + $0x440] ss:$16 sps:$4 sm:$0xff]   ;;  %v2263_v41 = vld [vmem:[%s3231_s1 + $0x48] ss:$16 sps:$4 sm:$0xff]  }
  0x28   :  { %1311 = vmatpush2.bf16.msra.mxu1 %v2193_v44  ;;  %1271 = vmatprep.subr.bf16.mxu0 %v2194_v45  ;;  %v2268_v43 = vld [vmem:[%s3231_s1 + $0x424] ss:$16 sps:$4 sm:$0xff]   ;;  %v2271_v44 = vld [vmem:[%s3231_s1 + $0x2c] ss:$16 sps:$4 sm:$0xff]   ;;  %v2266_v45 = vld [vmem:[%s3231_s1 + $0x420] ss:$16 sps:$4 sm:$0xff]  }
  0x29   :  { %1312 = vmatprep.subr.bf16.mxu1 %v2196_v46  ;;  %v2269_v46 = vld [vmem:[%s3231_s1 + $0x28] ss:$16 sps:$4 sm:$0xff]   ;;  %v2272_v49 = vld [vmem:[%s3231_s1 + $0x400] ss:$16 sps:$4 sm:$0xff]   ;;  %v2286_v55 = vld [vmem:[%s3231_s1 + $0x5c4] ss:$16 sps:$4 sm:$0xff]  }
  0x2a   :  { %v2292_v59 = vld [vmem:[%s3231_s1 + $0x5a4] ss:$16 sps:$4 sm:$0xff]  }
  0x2b   :  { %1272 = vmatpush2.bf16.msra.mxu0 %v2198_v47  ;;  %v2274_v47 = vld [vmem:[%s3231_s1 + $0x404] ss:$16 sps:$4 sm:$0xff]  }
  0x2c   :  { %1313 = vmatpush2.bf16.msra.mxu1 %v2199_v48  ;;  %1273 = vmatprep.subr.bf16.mxu0 %v2200_v50  ;;  %v2277_v48 = vld [vmem:[%s3231_s1 + $0xc] ss:$16 sps:$4 sm:$0xff]   ;;  %v2275_v50 = vld [vmem:[%s3231_s1 + $0x8] ss:$16 sps:$4 sm:$0xff]  }
  0x2d   :  { %1314 = vmatprep.subr.bf16.mxu1 %v2202_v51  ;;  %v2280_v51 = vld [vmem:[%s3231_s1 + $0x5e4] ss:$16 sps:$4 sm:$0xff]  }
  0x2f   :  { %1274 = vmatpush2.bf16.msra.mxu0 %v2204_v53  ;;  %v2278_v53 = vld [vmem:[%s3231_s1 + $0x5e0] ss:$16 sps:$4 sm:$0xff]  }
  0x30   :  { %1315 = vmatpush2.bf16.msra.mxu1 %v2205_v56  ;;  %1275 = vmatprep.subr.bf16.mxu0 %v2206_v57  ;;  %v2289_v56 = vld [vmem:[%s3231_s1 + $0x1cc] ss:$16 sps:$4 sm:$0xff]   ;;  %v2284_v57 = vld [vmem:[%s3231_s1 + $0x5c0] ss:$16 sps:$4 sm:$0xff]  }
  0x31   :  { %1316 = vmatprep.subr.bf16.mxu1 %v2208_v58  ;;  %v2287_v58 = vld [vmem:[%s3231_s1 + $0x1c8] ss:$16 sps:$4 sm:$0xff]  }
  0x33   :  { %1276 = vmatpush2.bf16.msra.mxu0 %v2210_v61  ;;  %v2290_v61 = vld [vmem:[%s3231_s1 + $0x5a0] ss:$16 sps:$4 sm:$0xff]  }
  0x34   :  { %1317 = vmatpush2.bf16.msra.mxu1 %v2211_v0  ;;  %1277 = vmatprep.subr.bf16.mxu0 %v2212_v1  ;;  %v2298_v0 = vld [vmem:[%s3231_s1 + $0x584] ss:$16 sps:$4 sm:$0xff]   ;;  %v2301_v1 = vld [vmem:[%s3231_s1 + $0x18c] ss:$16 sps:$4 sm:$0xff]  }
  0x35   :  { %1318 = vmatprep.subr.bf16.mxu1 %v2214_v2  ;;  %v2296_v2 = vld [vmem:[%s3231_s1 + $0x580] ss:$16 sps:$4 sm:$0xff]  }
  0x37   :  { %1278 = vmatpush2.bf16.msra.mxu0 %v2216_v4  ;;  %v2299_v4 = vld [vmem:[%s3231_s1 + $0x188] ss:$16 sps:$4 sm:$0xff]  }
  0x38   :  { %1319 = vmatpush2.bf16.msra.mxu1 %v2217_v5  ;;  %1279 = vmatprep.subr.bf16.mxu0 %v2218_v6  ;;  %v2304_v5 = vld [vmem:[%s3231_s1 + $0x564] ss:$16 sps:$4 sm:$0xff]   ;;  %v2307_v6 = vld [vmem:[%s3231_s1 + $0x16c] ss:$16 sps:$4 sm:$0xff]  }
  0x39   :  { %1320 = vmatprep.subr.bf16.mxu1 %v2220_v7  ;;  %v2302_v7 = vld [vmem:[%s3231_s1 + $0x560] ss:$16 sps:$4 sm:$0xff]  }
  0x3b   :  { %1280 = vmatpush2.bf16.msra.mxu0 %v2222_v8  ;;  %v2305_v8 = vld [vmem:[%s3231_s1 + $0x168] ss:$16 sps:$4 sm:$0xff]  }
  0x3c   :  { %1321 = vmatpush2.bf16.msra.mxu1 %v2223_v9  ;;  %1281 = vmatprep.subr.bf16.mxu0 %v2224_v10  ;;  %v2310_v9 = vld [vmem:[%s3231_s1 + $0x544] ss:$16 sps:$4 sm:$0xff]   ;;  %v2313_v10 = vld [vmem:[%s3231_s1 + $0x14c] ss:$16 sps:$4 sm:$0xff]  }
  0x3d   :  { %1322 = vmatprep.subr.bf16.mxu1 %v2226_v11  ;;  %v2308_v11 = vld [vmem:[%s3231_s1 + $0x540] ss:$16 sps:$4 sm:$0xff]  }
  0x3f   :  { %1282 = vmatpush2.bf16.msra.mxu0 %v2228_v12  ;;  %v2311_v12 = vld [vmem:[%s3231_s1 + $0x148] ss:$16 sps:$4 sm:$0xff]  }
  0x40   :  { %1323 = vmatpush2.bf16.msra.mxu1 %v2229_v14  ;;  %1333 = vmatprep.subr.bf16.mxu0 %v2232_v15  ;;  %v2316_v14 = vld [vmem:[%s3231_s1 + $0x524] ss:$16 sps:$4 sm:$0xff]   ;;  %v2319_v15 = vld [vmem:[%s3231_s1 + $0x12c] ss:$16 sps:$4 sm:$0xff]  }
  0x41   :  { %1374 = vmatprep.subr.bf16.mxu1 %v2235_v16  ;;  %v2314_v16 = vld [vmem:[%s3231_s1 + $0x520] ss:$16 sps:$4 sm:$0xff]  }
  0x42   :  { %1284 = vmatmul.mubr.bf16.vlgmr.msra.gmra.mxu0 %v2716_v13 }
  0x43   :  { %1325 = vmatmul.mubr.bf16.vlgmr.msra.gmra.mxu1 %v2729_v18  ;;  %1334 = vmatpush1.bf16.msra.mxu0 %v2230_v19  ;;  %v2322_v19 = vld [vmem:[%s3231_s1 + $0x504] ss:$16 sps:$4 sm:$0xff]  }
  0x44   :  { %1375 = vmatpush1.bf16.msra.mxu1 %v2233_v20  ;;  %1335 = vmatprep.subr.bf16.mxu0 %v2238_v21  ;;  %v2325_v20 = vld [vmem:[%s3231_s1 + $0x10c] ss:$16 sps:$4 sm:$0xff]   ;;  %v2320_v21 = vld [vmem:[%s3231_s1 + $0x500] ss:$16 sps:$4 sm:$0xff]  }
  0x45   :  { %1376 = vmatprep.subr.bf16.mxu1 %v2241_v22  ;;  %1365 = vmatprep.mubr.bf16.mxu0 %v2744_v23  ;;  %v2323_v22 = vld [vmem:[%s3231_s1 + $0x108] ss:$16 sps:$4 sm:$0xff]  }
  0x46   :  { %1406 = vmatprep.mubr.bf16.mxu1 %v275_v62  ;;  %v2293_v62 = vld [vmem:[%s3231_s1 + $0x1a8] ss:$16 sps:$4 sm:$0xff]  }
  0x47   :  { %1336 = vmatpush1.bf16.msra.mxu0 %v2236_v24  ;;  %v2329_v24 = vld [vmem:[%s3231_s1 + $0x2ec] ss:$16 sps:$4 sm:$0xff]  }
  0x48   :  { %1377 = vmatpush1.bf16.msra.mxu1 %v2239_v25  ;;  %1337 = vmatprep.subr.bf16.mxu0 %v2244_v26  ;;  %v2332_v25 = vld [vmem:[%s3231_s1 + $0x4ec] ss:$16 sps:$4 sm:$0xff]   ;;  %v2327_v26 = vld [vmem:[%s3231_s1 + $0x2e8] ss:$16 sps:$4 sm:$0xff]  }
  0x49   :  { %1378 = vmatprep.subr.bf16.mxu1 %v2247_v27  ;;  %v2330_v27 = vld [vmem:[%s3231_s1 + $0x4e8] ss:$16 sps:$4 sm:$0xff]  }
  0x4b   :  { %1338 = vmatpush1.bf16.msra.mxu0 %v2242_v28  ;;  %v2335_v28 = vld [vmem:[%s3231_s1 + $0x2cc] ss:$16 sps:$4 sm:$0xff]  }
  0x4c   :  { %1379 = vmatpush1.bf16.msra.mxu1 %v2245_v29  ;;  %1339 = vmatprep.subr.bf16.mxu0 %v2250_v30  ;;  %v2338_v29 = vld [vmem:[%s3231_s1 + $0x4cc] ss:$16 sps:$4 sm:$0xff]   ;;  %v2333_v30 = vld [vmem:[%s3231_s1 + $0x2c8] ss:$16 sps:$4 sm:$0xff]  }
  0x4d   :  { %1380 = vmatprep.subr.bf16.mxu1 %v2253_v31  ;;  %v2336_v31 = vld [vmem:[%s3231_s1 + $0x4c8] ss:$16 sps:$4 sm:$0xff]  }
  0x4f   :  { %1340 = vmatpush1.bf16.msra.mxu0 %v2248_v32  ;;  %v2341_v32 = vld [vmem:[%s3231_s1 + $0x2ac] ss:$16 sps:$4 sm:$0xff]  }
  0x50   :  { %1381 = vmatpush1.bf16.msra.mxu1 %v2251_v33  ;;  %1341 = vmatprep.subr.bf16.mxu0 %v2256_v34  ;;  %v2344_v33 = vld [vmem:[%s3231_s1 + $0x4ac] ss:$16 sps:$4 sm:$0xff]   ;;  %v2339_v34 = vld [vmem:[%s3231_s1 + $0x2a8] ss:$16 sps:$4 sm:$0xff]  }
  0x51   :  { %1382 = vmatprep.subr.bf16.mxu1 %v2259_v35  ;;  %v2347_v35 = vld [vmem:[%s3231_s1 + $0x28c] ss:$16 sps:$4 sm:$0xff]  }
  0x53   :  { %1342 = vmatpush1.bf16.msra.mxu0 %v2254_v36  ;;  %v2350_v36 = vld [vmem:[%s3231_s1 + $0x48c] ss:$16 sps:$4 sm:$0xff]  }
  0x54   :  { %1383 = vmatpush1.bf16.msra.mxu1 %v2257_v37  ;;  %1343 = vmatprep.subr.bf16.mxu0 %v2262_v38  ;;  %v2345_v37 = vld [vmem:[%s3231_s1 + $0x288] ss:$16 sps:$4 sm:$0xff]   ;;  %v2356_v38 = vld [vmem:[%s3231_s1 + $0x46c] ss:$16 sps:$4 sm:$0xff]  }
  0x55   :  { %1384 = vmatprep.subr.bf16.mxu1 %v2265_v39  ;;  %v2351_v39 = vld [vmem:[%s3231_s1 + $0x268] ss:$16 sps:$4 sm:$0xff]  }
  0x57   :  { %1344 = vmatpush1.bf16.msra.mxu0 %v2260_v40  ;;  %v2354_v40 = vld [vmem:[%s3231_s1 + $0x468] ss:$16 sps:$4 sm:$0xff]  }
  0x58   :  { %1385 = vmatpush1.bf16.msra.mxu1 %v2263_v41  ;;  %1345 = vmatprep.subr.bf16.mxu0 %v2268_v43  ;;  %v2359_v41 = vld [vmem:[%s3231_s1 + $0x24c] ss:$16 sps:$4 sm:$0xff]  }
  0x59   :  { %1386 = vmatprep.subr.bf16.mxu1 %v2271_v44  ;;  %v2362_v43 = vld [vmem:[%s3231_s1 + $0x44c] ss:$16 sps:$4 sm:$0xff]   ;;  %v2357_v44 = vld [vmem:[%s3231_s1 + $0x248] ss:$16 sps:$4 sm:$0xff]  }
  0x5b   :  { %1346 = vmatpush1.bf16.msra.mxu0 %v2266_v45  ;;  %v2360_v45 = vld [vmem:[%s3231_s1 + $0x448] ss:$16 sps:$4 sm:$0xff]  }
  0x5c   :  { %1387 = vmatpush1.bf16.msra.mxu1 %v2269_v46  ;;  %1347 = vmatprep.subr.bf16.mxu0 %v2274_v47  ;;  %v2365_v46 = vld [vmem:[%s3231_s1 + $0x22c] ss:$16 sps:$4 sm:$0xff]  }
  0x5d   :  { %1388 = vmatprep.subr.bf16.mxu1 %v2277_v48  ;;  %v2368_v47 = vld [vmem:[%s3231_s1 + $0x42c] ss:$16 sps:$4 sm:$0xff]   ;;  %v2363_v48 = vld [vmem:[%s3231_s1 + $0x228] ss:$16 sps:$4 sm:$0xff]  }
  0x5f   :  { %1348 = vmatpush1.bf16.msra.mxu0 %v2272_v49  ;;  %v2366_v49 = vld [vmem:[%s3231_s1 + $0x428] ss:$16 sps:$4 sm:$0xff]  }
  0x60   :  { %1389 = vmatpush1.bf16.msra.mxu1 %v2275_v50  ;;  %1349 = vmatprep.subr.bf16.mxu0 %v2280_v51  ;;  %v2371_v50 = vld [vmem:[%s3231_s1 + $0x20c] ss:$16 sps:$4 sm:$0xff]  }
  0x61   :  { %1390 = vmatprep.subr.bf16.mxu1 %v2283_v52  ;;  %v2374_v51 = vld [vmem:[%s3231_s1 + $0x40c] ss:$16 sps:$4 sm:$0xff]  }
  0x63   :  { %1350 = vmatpush2.bf16.msra.mxu0 %v2278_v53 }
  0x64   :  { %1391 = vmatpush2.bf16.msra.mxu1 %v2281_v54  ;;  %1351 = vmatprep.subr.bf16.mxu0 %v2286_v55 }
  0x65   :  { %1392 = vmatprep.subr.bf16.mxu1 %v2289_v56 }
  0x67   :  { %1352 = vmatpush2.bf16.msra.mxu0 %v2284_v57 }
  0x68   :  { %1393 = vmatpush2.bf16.msra.mxu1 %v2287_v58  ;;  %1353 = vmatprep.subr.bf16.mxu0 %v2292_v59 }
  0x69   :  { %1394 = vmatprep.subr.bf16.mxu1 %v2295_v60 }
  0x6b   :  { %1354 = vmatpush2.bf16.msra.mxu0 %v2290_v61 }
  0x6c   :  { %1395 = vmatpush2.bf16.msra.mxu1 %v2293_v62  ;;  %1355 = vmatprep.subr.bf16.mxu0 %v2298_v0 }
  0x6d   :  { %1396 = vmatprep.subr.bf16.mxu1 %v2301_v1 }
  0x6f   :  { %1356 = vmatpush2.bf16.msra.mxu0 %v2296_v2 }
  0x70   :  { %1397 = vmatpush2.bf16.msra.mxu1 %v2299_v4  ;;  %1357 = vmatprep.subr.bf16.mxu0 %v2304_v5 }
  0x71   :  { %1398 = vmatprep.subr.bf16.mxu1 %v2307_v6 }
  0x73   :  { %1358 = vmatpush2.bf16.msra.mxu0 %v2302_v7 }
  0x74   :  { %1399 = vmatpush2.bf16.msra.mxu1 %v2305_v8  ;;  %1359 = vmatprep.subr.bf16.mxu0 %v2310_v9 }
  0x75   :  { %1400 = vmatprep.subr.bf16.mxu1 %v2313_v10 }
  0x77   :  { %1360 = vmatpush2.bf16.msra.mxu0 %v2308_v11 }
  0x78   :  { %1401 = vmatpush2.bf16.msra.mxu1 %v2311_v12  ;;  %1361 = vmatprep.subr.bf16.mxu0 %v2316_v14 }
  0x79   :  { %1402 = vmatprep.subr.bf16.mxu1 %v2319_v15 }
  0x7b   :  { %1362 = vmatpush2.bf16.msra.mxu0 %v2314_v16 }
  0x7c   :  { %1403 = vmatpush2.bf16.msra.mxu1 %v2317_v17  ;;  %1363 = vmatprep.subr.bf16.mxu0 %v2322_v19 }
  0x7d   :  { %1404 = vmatprep.subr.bf16.mxu1 %v2325_v20 }
  0x7f   :  { %1364 = vmatpush2.bf16.msra.mxu0 %v2320_v21 }
  0x80   :  { %1405 = vmatpush2.bf16.msra.mxu1 %v2323_v22  ;;  %1415 = vmatprep.subr.bf16.mxu0 %v2329_v24 }
  0x81   :  { %1456 = vmatprep.subr.bf16.mxu1 %v2332_v25 }
  0x82   :  { %1366 = vmatmul.mubr.bf16.vlgmr.msra.gmra.mxu0 %v2674_v63 }
  0x83   :  { %1407 = vmatmul.mubr.bf16.vlgmr.msra.gmra.mxu1 %v2716_v13  ;;  %1416 = vmatpush1.bf16.msra.mxu0 %v2327_v26  ;;  %v2342_v13 = vld [vmem:[%s3231_s1 + $0x4a8] ss:$16 sps:$4 sm:$0xff]  }
  0x84   :  { %1457 = vmatpush1.bf16.msra.mxu1 %v2330_v27  ;;  %1417 = vmatprep.subr.bf16.mxu0 %v2335_v28 }
  0x85   :  { %1458 = vmatprep.subr.bf16.mxu1 %v2338_v29  ;;  %1447 = vmatprep.mubr.bf16.mxu0 %v2685_v3  ;;  %v2348_v3 = vld [vmem:[%s3231_s1 + $0x488] ss:$16 sps:$4 sm:$0xff]  }
  0x86   :  { %1488 = vmatprep.mubr.bf16.mxu1 %v2744_v23  ;;  %v2353_v23 = vld [vmem:[%s3231_s1 + $0x26c] ss:$16 sps:$4 sm:$0xff]  }
  0x87   :  { %1418 = vmatpush1.bf16.msra.mxu0 %v2333_v30 }
  0x88   :  { %1459 = vmatpush1.bf16.msra.mxu1 %v2336_v31  ;;  %1419 = vmatprep.subr.bf16.mxu0 %v2341_v32 }
  0x89   :  { %1460 = vmatprep.subr.bf16.mxu1 %v2344_v33 }
  0x8b   :  { %1420 = vmatpush1.bf16.msra.mxu0 %v2339_v34 }
  0x8c   :  { %1461 = vmatpush1.bf16.msra.mxu1 %v2342_v13  ;;  %1421 = vmatprep.subr.bf16.mxu0 %v2347_v35 }
  0x8d   :  { %1462 = vmatprep.subr.bf16.mxu1 %v2350_v36 }
  0x8f   :  { %1422 = vmatpush1.bf16.msra.mxu0 %v2345_v37 }
  0x90   :  { %1463 = vmatpush1.bf16.msra.mxu1 %v2348_v3  ;;  %1423 = vmatprep.subr.bf16.mxu0 %v2353_v23 }
  0x91   :  { %1464 = vmatprep.subr.bf16.mxu1 %v2356_v38 }
  0x93   :  { %1424 = vmatpush1.bf16.msra.mxu0 %v2351_v39 }
  0x94   :  { %1465 = vmatpush1.bf16.msra.mxu1 %v2354_v40  ;;  %1425 = vmatprep.subr.bf16.mxu0 %v2359_v41 }
  0x95   :  { %1466 = vmatprep.subr.bf16.mxu1 %v2362_v43 }
  0x97   :  { %1426 = vmatpush1.bf16.msra.mxu0 %v2357_v44 }
  0x98   :  { %1467 = vmatpush1.bf16.msra.mxu1 %v2360_v45  ;;  %1427 = vmatprep.subr.bf16.mxu0 %v2365_v46 }
  0x99   :  { %1468 = vmatprep.subr.bf16.mxu1 %v2368_v47 }
  0x9a   :  { %10 = vsyncpa [#allocation3], 0  ;;  %v2369_v52 = vld [vmem:[%s3231_s1 + $0x208] ss:$16 sps:$4 sm:$0xff]   ;;  %v2377_v54 = vld [vmem:[%s3231_s1 + $0x3ec] ss:$16 sps:$4 sm:$0xff]  }
  0x9b   :  { %1428 = vmatpush1.bf16.msra.mxu0 %v2363_v48  ;;  %v2372_v53 = vld [vmem:[%s3231_s1 + $0x408] ss:$16 sps:$4 sm:$0xff]   ;;  %v2380_v55 = vld [vmem:[%s3231_s1 + $0x5ec] ss:$16 sps:$4 sm:$0xff]   ;;  %v2425_v29 = vld [vmem:[%s3233_s3 + $0x70] sm:$0xff]   ;;  %s2478_s28 = smov [#allocation2]  }
  0x9c   :  { %1469 = vmatpush1.bf16.msra.mxu1 %v2366_v49  ;;  %1429 = vmatprep.subr.bf16.mxu0 %v2371_v50  ;;  %v2375_v56 = vld [vmem:[%s3231_s1 + $0x3e8] ss:$16 sps:$4 sm:$0xff]   ;;  %v2383_v58 = vld [vmem:[%s3231_s1 + $0x3cc] ss:$16 sps:$4 sm:$0xff]   ;;  %v2426_v30 = vld [vmem:[%s3233_s3 + $0x30] sm:$0xff]   ;;  %s1855_s29 = sshll.u32 %s2478_s28, 4  ;;  %s1856_s29 = int_to_ptr.vmem [resolvable:$true] %s1855_s29 }
  0x9d   :  { %1470 = vmatprep.subr.bf16.mxu1 %v2374_v51  ;;  %v2378_v57 = vld [vmem:[%s3231_s1 + $0x5e8] ss:$16 sps:$4 sm:$0xff]   ;;  %v2386_v59 = vld [vmem:[%s3231_s1 + $0x5cc] ss:$16 sps:$4 sm:$0xff]   ;;  %v2441_v35 = vld [vmem:[%s3233_s3 + $0xf0] sm:$0xff]   ;;  %s2455_s30 = scalar_lea.vmem %s1856_s29, 32  ;;  %p2460_p1 = scmp.lt.s32.totalorder %s1856_s29, %s1856_s29 }
  0x9e   :  { %v2381_v60 = vld [vmem:[%s3231_s1 + $0x3c8] ss:$16 sps:$4 sm:$0xff]   ;;  %v2389_v62 = vld [vmem:[%s3231_s1 + $0x3ac] ss:$16 sps:$4 sm:$0xff]   ;;  %v2442_v37 = vld [vmem:[%s3233_s3 + $0xb0] sm:$0xff]   ;;  %p2456_p0 = scmp.ne.s32.totalorder %s1856_s29, %s2455_s30  ;;  %p2461_p2 = scmp.lt.s32.totalorder %s2455_s30, %s2455_s30 }
  0x9f   :  { %1430 = vmatpush1.bf16.msra.mxu0 %v2369_v52  ;;  %v2384_v61 = vld [vmem:[%s3231_s1 + $0x5c8] ss:$16 sps:$4 sm:$0xff]   ;;  %v2392_v0 = vld [vmem:[%s3231_s1 + $0x5ac] ss:$16 sps:$4 sm:$0xff]   ;;  %v2433_v3 = vld [vmem:[%s3233_s3 + $0x50] sm:$0xff]  }
  0xa0   :  { %1471 = vmatpush1.bf16.msra.mxu1 %v2372_v53  ;;  %1431 = vmatprep.subr.bf16.mxu0 %v2377_v54  ;;  %v2387_v1 = vld [vmem:[%s3231_s1 + $0x3a8] ss:$16 sps:$4 sm:$0xff]   ;;  %v2395_v4 = vld [vmem:[%s3231_s1 + $0x38c] ss:$16 sps:$4 sm:$0xff]   ;;  %v2434_v38 = vld [vmem:[%s3233_s3 + $0x10] sm:$0xff]   ;;  %p2462_p3 = por %p2461_p2, %p2460_p1 }
  0xa1   :  { %1472 = vmatprep.subr.bf16.mxu1 %v2380_v55  ;;  %v2390_v2 = vld [vmem:[%s3231_s1 + $0x5a8] ss:$16 sps:$4 sm:$0xff]   ;;  %v2398_v5 = vld [vmem:[%s3231_s1 + $0x58c] ss:$16 sps:$4 sm:$0xff]   ;;  %v2445_v41 = vld [vmem:[%s3233_s3 + $0xe0] sm:$0xff]  }
  0xa2   :  { %v2393_v6 = vld [vmem:[%s3231_s1 + $0x388] ss:$16 sps:$4 sm:$0xff]   ;;  %v2401_v8 = vld [vmem:[%s3231_s1 + $0x36c] ss:$16 sps:$4 sm:$0xff]   ;;  %v2446_v44 = vld [vmem:[%s3233_s3 + $0xa0] sm:$0xff]   ;;  %p2463_p4 = pnand %p2462_p3, %p2456_p0 }
  0xa3   :  { %1432 = vmatpush2.bf16.msra.mxu0 %v2375_v56  ;;  %v2396_v7 = vld [vmem:[%s3231_s1 + $0x588] ss:$16 sps:$4 sm:$0xff]   ;;  %v2404_v9 = vld [vmem:[%s3231_s1 + $0x56c] ss:$16 sps:$4 sm:$0xff]   ;;  %v2437_v45 = vld [vmem:[%s3233_s3 + $0x40] sm:$0xff]  }
  0xa4   :  { %1473 = vmatpush2.bf16.msra.mxu1 %v2378_v57  ;;  %1433 = vmatprep.subr.bf16.mxu0 %v2383_v58  ;;  %v2399_v10 = vld [vmem:[%s3231_s1 + $0x368] ss:$16 sps:$4 sm:$0xff]   ;;  %v2407_v12 = vld [vmem:[%s3231_s1 + $0x34c] ss:$16 sps:$4 sm:$0xff]   ;;  %v2438_v47 = vld [vmem:[%s3233_s3] sm:$0xff]  }
  0xa5   :  { %1474 = vmatprep.subr.bf16.mxu1 %v2386_v59  ;;  %v2402_v11 = vld [vmem:[%s3231_s1 + $0x568] ss:$16 sps:$4 sm:$0xff]   ;;  %v2410_v14 = vld [vmem:[%s3231_s1 + $0x54c] ss:$16 sps:$4 sm:$0xff]   ;;  %v2449_v49 = vld [vmem:[%s3233_s3 + $0xd0] sm:$0xff]  }
  0xa6   :  { %v2405_v15 = vld [vmem:[%s3231_s1 + $0x348] ss:$16 sps:$4 sm:$0xff]   ;;  %v2413_v17 = vld [vmem:[%s3231_s1 + $0x32c] ss:$16 sps:$4 sm:$0xff]   ;;  %v2450_v50 = vld [vmem:[%s3233_s3 + $0x90] sm:$0xff]  }
  0xa7   :  { %1434 = vmatpush2.bf16.msra.mxu0 %v2381_v60  ;;  %v2408_v16 = vld [vmem:[%s3231_s1 + $0x548] ss:$16 sps:$4 sm:$0xff]   ;;  %v2416_v19 = vld [vmem:[%s3231_s1 + $0x52c] ss:$16 sps:$4 sm:$0xff]  }
  0xa8   :  { %1475 = vmatpush2.bf16.msra.mxu1 %v2384_v61  ;;  %1435 = vmatprep.subr.bf16.mxu0 %v2389_v62  ;;  %v2411_v20 = vld [vmem:[%s3231_s1 + $0x328] ss:$16 sps:$4 sm:$0xff]   ;;  %v2419_v22 = vld [vmem:[%s3231_s1 + $0x30c] ss:$16 sps:$4 sm:$0xff]   ;;  %v2453_v61 = vld [vmem:[%s3233_s3 + $0xc0] sm:$0xff]  }
  0xa9   :  { %1476 = vmatprep.subr.bf16.mxu1 %v2392_v0  ;;  %v2414_v21 = vld [vmem:[%s3231_s1 + $0x528] ss:$16 sps:$4 sm:$0xff]   ;;  %v2422_v24 = vld [vmem:[%s3231_s1 + $0x50c] ss:$16 sps:$4 sm:$0xff]   ;;  %v2454_v62 = vld [vmem:[%s3233_s3 + $0x80] sm:$0xff]   ;;  %v219_v0 = vsub.s32 0, %v2626_v42 }
  0xaa   :  { %v2417_v25 = vld [vmem:[%s3231_s1 + $0x308] ss:$16 sps:$4 sm:$0xff]  }
  0xab   :  { %1436 = vmatpush2.bf16.msra.mxu0 %v2387_v1  ;;  %v2420_v26 = vld [vmem:[%s3231_s1 + $0x508] ss:$16 sps:$4 sm:$0xff]   ;;  %v215_v1 = vld [vmem:[%s3232_s2] sm:$0xf] }
  0xac   :  { %1477 = vmatpush2.bf16.msra.mxu1 %v2390_v2  ;;  %1437 = vmatprep.subr.bf16.mxu0 %v2395_v4  ;;  %v2423_v27 = vld [vmem:[%s3233_s3 + $0x78] sm:$0xff]   ;;  %v2427_v31 = vld [vmem:[%s3233_s3 + $0x68] sm:$0xff]   ;;  %v223_v2 = vsub.s32 1, %v2626_v42  ;;  %v220_v4 = vrot.slane %v215_v1, %v219_v0 }
  0xad   :  { %1478 = vmatprep.subr.bf16.mxu1 %v2398_v5  ;;  %v2424_v28 = vld [vmem:[%s3233_s3 + $0x38] sm:$0xff]   ;;  %v2428_v32 = vld [vmem:[%s3233_s3 + $0x28] sm:$0xff]  }
  0xae   :  { %v2431_v33 = vld [vmem:[%s3233_s3 + $0x58] sm:$0xff]   ;;  %v2443_v23 = vld [vmem:[%s3233_s3 + $0xe8] sm:$0xff]   ;;  %v224_v5 = vrot.slane %v215_v1, %v223_v2 }
  0xaf   :  { %1438 = vmatpush2.bf16.msra.mxu0 %v2393_v6  ;;  %v2439_v34 = vld [vmem:[%s3233_s3 + $0xf8] sm:$0xff]   ;;  %v2444_v39 = vld [vmem:[%s3233_s3 + $0xa8] sm:$0xff]  }
  0xb0   :  { %1479 = vmatpush2.bf16.msra.mxu1 %v2396_v7  ;;  %1439 = vmatprep.subr.bf16.mxu0 %v2401_v8  ;;  %v2440_v13 = vld [vmem:[%s3233_s3 + $0xb8] sm:$0xff]   ;;  %v2435_v40 = vld [vmem:[%s3233_s3 + $0x48] sm:$0xff]  }
  0xb1   :  { %1480 = vmatprep.subr.bf16.mxu1 %v2404_v9  ;;  %v2432_v36 = vld [vmem:[%s3233_s3 + $0x18] sm:$0xff]   ;;  %v2436_v43 = vld [vmem:[%s3233_s3 + $0x8] sm:$0xff]  }
  0xb2   :  { %v2447_v46 = vld [vmem:[%s3233_s3 + $0xd8] sm:$0xff]   ;;  %v2451_v55 = vld [vmem:[%s3233_s3 + $0xc8] sm:$0xff]  }
  0xb3   :  { %1440 = vmatpush2.bf16.msra.mxu0 %v2399_v10  ;;  %v2448_v48 = vld [vmem:[%s3233_s3 + $0x98] sm:$0xff]   ;;  %v2452_v56 = vld [vmem:[%s3233_s3 + $0x88] sm:$0xff]  }
  0xb4   :  { %1481 = vmatpush2.bf16.msra.mxu1 %v2402_v11  ;;  %1441 = vmatprep.subr.bf16.mxu0 %v2407_v12 }
  0xb5   :  { %1482 = vmatprep.subr.bf16.mxu1 %v2410_v14 }
  0xb7   :  { %1442 = vmatpush2.bf16.msra.mxu0 %v2405_v15 }
  0xb8   :  { %1483 = vmatpush2.bf16.msra.mxu1 %v2408_v16  ;;  %1443 = vmatprep.subr.bf16.mxu0 %v2413_v17 }
  0xb9   :  { %1484 = vmatprep.subr.bf16.mxu1 %v2416_v19 }
  0xbb   :  { %1444 = vmatpush2.bf16.msra.mxu0 %v2411_v20 }
  0xbc   :  { %1485 = vmatpush2.bf16.msra.mxu1 %v2414_v21  ;;  %1445 = vmatprep.subr.bf16.mxu0 %v2419_v22 }
  0xbd   :  { %1486 = vmatprep.subr.bf16.mxu1 %v2422_v24 }
  0xbf   :  { %1446 = vmatpush2.bf16.msra.mxu0 %v2417_v25 }
  0xc0   :  { %1487 = vmatpush2.bf16.msra.mxu1 %v2420_v26  ;;  %2088 = vmatprep.subr.bf16.mxu0 %v2423_v27  ;;  %v227_v27 = vsub.s32 2, %v2626_v42 }
  0xc1   :  { %2110 = vmatprep.subr.bf16.mxu1 %v2439_v34 }
  0xc2   :  { %1448 = vmatmul.mubr.bf16.vlgmr.msra.gmra.mxu0 %v2729_v18  ;;  %v2430_v18 = vld [vmem:[%s3233_s3 + $0x20] sm:$0xff]  }
  0xc3   :  { %1489 = vmatmul.mubr.bf16.vlgmr.msra.gmra.mxu1 %v2674_v63  ;;  %2089 = vmatpush3.bf16.msra.mxu0 %v2424_v28  ;;  %v2429_v63 = vld [vmem:[%s3233_s3 + $0x60] sm:$0xff]   ;;  %v231_v28 = vsub.s32 3, %v2626_v42 }
  0xc4   :  { %2090 = vmatprep.subr.bf16.mxu0 %v2425_v29  ;;  %2111 = vmatpush3.bf16.msra.mxu1 %v2440_v13  ;;  %v228_v29 = vrot.slane %v215_v1, %v227_v27 }
  0xc5   :  { %2112 = vmatprep.subr.bf16.mxu1 %v2441_v35 }
  0xc7   :  { %2091 = vmatpush3.bf16.msra.mxu0 %v2426_v30  ;;  %v232_v30 = vrot.slane %v215_v1, %v231_v28 }
  0xc8   :  { %2092 = vmatprep.subr.bf16.mxu0 %v2427_v31  ;;  %2113 = vmatpush3.bf16.msra.mxu1 %v2442_v37 }
  0xc9   :  { %2114 = vmatprep.subr.bf16.mxu1 %v2443_v23 }
  0xcb   :  { %2093 = vmatpush3.bf16.msra.mxu0 %v2428_v32 }
  0xcc   :  { %2094 = vmatprep.subr.bf16.mxu0 %v2429_v63  ;;  %2115 = vmatpush3.bf16.msra.mxu1 %v2444_v39 }
  0xcd   :  { %2116 = vmatprep.subr.bf16.mxu1 %v2445_v41 }
  0xcf   :  { %2095 = vmatpush3.bf16.msra.mxu0 %v2430_v18 }
  0xd0   :  { %2096 = vmatprep.subr.bf16.mxu0 %v2431_v33  ;;  %2117 = vmatpush3.bf16.msra.mxu1 %v2446_v44 }
  0xd1   :  { %2118 = vmatprep.subr.bf16.mxu1 %v2447_v46 }
  0xd3   :  { %2097 = vmatpush3.bf16.msra.mxu0 %v2432_v36 }
  0xd4   :  { %2098 = vmatprep.subr.bf16.mxu0 %v2433_v3  ;;  %2119 = vmatpush3.bf16.msra.mxu1 %v2448_v48 }
  0xd5   :  { %2120 = vmatprep.subr.bf16.mxu1 %v2449_v49  ;;  %v2055_v49 = vld [vmem:[%s3234_s4] ss:$0 sm:$0xff] }
  0xd7   :  { %2099 = vmatpush3.bf16.msra.mxu0 %v2434_v38 }
  0xd8   :  { %2100 = vmatprep.subr.bf16.mxu0 %v2435_v40  ;;  %2121 = vmatpush3.bf16.msra.mxu1 %v2450_v50 }
  0xd9   :  { %2122 = vmatprep.subr.bf16.mxu1 %v2451_v55 }
  0xdb   :  { %2101 = vmatpush3.bf16.msra.mxu0 %v2436_v43 }
  0xdc   :  { %2102 = vmatprep.subr.bf16.mxu0 %v2437_v45  ;;  %2123 = vmatpush3.bf16.msra.mxu1 %v2452_v56 }
  0xdd   :  { %2124 = vmatprep.subr.bf16.mxu1 %v2453_v61 }
  0xdf   :  { %2103 = vmatpush3.bf16.msra.mxu0 %v2438_v47 }
  0xe0   :  { %2125 = vmatpush3.bf16.msra.mxu1 %v2454_v62 }
 0x102   :  { %v1285_v51 = vpop.f32.mrf.mxu0 }
 0x103   :  { %v1326_v52 = vpop.f32.mrf.mxu1  ;;  %v1286_v6 = vadd.f32 %v1285_v51, %v220_v4 }
 0x104   :  { %v1287_v53 = vpop.f32.mrf.mxu0 }
 0x105   :  { %v1328_v54 = vpop.f32.mrf.mxu1  ;;  %v1288_v7 = vadd.f32 %v1287_v53, %v224_v5  ;;  %v1327_v8 = vadd.f32 %v1326_v52, %v1286_v6 }
 0x106   :  { %v1289_v57 = vpop.f32.mrf.mxu0 }
 0x107   :  { %v1330_v58 = vpop.f32.mrf.mxu1  ;;  %v1329_v11 = vadd.f32 %v1328_v54, %v1288_v7 }
 0x108   :  { %v1290_v59 = vpop.f32.mrf.mxu0 }
 0x109   :  { %v1331_v60 = vpop.f32.mrf.mxu1 }
 0x142   :  { %v1367_v9 = vpop.f32.mrf.mxu0 }
 0x143   :  { %v1408_v10 = vpop.f32.mrf.mxu1  ;;  %v1368_v12 = vadd.f32 %v1367_v9, %v1327_v8 }
 0x144   :  { %v1369_v14 = vpop.f32.mrf.mxu0  ;;  %v1409_v31 = vadd.f32 %v1408_v10, %v228_v29 }
 0x145   :  { %v1410_v15 = vpop.f32.mrf.mxu1  ;;  %v1370_v16 = vadd.f32 %v1369_v14, %v1329_v11  ;;  %v1497_v17 = vmax.f32 %v1368_v12, 0.0 }
 0x146   :  { %v1371_v19 = vpop.f32.mrf.mxu0  ;;  %v1411_v18 = vadd.f32 %v1410_v15, %v232_v30 }
 0x147   :  { %v1412_v20 = vpop.f32.mrf.mxu1  ;;  %v1498_v21 = vmax.f32 %v1370_v16, 0.0  ;;  %v1501_v26 = vpack.c.bf16 %v1497_v17, %v1497_v17 }
 0x148   :  { %v1372_v22 = vpop.f32.mrf.mxu0 }
 0x149   :  { %v1413_v24 = vpop.f32.mrf.mxu1  ;;  %v1502_v25 = vpack.c.bf16 %v1498_v21, %v1498_v21 }
 0x14b   :  { %1800 = vmatprep.mubr.bf16.mxu0 %v1502_v25 }
 0x14c   :  { %1801 = vmatmul.mubr.bf16.vlgmr.msra.gmra.mxu0 %v1501_v26 }
 0x182   :  { %v1449_v32 = vpop.f32.mrf.mxu0 }
 0x183   :  { %v1490_v63 = vpop.f32.mrf.mxu1  ;;  %v1450_v33 = vadd.f32 %v1449_v32, %v1409_v31 }
 0x184   :  { %v1451_v34 = vpop.f32.mrf.mxu0 }
 0x185   :  { %v1492_v13 = vpop.f32.mrf.mxu1  ;;  %v1491_v35 = vadd.f32 %v1490_v63, %v1450_v33  ;;  %v1452_v36 = vadd.f32 %v1451_v34, %v1411_v18 }
 0x186   :  { %v1453_v37 = vpop.f32.mrf.mxu0 }
 0x187   :  { %v1494_v3 = vpop.f32.mrf.mxu1  ;;  %v1493_v23 = vadd.f32 %v1492_v13, %v1452_v36  ;;  %v1499_v38 = vmax.f32 %v1491_v35, 0.0 }
 0x188   :  { %v1454_v39 = vpop.f32.mrf.mxu0 }
 0x189   :  { %v1495_v40 = vpop.f32.mrf.mxu1  ;;  %v1500_v41 = vmax.f32 %v1493_v23, 0.0  ;;  %v1503_v42 = vpack.c.bf16 %v1499_v38, %v1499_v38 }
 0x18b   :  { %v1504_v43 = vpack.c.bf16 %v1500_v41, %v1500_v41 }
 0x18d   :  { %1840 = vmatprep.mubr.bf16.mxu1 %v1504_v43 }
 0x18e   :  { %1841 = vmatmul.mubr.bf16.vlgmr.msra.gmra.mxu1 %v1503_v42 }
 0x20c   :  { %v2104_v44 = vpop.f32.mrf.mxu0 }
 0x20e   :  { %v2105_v45 = vpop.f32.mrf.mxu0 }
 0x20f   :  { %v2106_v46 = vadd.f32 %v2105_v45, %v2104_v44 }
 0x210   :  { %v2107_v47 = vpop.f32.mrf.mxu0 }
 0x211   :  { %v1803_v52 = vadd.f32 %v2106_v46, %v2055_v49 }
 0x212   :  { %v2108_v48 = vpop.f32.mrf.mxu0 }
 0x24e   :  { %v2126_v50 = vpop.f32.mrf.mxu1 }
 0x250   :  { %v2127_v51 = vpop.f32.mrf.mxu1 }
 0x251   :  { %v2128_v53 = vadd.f32 %v2127_v51, %v2126_v50 }
 0x252   :  { %v2129_v54 = vpop.f32.mrf.mxu1 }
 0x253   :  { %v1843_v55 = vadd.f32 %v2128_v53, %v1803_v52 }
 0x254   :  { %v2130_v56 = vpop.f32.mrf.mxu1 }
 0x255   :  { %1848 = vst [vmem:[#allocation2] sm:$0x3] %v1843_v55 }
 0x256   :  { %2466 = shalt.err (!%p2463_p4)
}
 0x257   :  { %1858 = dma.vmem_to_hbm [thread:$0]  %s1856_s29, 32, %s3235_s5, [#allocation3]  }
 0x258   :  { %2475 = dma.done.wait [#allocation3], 32  }
 0x259   :  { %2476 = vsyncadd [#allocation3], 4294967264 }
 0x25a   :  { %1862 = vsyncpa [#allocation3], 1 }

</bundles_post_ra>
